<compile_context>
chip_gen: v5e
topology: v5e:2x2
jax: 0.10.0
libtpu: 0.0.40
codegen_flags: <defaults>
</compile_context>

<pallas_src>
import functools

import jax
import jax.numpy as jnp
from jax import lax
from jax.experimental import pallas as pl
from jax.experimental.pallas import tpu as pltpu


def _round_up(x, m):
    return (x + m - 1) // m * m


def _vmem_capacity_bytes():
    try:
        return int(pltpu.get_tpu_info().vmem_capacity_bytes)
    except Exception:
        return 64 << 20  # conservative fallback (v7x has the smallest VMEM)


_VMEM_CAP_BYTES = _vmem_capacity_bytes()
# Generation-aware tile caps: 128 MiB parts (v5e/v6e) may use 1024-row tiles,
# 64 MiB parts (v7x) stay at 512 so double-buffered tiles + f32 acc stay small.
_TM_CAP = 1024 if _VMEM_CAP_BYTES >= (100 << 20) else 512
_TN_CAP = 512
_TK_CAP = 512


def _pick_tile(dim, cap, align):
    """Pick a tile (multiple of `align`, <= cap).  Prefers the largest tile whose
    padded dim is within ~12.5% of the minimum achievable padding.
    Returns (tile, padded_dim)."""
    small = _round_up(dim, align)
    if small <= cap:
        return small, small
    cands = [(t, _round_up(dim, t)) for t in range(align, cap + 1, align)]
    min_pad = min(p for _, p in cands)
    bound = min_pad + min_pad // 8
    tile, padded = max((tp for tp in cands if tp[1] <= bound), key=lambda tp: tp[0])
    return tile, padded


def _plan_matmul(K, N):
    """Static per-layer tiling plan shared by init-time weight packing and the
    forward pass (so pre-padded weights and runtime tiles always agree)."""
    TK, Kp = _pick_tile(K, _TK_CAP, 128)
    TN, Np = _pick_tile(N, _TN_CAP, 128)
    return TK, Kp, TN, Np


# ----------------------------------------------------------------------------
# Pallas kernel: batched matmul (bf16 MXU, f32 accumulate) + shift + opt. ReLU
# ----------------------------------------------------------------------------
def _bmm_affine_kernel(a_ref, w_ref, shift_ref, o_ref, acc_ref, *, apply_relu):
    """One (TM, TN) tile of out[g] = relu?(a[g] @ w[g] + shift); K innermost."""
    @pl.when(pl.program_id(3) == 0)
    def _():
        acc_ref[...] = jnp.zeros_like(acc_ref)

    acc_ref[...] += jnp.dot(a_ref[0], w_ref[0], preferred_element_type=jnp.float32)

    @pl.when(pl.program_id(3) == pl.num_programs(3) - 1)
    def _():
        out = acc_ref[...] + shift_ref[...]
        if apply_relu:
            out = jnp.maximum(out, 0.0)
        o_ref[0] = out.astype(o_ref.dtype)


def matmul_affine(a, w, shift, *, apply_relu, out_dtype, TK, TN):
    """a: (G, M, K) bf16 (unpadded). w: (G, Kp, Np) bf16 pre-packed/padded.
    shift: (1, Np) f32.  Returns (G, M, Np) in out_dtype."""
    G, M, K = a.shape
    Gw, Kp, Np = w.shape
    assert G == Gw and K <= Kp and Kp % TK == 0 and Np % TN == 0

    TM, Mp = _pick_tile(M, _TM_CAP, 16)

    # Megacore: make sure at least one parallel grid axis has >= 2 blocks when
    # possible (v7x has 2 TensorCores; a 1x1x1 parallel grid would use one).
    if G * (Mp // TM) * (Np // TN) < 2:
        if TN >= 256 and (TN // 2) % 128 == 0 and Np % (TN // 2) == 0:
            TN //= 2
        elif TM >= 32 and (TM // 2) % 16 == 0 and Mp % (TM // 2) == 0:
            TM //= 2

    if (Mp, Kp) != (M, K):
        a = jnp.pad(a, ((0, 0), (0, Mp - M), (0, Kp - K)))

    grid = (G, Mp // TM, Np // TN, Kp // TK)

    out_bytes = jnp.dtype(out_dtype).itemsize
    est = (2 * 2 * (TM * TK + TK * TN)      # double-buffered bf16 a / w tiles
           + 2 * TM * TN * out_bytes        # double-buffered output tiles
           + TM * TN * 4                    # f32 accumulator scratch
           + 2 * TN * 4)                    # shift tiles
    vmem_limit = int(min(max(2 * est, 16 << 20), (_VMEM_CAP_BYTES * 3) // 4))

    out = pl.pallas_call(
        functools.partial(_bmm_affine_kernel, apply_relu=apply_relu),
        out_shape=jax.ShapeDtypeStruct((G, Mp, Np), out_dtype),
        grid_spec=pltpu.PrefetchScalarGridSpec(
            num_scalar_prefetch=0,
            grid=grid,
            in_specs=[
                pl.BlockSpec((1, TM, TK), lambda g, i, j, k: (g, i, k)),
                pl.BlockSpec((1, TK, TN), lambda g, i, j, k: (g, k, j)),
                pl.BlockSpec((1, TN), lambda g, i, j, k: (0, j)),
            ],
            out_specs=pl.BlockSpec((1, TM, TN), lambda g, i, j, k: (g, i, j)),
            scratch_shapes=[pltpu.VMEM((TM, TN), jnp.float32)],
        ),
        compiler_params=pltpu.CompilerParams(
            dimension_semantics=("parallel", "parallel", "parallel", "arbitrary"),
            vmem_limit_bytes=vmem_limit,
        ),
    )(a, w, shift)

    if Mp != M:
        out = out[:, :M, :]
    return out


# ----------------------------------------------------------------------------
# im2col glue (plain JAX): NHWC -> (B*Ho*Wo, kh*kw*C) patch matrix
# feature ordering: ((dh*kw + dw) * C + c)
# ----------------------------------------------------------------------------
def im2col(x, kh, kw, stride, pad_h, pad_w):
    B, H, W, C = x.shape
    xp = jnp.pad(x, ((0, 0), pad_h, pad_w, (0, 0)))
    Hp = H + pad_h[0] + pad_h[1]
    Wp = W + pad_w[0] + pad_w[1]
    Ho = (Hp - kh) // stride + 1
    Wo = (Wp - kw) // stride + 1
    cols = []
    for di in range(kh):
        for dj in range(kw):
            patch = lax.slice(
                xp,
                (0, di, dj, 0),
                (B, di + (Ho - 1) * stride + 1, dj + (Wo - 1) * stride + 1, C),
                (1, stride, stride, 1))
            cols.append(patch)                      # (B, Ho, Wo, C)
    patches = jnp.stack(cols, axis=3)               # (B, Ho, Wo, kh*kw, C)
    return patches.reshape(B * Ho * Wo, kh * kw * C), Ho, Wo


# ----------------------------------------------------------------------------
# Layers
# ----------------------------------------------------------------------------
def _conv_layer(x, w_packed, shift, cfg, out_dtype):
    """Conv2d: im2col + one batched (G=1) Pallas matmul."""
    k, s, p, cin, cout, relu = cfg
    B = x.shape[0]
    K = k * k * cin
    TK, Kp, TN, Np = _plan_matmul(K, cout)
    a, Ho, Wo = im2col(x, k, k, s, (p, p), (p, p))
    out = matmul_affine(a[None], w_packed, shift, apply_relu=relu,
                        out_dtype=out_dtype, TK=TK, TN=TN)
    out = out[0, :, :cout] if Np != cout else out[0]
    return out.reshape(B, Ho, Wo, cout)


def _phase_geom(r, s, p, k, in_size, out_size):
    """Geometry of the stride-1 conv computing output phase r of a transposed conv."""
    c = (r + p) % s                      # first kernel tap of this phase
    m = -(-(k - c) // s)                 # number of taps
    off = (r + p - c) // s
    pad_before = m - 1 - off
    q = -(-(out_size - r) // s)          # number of outputs with this phase
    pad_after = q + off - in_size
    return c, m, pad_before, pad_after, q


def _deconv_layer(x, w_packed, shift, cfg, out_dtype):
    """ConvTranspose2d: all s^2 sub-pixel phases fused into ONE batched Pallas
    matmul (phase = leading parallel grid axis), then a lane-dense pixel shuffle."""
    k, s, p, cin, cout, relu = cfg
    B, H, W, C = x.shape
    assert C == cin
    Ho = (H - 1) * s - 2 * p + k
    Wo = (W - 1) * s - 2 * p + k

    gh = [_phase_geom(r, s, p, k, H, Ho) for r in range(s)]
    gw = [_phase_geom(r, s, p, k, W, Wo) for r in range(s)]
    m_h, q_h = gh[0][1], gh[0][4]
    m_w, q_w = gw[0][1], gw[0][4]
    # All phases must share the same stride-1 geometry so they can be fused
    # (true for the module's 4/2/1 decoder layers).
    assert all(g[1] == m_h and g[4] == q_h and g[2] >= 0 and g[3] >= 0 for g in gh)
    assert all(g[1] == m_w and g[4] == q_w and g[2] >= 0 and g[3] >= 0 for g in gw)
    assert q_h * s == Ho and q_w * s == Wo

    pbh = max(g[2] for g in gh)
    pah = max(g[3] for g in gh)
    pbw = max(g[2] for g in gw)
    paw = max(g[3] for g in gw)
    xp = jnp.pad(x, ((0, 0), (pbh, pah), (pbw, paw), (0, 0)))

    K = m_h * m_w * cin
    TK, Kp, TN, Np = _plan_matmul(K, cout)

    phases = []
    for rh in range(s):
        oh = pbh - gh[rh][2]
        for rw in range(s):
            ow = pbw - gw[rw][2]
            xs = lax.slice(xp, (0, oh, ow, 0),
                           (B, oh + q_h + m_h - 1, ow + q_w + m_w - 1, C))
            a, _, _ = im2col(xs, m_h, m_w, 1, (0, 0), (0, 0))
            phases.append(a)
    a = jnp.stack(phases, axis=0)                    # (s*s, B*q_h*q_w, K)

    out = matmul_affine(a, w_packed, shift, apply_relu=relu,
                        out_dtype=out_dtype, TK=TK, TN=TN)   # (s*s, M, Np)
    out = out[:, :, :cout] if Np != cout else out
    # Pixel shuffle (lane-dense) instead of s*s strided scatters.
    out = out.reshape(s, s, B, q_h, q_w, cout)
    out = jnp.transpose(out, (2, 3, 0, 4, 1, 5)).reshape(B, Ho, Wo, cout)
    return out


# ----------------------------------------------------------------------------
# Static architecture config + deterministic parameter construction
# ----------------------------------------------------------------------------
def _arch_cfg(in_channels):
    # (kernel, stride, pad, cin, cout, relu)
    enc = ((7, 2, 3, in_channels * 2, 64, True),
           (5, 2, 2, 64, 128, True),
           (5, 2, 2, 128, 256, True),
           (3, 2, 1, 256, 512, True))
    dec = ((4, 2, 1, 512, 256, True),
           (4, 2, 1, 256, 128, True),
           (4, 2, 1, 128, 64, True),
           (4, 2, 1, 64, 4, False))
    return enc, dec


def init_params(in_channels, key):
    """Returns (packed_params, raw_params).  packed: matmul-layout, scale-folded,
    bf16, pre-padded weights (ready for the Pallas kernels).  raw: the folded
    (w, shift) pairs in PyTorch layout, used only by the numerical reference."""
    enc_cfg, dec_cfg = _arch_cfg(in_channels)
    enc_bn = (False, True, True, True)
    dec_bn = (True, True, True, False)

    def fold_bn(bias, cout, has_bn):
        if has_bn:
            gamma = jnp.ones((cout,), jnp.float32)
            beta = jnp.zeros((cout,), jnp.float32)
            mean = jnp.zeros((cout,), jnp.float32)
            var = jnp.ones((cout,), jnp.float32)
            scale = gamma / jnp.sqrt(var + 1e-5)
            shift = (bias - mean) * scale + beta
        else:
            scale = jnp.ones((cout,), jnp.float32)
            shift = bias
        return scale, shift

    def pack_conv(lkey, cfg, has_bn):
        k, s, p, cin, cout, _relu = cfg
        kw_key, kb_key = jax.random.split(lkey)
        w = jax.random.normal(kw_key, (cout, cin, k, k), jnp.float32) * 0.05
        bias = jax.random.normal(kb_key, (cout,), jnp.float32) * 0.01
        scale, shift = fold_bn(bias, cout, has_bn)
        w = w * scale[:, None, None, None]
        K = k * k * cin
        _TKu, Kp, _TNu, Np = _plan_matmul(K, cout)
        wm = jnp.transpose(w, (2, 3, 1, 0)).reshape(K, cout)
        wm = jnp.pad(wm, ((0, Kp - K), (0, Np - cout))).astype(jnp.bfloat16)[None]
        sh = jnp.pad(shift, (0, Np - cout)).reshape(1, Np)
        return {"w": wm, "shift": sh}, (w, shift)

    def pack_deconv(lkey, cfg, has_bn):
        k, s, p, cin, cout, _relu = cfg
        kw_key, kb_key = jax.random.split(lkey)
        w = jax.random.normal(kw_key, (cin, cout, k, k), jnp.float32) * 0.05
        bias = jax.random.normal(kb_key, (cout,), jnp.float32) * 0.01
        scale, shift = fold_bn(bias, cout, has_bn)
        w = w * scale[None, :, None, None]
        # Per-phase stride-1 sub-kernels (tap kh = c + s*(m-1-d) pairs with patch tap d).
        mats = []
        for rh in range(s):
            ch = (rh + p) % s
            mh = -(-(k - ch) // s)
            kh_idx = [ch + s * (mh - 1 - d) for d in range(mh)]
            for rw in range(s):
                cw = (rw + p) % s
                mw = -(-(k - cw) // s)
                kw_idx = [cw + s * (mw - 1 - d) for d in range(mw)]
                w_sub = w[:, :, kh_idx, :][:, :, :, kw_idx]        # (cin, cout, mh, mw)
                mats.append(jnp.transpose(w_sub, (2, 3, 0, 1)).reshape(mh * mw * cin, cout))
        K = mats[0].shape[0]
        _TKu, Kp, _TNu, Np = _plan_matmul(K, cout)
        wp = jnp.stack(mats, axis=0)                               # (s*s, K, cout)
        wp = jnp.pad(wp, ((0, 0), (0, Kp - K), (0, Np - cout))).astype(jnp.bfloat16)
        sh = jnp.pad(shift, (0, Np - cout)).reshape(1, Np)
        return {"w": wp, "shift": sh}, (w, shift)

    keys = jax.random.split(key, len(enc_cfg) + len(dec_cfg))
    enc_p, enc_raw, dec_p, dec_raw = [], [], [], []
    for i, cfg in enumerate(enc_cfg):
        packed, raw = pack_conv(keys[i], cfg, enc_bn[i])
        enc_p.append(packed)
        enc_raw.append(raw)
    for j, cfg in enumerate(dec_cfg):
        packed, raw = pack_deconv(keys[len(enc_cfg) + j], cfg, dec_bn[j])
        dec_p.append(packed)
        dec_raw.append(raw)
    return ({"encoder": enc_p, "decoder": dec_p},
            {"encoder": enc_raw, "decoder": dec_raw})


# ----------------------------------------------------------------------------
# Forward pass (mirrors BidirectionalFlowEstimator.forward), fully jit-compiled
# ----------------------------------------------------------------------------
@jax.jit
def bidirectional_flow_estimator(start, end, params):
    in_channels = start.shape[1]
    enc_cfg, dec_cfg = _arch_cfg(in_channels)

    x = jnp.concatenate([start, end], axis=1)                   # (B, 2C, H, W)
    x = jnp.transpose(x, (0, 2, 3, 1)).astype(jnp.bfloat16)     # NHWC, bf16 acts

    for layer, cfg in zip(params["encoder"], enc_cfg):
        x = _conv_layer(x, layer["w"], layer["shift"], cfg, jnp.bfloat16)

    n_dec = len(dec_cfg)
    for i, (layer, cfg) in enumerate(zip(params["decoder"], dec_cfg)):
        last = i == n_dec - 1
        x = _deconv_layer(x, layer["w"], layer["shift"], cfg,
                          jnp.float32 if last else jnp.bfloat16)

    flow = jnp.transpose(x, (0, 3, 1, 2))                       # (B, 4, H, W)
    return flow[:, :2, :, :], flow[:, 2:, :, :]


# ----------------------------------------------------------------------------
# Pure-XLA reference (same bf16 weights / bf16 inter-layer casts) for checking
# ----------------------------------------------------------------------------
def _reference_forward(start, end, raw, in_channels):
    enc_cfg, dec_cfg = _arch_cfg(in_channels)
    x = jnp.concatenate([start, end], axis=1)
    x = jnp.transpose(x, (0, 2, 3, 1)).astype(jnp.bfloat16)
    for (w, shift), cfg in zip(raw["encoder"], enc_cfg):
        k, s, p, _cin, _cout, relu = cfg
        wk = jnp.transpose(w, (2, 3, 1, 0)).astype(jnp.bfloat16).astype(jnp.float32)
        y = lax.conv_general_dilated(x.astype(jnp.float32), wk, (s, s),
                                     [(p, p), (p, p)],
                                     dimension_numbers=("NHWC", "HWIO", "NHWC"))
        y = y + shift
        if relu:
            y = jnp.maximum(y, 0.0)
        x = y.astype(jnp.bfloat16)
    n_dec = len(dec_cfg)
    for i, ((w, shift), cfg) in enumerate(zip(raw["decoder"], dec_cfg)):
        k, s, p, _cin, _cout, relu = cfg
        wk = jnp.transpose(w[:, :, ::-1, ::-1], (2, 3, 0, 1))
        wk = wk.astype(jnp.bfloat16).astype(jnp.float32)
        y = lax.conv_general_dilated(x.astype(jnp.float32), wk, (1, 1),
                                     [(k - 1 - p, k - 1 - p)] * 2,
                                     lhs_dilation=(s, s),
                                     dimension_numbers=("NHWC", "HWIO", "NHWC"))
        y = y + shift
        if relu:
            y = jnp.maximum(y, 0.0)
        x = y.astype(jnp.float32 if i == n_dec - 1 else jnp.bfloat16)
    flow = jnp.transpose(x, (0, 3, 1, 2))
    return flow[:, :2, :, :], flow[:, 2:, :, :]


if __name__ == "__main__":
    key = jax.random.PRNGKey(0)
    k_param, k_start, k_end = jax.random.split(key, 3)

    B, C, H, W = 2, 4, 16, 16
    start = jax.random.normal(k_start, (B, C, H, W), jnp.float32)
    end = jax.random.normal(k_end, (B, C, H, W), jnp.float32)

    params, raw_params = init_params(C, k_param)

    flow_f, flow_b = bidirectional_flow_estimator(start, end, params)
    flow_f = jax.block_until_ready(flow_f)
    flow_b = jax.block_until_ready(flow_b)

    assert flow_f.shape == (B, 2, H, W), flow_f.shape
    assert flow_b.shape == (B, 2, H, W), flow_b.shape
    assert bool(jnp.all(jnp.isfinite(flow_f))) and bool(jnp.all(jnp.isfinite(flow_b)))

    # Numerical check against an XLA conv reference that uses the exact same
    # bf16 weight values and bf16 inter-layer casts (remaining differences are
    # only f32 accumulation order / occasional 1-ulp bf16 rounding flips).
    ref_f, ref_b = _reference_forward(start, end, raw_params, C)
    assert bool(jnp.allclose(flow_f, ref_f, rtol=5e-2, atol=5e-2))
    assert bool(jnp.allclose(flow_b, ref_b, rtol=5e-2, atol=5e-2))

    print("KERNEL_OK")
</pallas_src>

<mosaic_0001>
module attributes {stable_mosaic.version = 11 : i64} {
  func.func @_bmm_affine_kernel(%arg0: i32, %arg1: i32, %arg2: i32, %arg3: i32, %arg4: memref<1x64x512xbf16, #tpu.memory_space<vmem>>, %arg5: memref<1x512x128xbf16, #tpu.memory_space<vmem>>, %arg6: memref<1x128xf32, #tpu.memory_space<vmem>>, %arg7: memref<1x64x128xbf16, #tpu.memory_space<vmem>>, %arg8: memref<64x128xf32, #tpu.memory_space<vmem>>) attributes {dimension_semantics = [#tpu.dimension_semantics<parallel>, #tpu.dimension_semantics<parallel>, #tpu.dimension_semantics<parallel>, #tpu.dimension_semantics<arbitrary>], iteration_bounds = array<i64: 1, 2, 1, 1>, scalar_prefetch = 0 : i64, scratch_operands = 1 : i64, tpu.core_type = #tpu.core_type<tc>, window_params = [{transform_indices = @transform_0, window_bounds = array<i64: 1, 64, 512>}, {transform_indices = @transform_1, window_bounds = array<i64: 1, 512, 128>}, {transform_indices = @transform_2, window_bounds = array<i64: 1, 128>}, {transform_indices = @transform_3, window_bounds = array<i64: 1, 64, 128>}]} {
    %c0_i32 = arith.constant 0 : i32
    %0 = arith.cmpi eq, %arg3, %c0_i32 : i32
    %1 = arith.extui %0 : i1 to i32
    %c0_i32_0 = arith.constant 0 : i32
    %2 = arith.cmpi ne, %1, %c0_i32_0 : i32
    scf.if %2 {
      %cst_12 = arith.constant 0.000000e+00 : f32
      %14 = vector.broadcast %cst_12 : f32 to vector<64x128xf32>
      %c0_13 = arith.constant 0 : index
      %c0_14 = arith.constant 0 : index
      %15 = vector.load %arg8[%c0_13, %c0_14] : memref<64x128xf32, #tpu.memory_space<vmem>>, vector<64x128xf32>
      tpu.vector_store %arg8[%c0_13, %c0_14], %14 {strides = array<i32>} : memref<64x128xf32, #tpu.memory_space<vmem>>, vector<64x128xf32>,
    } else {
    }
    %c0 = arith.constant 0 : index
    %c0_1 = arith.constant 0 : index
    %3 = vector.load %arg8[%c0, %c0_1] : memref<64x128xf32, #tpu.memory_space<vmem>>, vector<64x128xf32>
    %c0_2 = arith.constant 0 : index
    %c0_3 = arith.constant 0 : index
    %c0_4 = arith.constant 0 : index
    %4 = vector.load %arg4[%c0_2, %c0_3, %c0_4] : memref<1x64x512xbf16, #tpu.memory_space<vmem>>, vector<1x64x512xbf16>
    %5 = vector.shape_cast %4 : vector<1x64x512xbf16> to vector<64x512xbf16>
    %c0_5 = arith.constant 0 : index
    %c0_6 = arith.constant 0 : index
    %c0_7 = arith.constant 0 : index
    %6 = vector.load %arg5[%c0_5, %c0_6, %c0_7] : memref<1x512x128xbf16, #tpu.memory_space<vmem>>, vector<1x512x128xbf16>
    %7 = vector.shape_cast %6 : vector<1x512x128xbf16> to vector<512x128xbf16>
    %cst = arith.constant dense<0.000000e+00> : vector<64x128xf32>
    %8 = tpu.matmul %5, %7, %cst {dimension_numbers = #tpu.dot_dimension_numbers<[1], [0], [0], [1], [0, 0, 1, 1], [], []>} : vector<64x512xbf16>, vector<512x128xbf16>, vector<64x128xf32> -> vector<64x128xf32>
    %9 = arith.addf %3, %8 : vector<64x128xf32>
    %c0_8 = arith.constant 0 : index
    %c0_9 = arith.constant 0 : index
    %10 = vector.load %arg8[%c0_8, %c0_9] : memref<64x128xf32, #tpu.memory_space<vmem>>, vector<64x128xf32>
    tpu.vector_store %arg8[%c0_8, %c0_9], %9 {strides = array<i32>} : memref<64x128xf32, #tpu.memory_space<vmem>>, vector<64x128xf32>,
    %c0_i32_10 = arith.constant 0 : i32
    %11 = arith.cmpi eq, %arg3, %c0_i32_10 : i32
    %12 = arith.extui %11 : i1 to i32
    %c0_i32_11 = arith.constant 0 : i32
    %13 = arith.cmpi ne, %12, %c0_i32_11 : i32
    scf.if %13 {
      %c0_12 = arith.constant 0 : index
      %c0_13 = arith.constant 0 : index
      %14 = vector.load %arg8[%c0_12, %c0_13] : memref<64x128xf32, #tpu.memory_space<vmem>>, vector<64x128xf32>
      %c0_14 = arith.constant 0 : index
      %c0_15 = arith.constant 0 : index
      %15 = vector.load %arg6[%c0_14, %c0_15] : memref<1x128xf32, #tpu.memory_space<vmem>>, vector<1x128xf32>
      %16 = vector.broadcast %15 : vector<1x128xf32> to vector<64x128xf32>
      %17 = arith.addf %14, %16 : vector<64x128xf32>
      %cst_16 = arith.constant 0.000000e+00 : f32
      %18 = vector.broadcast %cst_16 : f32 to vector<64x128xf32>
      %19 = arith.maximumf %17, %18 : vector<64x128xf32>
      %20 = arith.truncf %19 : vector<64x128xf32> to vector<64x128xbf16>
      %c0_17 = arith.constant 0 : index
      %c0_18 = arith.constant 0 : index
      %c0_19 = arith.constant 0 : index
      %21 = vector.load %arg7[%c0_17, %c0_18, %c0_19] : memref<1x64x128xbf16, #tpu.memory_space<vmem>>, vector<1x64x128xbf16>
      %22 = vector.shape_cast %21 : vector<1x64x128xbf16> to vector<64x128xbf16>
      %23 = vector.shape_cast %20 : vector<64x128xbf16> to vector<1x64x128xbf16>
      tpu.vector_store %arg7[%c0_17, %c0_18, %c0_19], %23 {strides = array<i32>} : memref<1x64x128xbf16, #tpu.memory_space<vmem>>, vector<1x64x128xbf16>,
    } else {
    }
    return
  }
  func.func @transform_0(%arg0: i32, %arg1: i32, %arg2: i32, %arg3: i32) -> (i32, i32, i32) {
    %c0_i32 = arith.constant 0 : i32
    return %arg0, %arg1, %arg3 : i32, i32, i32
  }
  func.func @transform_1(%arg0: i32, %arg1: i32, %arg2: i32, %arg3: i32) -> (i32, i32, i32) {
    %c0_i32 = arith.constant 0 : i32
    return %arg0, %arg3, %arg2 : i32, i32, i32
  }
  func.func @transform_2(%arg0: i32, %arg1: i32, %arg2: i32, %arg3: i32) -> (i32, i32) {
    %c0_i32 = arith.constant 0 : i32
    %c0_i32_0 = arith.constant 0 : i32
    return %c0_i32, %arg2 : i32, i32
  }
  func.func @transform_3(%arg0: i32, %arg1: i32, %arg2: i32, %arg3: i32) -> (i32, i32, i32) {
    %c0_i32 = arith.constant 0 : i32
    return %arg0, %arg1, %arg2 : i32, i32, i32
  }
}

module attributes {stable_mosaic.version = 11 : i64} {
  func.func @_bmm_affine_kernel(%arg0: i32, %arg1: i32, %arg2: i32, %arg3: i32, %arg4: memref<1x16x256xbf16, #tpu.memory_space<vmem>>, %arg5: memref<1x256x128xbf16, #tpu.memory_space<vmem>>, %arg6: memref<1x128xf32, #tpu.memory_space<vmem>>, %arg7: memref<1x16x128xbf16, #tpu.memory_space<vmem>>, %arg8: memref<16x128xf32, #tpu.memory_space<vmem>>) attributes {dimension_semantics = [#tpu.dimension_semantics<parallel>, #tpu.dimension_semantics<parallel>, #tpu.dimension_semantics<parallel>, #tpu.dimension_semantics<arbitrary>], iteration_bounds = array<i64: 1, 2, 1, 7>, scalar_prefetch = 0 : i64, scratch_operands = 1 : i64, tpu.core_type = #tpu.core_type<tc>, window_params = [{transform_indices = @transform_0, window_bounds = array<i64: 1, 16, 256>}, {transform_indices = @transform_1, window_bounds = array<i64: 1, 256, 128>}, {transform_indices = @transform_2, window_bounds = array<i64: 1, 128>}, {transform_indices = @transform_3, window_bounds = array<i64: 1, 16, 128>}]} {
    %c0_i32 = arith.constant 0 : i32
    %0 = arith.cmpi eq, %arg3, %c0_i32 : i32
    %1 = arith.extui %0 : i1 to i32
    %c0_i32_0 = arith.constant 0 : i32
    %2 = arith.cmpi ne, %1, %c0_i32_0 : i32
    scf.if %2 {
      %cst_11 = arith.constant 0.000000e+00 : f32
      %14 = vector.broadcast %cst_11 : f32 to vector<16x128xf32>
      %c0_12 = arith.constant 0 : index
      %c0_13 = arith.constant 0 : index
      %15 = vector.load %arg8[%c0_12, %c0_13] : memref<16x128xf32, #tpu.memory_space<vmem>>, vector<16x128xf32>
      tpu.vector_store %arg8[%c0_12, %c0_13], %14 {strides = array<i32>} : memref<16x128xf32, #tpu.memory_space<vmem>>, vector<16x128xf32>,
    } else {
    }
    %c0 = arith.constant 0 : index
    %c0_1 = arith.constant 0 : index
    %3 = vector.load %arg8[%c0, %c0_1] : memref<16x128xf32, #tpu.memory_space<vmem>>, vector<16x128xf32>
    %c0_2 = arith.constant 0 : index
    %c0_3 = arith.constant 0 : index
    %c0_4 = arith.constant 0 : index
    %4 = vector.load %arg4[%c0_2, %c0_3, %c0_4] : memref<1x16x256xbf16, #tpu.memory_space<vmem>>, vector<1x16x256xbf16>
    %5 = vector.shape_cast %4 : vector<1x16x256xbf16> to vector<16x256xbf16>
    %c0_5 = arith.constant 0 : index
    %c0_6 = arith.constant 0 : index
    %c0_7 = arith.constant 0 : index
    %6 = vector.load %arg5[%c0_5, %c0_6, %c0_7] : memref<1x256x128xbf16, #tpu.memory_space<vmem>>, vector<1x256x128xbf16>
    %7 = vector.shape_cast %6 : vector<1x256x128xbf16> to vector<256x128xbf16>
    %cst = arith.constant dense<0.000000e+00> : vector<16x128xf32>
    %8 = tpu.matmul %5, %7, %cst {dimension_numbers = #tpu.dot_dimension_numbers<[1], [0], [0], [1], [0, 0, 1, 1], [], []>} : vector<16x256xbf16>, vector<256x128xbf16>, vector<16x128xf32> -> vector<16x128xf32>
    %9 = arith.addf %3, %8 : vector<16x128xf32>
    %c0_8 = arith.constant 0 : index
    %c0_9 = arith.constant 0 : index
    %10 = vector.load %arg8[%c0_8, %c0_9] : memref<16x128xf32, #tpu.memory_space<vmem>>, vector<16x128xf32>
    tpu.vector_store %arg8[%c0_8, %c0_9], %9 {strides = array<i32>} : memref<16x128xf32, #tpu.memory_space<vmem>>, vector<16x128xf32>,
    %c6_i32 = arith.constant 6 : i32
    %11 = arith.cmpi eq, %arg3, %c6_i32 : i32
    %12 = arith.extui %11 : i1 to i32
    %c0_i32_10 = arith.constant 0 : i32
    %13 = arith.cmpi ne, %12, %c0_i32_10 : i32
    scf.if %13 {
      %c0_11 = arith.constant 0 : index
      %c0_12 = arith.constant 0 : index
      %14 = vector.load %arg8[%c0_11, %c0_12] : memref<16x128xf32, #tpu.memory_space<vmem>>, vector<16x128xf32>
      %c0_13 = arith.constant 0 : index
      %c0_14 = arith.constant 0 : index
      %15 = vector.load %arg6[%c0_13, %c0_14] : memref<1x128xf32, #tpu.memory_space<vmem>>, vector<1x128xf32>
      %16 = vector.broadcast %15 : vector<1x128xf32> to vector<16x128xf32>
      %17 = arith.addf %14, %16 : vector<16x128xf32>
      %cst_15 = arith.constant 0.000000e+00 : f32
      %18 = vector.broadcast %cst_15 : f32 to vector<16x128xf32>
      %19 = arith.maximumf %17, %18 : vector<16x128xf32>
      %20 = arith.truncf %19 : vector<16x128xf32> to vector<16x128xbf16>
      %c0_16 = arith.constant 0 : index
      %c0_17 = arith.constant 0 : index
      %c0_18 = arith.constant 0 : index
      %21 = vector.load %arg7[%c0_16, %c0_17, %c0_18] : memref<1x16x128xbf16, #tpu.memory_space<vmem>>, vector<1x16x128xbf16>
      %22 = vector.shape_cast %21 : vector<1x16x128xbf16> to vector<16x128xbf16>
      %23 = vector.shape_cast %20 : vector<16x128xbf16> to vector<1x16x128xbf16>
      tpu.vector_store %arg7[%c0_16, %c0_17, %c0_18], %23 {strides = array<i32>} : memref<1x16x128xbf16, #tpu.memory_space<vmem>>, vector<1x16x128xbf16>,
    } else {
    }
    return
  }
  func.func @transform_0(%arg0: i32, %arg1: i32, %arg2: i32, %arg3: i32) -> (i32, i32, i32) {
    %c0_i32 = arith.constant 0 : i32
    return %arg0, %arg1, %arg3 : i32, i32, i32
  }
  func.func @transform_1(%arg0: i32, %arg1: i32, %arg2: i32, %arg3: i32) -> (i32, i32, i32) {
    %c0_i32 = arith.constant 0 : i32
    return %arg0, %arg3, %arg2 : i32, i32, i32
  }
  func.func @transform_2(%arg0: i32, %arg1: i32, %arg2: i32, %arg3: i32) -> (i32, i32) {
    %c0_i32 = arith.constant 0 : i32
    %c0_i32_0 = arith.constant 0 : i32
    return %c0_i32, %arg2 : i32, i32
  }
  func.func @transform_3(%arg0: i32, %arg1: i32, %arg2: i32, %arg3: i32) -> (i32, i32, i32) {
    %c0_i32 = arith.constant 0 : i32
    return %arg0, %arg1, %arg2 : i32, i32, i32
  }
}

module attributes {stable_mosaic.version = 11 : i64} {
  func.func @_bmm_affine_kernel(%arg0: i32, %arg1: i32, %arg2: i32, %arg3: i32, %arg4: memref<1x16x512xbf16, #tpu.memory_space<vmem>>, %arg5: memref<1x512x128xbf16, #tpu.memory_space<vmem>>, %arg6: memref<1x128xf32, #tpu.memory_space<vmem>>, %arg7: memref<1x16x128xbf16, #tpu.memory_space<vmem>>, %arg8: memref<16x128xf32, #tpu.memory_space<vmem>>) attributes {dimension_semantics = [#tpu.dimension_semantics<parallel>, #tpu.dimension_semantics<parallel>, #tpu.dimension_semantics<parallel>, #tpu.dimension_semantics<arbitrary>], iteration_bounds = array<i64: 1, 1, 2, 7>, scalar_prefetch = 0 : i64, scratch_operands = 1 : i64, tpu.core_type = #tpu.core_type<tc>, window_params = [{transform_indices = @transform_0, window_bounds = array<i64: 1, 16, 512>}, {transform_indices = @transform_1, window_bounds = array<i64: 1, 512, 128>}, {transform_indices = @transform_2, window_bounds = array<i64: 1, 128>}, {transform_indices = @transform_3, window_bounds = array<i64: 1, 16, 128>}]} {
    %c0_i32 = arith.constant 0 : i32
    %0 = arith.cmpi eq, %arg3, %c0_i32 : i32
    %1 = arith.extui %0 : i1 to i32
    %c0_i32_0 = arith.constant 0 : i32
    %2 = arith.cmpi ne, %1, %c0_i32_0 : i32
    scf.if %2 {
      %cst_11 = arith.constant 0.000000e+00 : f32
      %14 = vector.broadcast %cst_11 : f32 to vector<16x128xf32>
      %c0_12 = arith.constant 0 : index
      %c0_13 = arith.constant 0 : index
      %15 = vector.load %arg8[%c0_12, %c0_13] : memref<16x128xf32, #tpu.memory_space<vmem>>, vector<16x128xf32>
      tpu.vector_store %arg8[%c0_12, %c0_13], %14 {strides = array<i32>} : memref<16x128xf32, #tpu.memory_space<vmem>>, vector<16x128xf32>,
    } else {
    }
    %c0 = arith.constant 0 : index
    %c0_1 = arith.constant 0 : index
    %3 = vector.load %arg8[%c0, %c0_1] : memref<16x128xf32, #tpu.memory_space<vmem>>, vector<16x128xf32>
    %c0_2 = arith.constant 0 : index
    %c0_3 = arith.constant 0 : index
    %c0_4 = arith.constant 0 : index
    %4 = vector.load %arg4[%c0_2, %c0_3, %c0_4] : memref<1x16x512xbf16, #tpu.memory_space<vmem>>, vector<1x16x512xbf16>
    %5 = vector.shape_cast %4 : vector<1x16x512xbf16> to vector<16x512xbf16>
    %c0_5 = arith.constant 0 : index
    %c0_6 = arith.constant 0 : index
    %c0_7 = arith.constant 0 : index
    %6 = vector.load %arg5[%c0_5, %c0_6, %c0_7] : memref<1x512x128xbf16, #tpu.memory_space<vmem>>, vector<1x512x128xbf16>
    %7 = vector.shape_cast %6 : vector<1x512x128xbf16> to vector<512x128xbf16>
    %cst = arith.constant dense<0.000000e+00> : vector<16x128xf32>
    %8 = tpu.matmul %5, %7, %cst {dimension_numbers = #tpu.dot_dimension_numbers<[1], [0], [0], [1], [0, 0, 1, 1], [], []>} : vector<16x512xbf16>, vector<512x128xbf16>, vector<16x128xf32> -> vector<16x128xf32>
    %9 = arith.addf %3, %8 : vector<16x128xf32>
    %c0_8 = arith.constant 0 : index
    %c0_9 = arith.constant 0 : index
    %10 = vector.load %arg8[%c0_8, %c0_9] : memref<16x128xf32, #tpu.memory_space<vmem>>, vector<16x128xf32>
    tpu.vector_store %arg8[%c0_8, %c0_9], %9 {strides = array<i32>} : memref<16x128xf32, #tpu.memory_space<vmem>>, vector<16x128xf32>,
    %c6_i32 = arith.constant 6 : i32
    %11 = arith.cmpi eq, %arg3, %c6_i32 : i32
    %12 = arith.extui %11 : i1 to i32
    %c0_i32_10 = arith.constant 0 : i32
    %13 = arith.cmpi ne, %12, %c0_i32_10 : i32
    scf.if %13 {
      %c0_11 = arith.constant 0 : index
      %c0_12 = arith.constant 0 : index
      %14 = vector.load %arg8[%c0_11, %c0_12] : memref<16x128xf32, #tpu.memory_space<vmem>>, vector<16x128xf32>
      %c0_13 = arith.constant 0 : index
      %c0_14 = arith.constant 0 : index
      %15 = vector.load %arg6[%c0_13, %c0_14] : memref<1x128xf32, #tpu.memory_space<vmem>>, vector<1x128xf32>
      %16 = vector.broadcast %15 : vector<1x128xf32> to vector<16x128xf32>
      %17 = arith.addf %14, %16 : vector<16x128xf32>
      %cst_15 = arith.constant 0.000000e+00 : f32
      %18 = vector.broadcast %cst_15 : f32 to vector<16x128xf32>
      %19 = arith.maximumf %17, %18 : vector<16x128xf32>
      %20 = arith.truncf %19 : vector<16x128xf32> to vector<16x128xbf16>
      %c0_16 = arith.constant 0 : index
      %c0_17 = arith.constant 0 : index
      %c0_18 = arith.constant 0 : index
      %21 = vector.load %arg7[%c0_16, %c0_17, %c0_18] : memref<1x16x128xbf16, #tpu.memory_space<vmem>>, vector<1x16x128xbf16>
      %22 = vector.shape_cast %21 : vector<1x16x128xbf16> to vector<16x128xbf16>
      %23 = vector.shape_cast %20 : vector<16x128xbf16> to vector<1x16x128xbf16>
      tpu.vector_store %arg7[%c0_16, %c0_17, %c0_18], %23 {strides = array<i32>} : memref<1x16x128xbf16, #tpu.memory_space<vmem>>, vector<1x16x128xbf16>,
    } else {
    }
    return
  }
  func.func @transform_0(%arg0: i32, %arg1: i32, %arg2: i32, %arg3: i32) -> (i32, i32, i32) {
    %c0_i32 = arith.constant 0 : i32
    return %arg0, %arg1, %arg3 : i32, i32, i32
  }
  func.func @transform_1(%arg0: i32, %arg1: i32, %arg2: i32, %arg3: i32) -> (i32, i32, i32) {
    %c0_i32 = arith.constant 0 : i32
    return %arg0, %arg3, %arg2 : i32, i32, i32
  }
  func.func @transform_2(%arg0: i32, %arg1: i32, %arg2: i32, %arg3: i32) -> (i32, i32) {
    %c0_i32 = arith.constant 0 : i32
    %c0_i32_0 = arith.constant 0 : i32
    return %c0_i32, %arg2 : i32, i32
  }
  func.func @transform_3(%arg0: i32, %arg1: i32, %arg2: i32, %arg3: i32) -> (i32, i32, i32) {
    %c0_i32 = arith.constant 0 : i32
    return %arg0, %arg1, %arg2 : i32, i32, i32
  }
}

module attributes {stable_mosaic.version = 11 : i64} {
  func.func @_bmm_affine_kernel(%arg0: i32, %arg1: i32, %arg2: i32, %arg3: i32, %arg4: memref<1x16x512xbf16, #tpu.memory_space<vmem>>, %arg5: memref<1x512x256xbf16, #tpu.memory_space<vmem>>, %arg6: memref<1x256xf32, #tpu.memory_space<vmem>>, %arg7: memref<1x16x256xbf16, #tpu.memory_space<vmem>>, %arg8: memref<16x256xf32, #tpu.memory_space<vmem>>) attributes {dimension_semantics = [#tpu.dimension_semantics<parallel>, #tpu.dimension_semantics<parallel>, #tpu.dimension_semantics<parallel>, #tpu.dimension_semantics<arbitrary>], iteration_bounds = array<i64: 1, 1, 2, 5>, scalar_prefetch = 0 : i64, scratch_operands = 1 : i64, tpu.core_type = #tpu.core_type<tc>, window_params = [{transform_indices = @transform_0, window_bounds = array<i64: 1, 16, 512>}, {transform_indices = @transform_1, window_bounds = array<i64: 1, 512, 256>}, {transform_indices = @transform_2, window_bounds = array<i64: 1, 256>}, {transform_indices = @transform_3, window_bounds = array<i64: 1, 16, 256>}]} {
    %c0_i32 = arith.constant 0 : i32
    %0 = arith.cmpi eq, %arg3, %c0_i32 : i32
    %1 = arith.extui %0 : i1 to i32
    %c0_i32_0 = arith.constant 0 : i32
    %2 = arith.cmpi ne, %1, %c0_i32_0 : i32
    scf.if %2 {
      %cst_11 = arith.constant 0.000000e+00 : f32
      %14 = vector.broadcast %cst_11 : f32 to vector<16x256xf32>
      %c0_12 = arith.constant 0 : index
      %c0_13 = arith.constant 0 : index
      %15 = vector.load %arg8[%c0_12, %c0_13] : memref<16x256xf32, #tpu.memory_space<vmem>>, vector<16x256xf32>
      tpu.vector_store %arg8[%c0_12, %c0_13], %14 {strides = array<i32>} : memref<16x256xf32, #tpu.memory_space<vmem>>, vector<16x256xf32>,
    } else {
    }
    %c0 = arith.constant 0 : index
    %c0_1 = arith.constant 0 : index
    %3 = vector.load %arg8[%c0, %c0_1] : memref<16x256xf32, #tpu.memory_space<vmem>>, vector<16x256xf32>
    %c0_2 = arith.constant 0 : index
    %c0_3 = arith.constant 0 : index
    %c0_4 = arith.constant 0 : index
    %4 = vector.load %arg4[%c0_2, %c0_3, %c0_4] : memref<1x16x512xbf16, #tpu.memory_space<vmem>>, vector<1x16x512xbf16>
    %5 = vector.shape_cast %4 : vector<1x16x512xbf16> to vector<16x512xbf16>
    %c0_5 = arith.constant 0 : index
    %c0_6 = arith.constant 0 : index
    %c0_7 = arith.constant 0 : index
    %6 = vector.load %arg5[%c0_5, %c0_6, %c0_7] : memref<1x512x256xbf16, #tpu.memory_space<vmem>>, vector<1x512x256xbf16>
    %7 = vector.shape_cast %6 : vector<1x512x256xbf16> to vector<512x256xbf16>
    %cst = arith.constant dense<0.000000e+00> : vector<16x256xf32>
    %8 = tpu.matmul %5, %7, %cst {dimension_numbers = #tpu.dot_dimension_numbers<[1], [0], [0], [1], [0, 0, 1, 1], [], []>} : vector<16x512xbf16>, vector<512x256xbf16>, vector<16x256xf32> -> vector<16x256xf32>
    %9 = arith.addf %3, %8 : vector<16x256xf32>
    %c0_8 = arith.constant 0 : index
    %c0_9 = arith.constant 0 : index
    %10 = vector.load %arg8[%c0_8, %c0_9] : memref<16x256xf32, #tpu.memory_space<vmem>>, vector<16x256xf32>
    tpu.vector_store %arg8[%c0_8, %c0_9], %9 {strides = array<i32>} : memref<16x256xf32, #tpu.memory_space<vmem>>, vector<16x256xf32>,
    %c4_i32 = arith.constant 4 : i32
    %11 = arith.cmpi eq, %arg3, %c4_i32 : i32
    %12 = arith.extui %11 : i1 to i32
    %c0_i32_10 = arith.constant 0 : i32
    %13 = arith.cmpi ne, %12, %c0_i32_10 : i32
    scf.if %13 {
      %c0_11 = arith.constant 0 : index
      %c0_12 = arith.constant 0 : index
      %14 = vector.load %arg8[%c0_11, %c0_12] : memref<16x256xf32, #tpu.memory_space<vmem>>, vector<16x256xf32>
      %c0_13 = arith.constant 0 : index
      %c0_14 = arith.constant 0 : index
      %15 = vector.load %arg6[%c0_13, %c0_14] : memref<1x256xf32, #tpu.memory_space<vmem>>, vector<1x256xf32>
      %16 = vector.broadcast %15 : vector<1x256xf32> to vector<16x256xf32>
      %17 = arith.addf %14, %16 : vector<16x256xf32>
      %cst_15 = arith.constant 0.000000e+00 : f32
      %18 = vector.broadcast %cst_15 : f32 to vector<16x256xf32>
      %19 = arith.maximumf %17, %18 : vector<16x256xf32>
      %20 = arith.truncf %19 : vector<16x256xf32> to vector<16x256xbf16>
      %c0_16 = arith.constant 0 : index
      %c0_17 = arith.constant 0 : index
      %c0_18 = arith.constant 0 : index
      %21 = vector.load %arg7[%c0_16, %c0_17, %c0_18] : memref<1x16x256xbf16, #tpu.memory_space<vmem>>, vector<1x16x256xbf16>
      %22 = vector.shape_cast %21 : vector<1x16x256xbf16> to vector<16x256xbf16>
      %23 = vector.shape_cast %20 : vector<16x256xbf16> to vector<1x16x256xbf16>
      tpu.vector_store %arg7[%c0_16, %c0_17, %c0_18], %23 {strides = array<i32>} : memref<1x16x256xbf16, #tpu.memory_space<vmem>>, vector<1x16x256xbf16>,
    } else {
    }
    return
  }
  func.func @transform_0(%arg0: i32, %arg1: i32, %arg2: i32, %arg3: i32) -> (i32, i32, i32) {
    %c0_i32 = arith.constant 0 : i32
    return %arg0, %arg1, %arg3 : i32, i32, i32
  }
  func.func @transform_1(%arg0: i32, %arg1: i32, %arg2: i32, %arg3: i32) -> (i32, i32, i32) {
    %c0_i32 = arith.constant 0 : i32
    return %arg0, %arg3, %arg2 : i32, i32, i32
  }
  func.func @transform_2(%arg0: i32, %arg1: i32, %arg2: i32, %arg3: i32) -> (i32, i32) {
    %c0_i32 = arith.constant 0 : i32
    %c0_i32_0 = arith.constant 0 : i32
    return %c0_i32, %arg2 : i32, i32
  }
  func.func @transform_3(%arg0: i32, %arg1: i32, %arg2: i32, %arg3: i32) -> (i32, i32, i32) {
    %c0_i32 = arith.constant 0 : i32
    return %arg0, %arg1, %arg2 : i32, i32, i32
  }
}

module attributes {stable_mosaic.version = 11 : i64} {
  func.func @_bmm_affine_kernel(%arg0: i32, %arg1: i32, %arg2: i32, %arg3: i32, %arg4: memref<1x16x512xbf16, #tpu.memory_space<vmem>>, %arg5: memref<1x512x256xbf16, #tpu.memory_space<vmem>>, %arg6: memref<1x256xf32, #tpu.memory_space<vmem>>, %arg7: memref<1x16x256xbf16, #tpu.memory_space<vmem>>, %arg8: memref<16x256xf32, #tpu.memory_space<vmem>>) attributes {dimension_semantics = [#tpu.dimension_semantics<parallel>, #tpu.dimension_semantics<parallel>, #tpu.dimension_semantics<parallel>, #tpu.dimension_semantics<arbitrary>], iteration_bounds = array<i64: 4, 1, 1, 4>, scalar_prefetch = 0 : i64, scratch_operands = 1 : i64, tpu.core_type = #tpu.core_type<tc>, window_params = [{transform_indices = @transform_0, window_bounds = array<i64: 1, 16, 512>}, {transform_indices = @transform_1, window_bounds = array<i64: 1, 512, 256>}, {transform_indices = @transform_2, window_bounds = array<i64: 1, 256>}, {transform_indices = @transform_3, window_bounds = array<i64: 1, 16, 256>}]} {
    %c0_i32 = arith.constant 0 : i32
    %0 = arith.cmpi eq, %arg3, %c0_i32 : i32
    %1 = arith.extui %0 : i1 to i32
    %c0_i32_0 = arith.constant 0 : i32
    %2 = arith.cmpi ne, %1, %c0_i32_0 : i32
    scf.if %2 {
      %cst_11 = arith.constant 0.000000e+00 : f32
      %14 = vector.broadcast %cst_11 : f32 to vector<16x256xf32>
      %c0_12 = arith.constant 0 : index
      %c0_13 = arith.constant 0 : index
      %15 = vector.load %arg8[%c0_12, %c0_13] : memref<16x256xf32, #tpu.memory_space<vmem>>, vector<16x256xf32>
      tpu.vector_store %arg8[%c0_12, %c0_13], %14 {strides = array<i32>} : memref<16x256xf32, #tpu.memory_space<vmem>>, vector<16x256xf32>,
    } else {
    }
    %c0 = arith.constant 0 : index
    %c0_1 = arith.constant 0 : index
    %3 = vector.load %arg8[%c0, %c0_1] : memref<16x256xf32, #tpu.memory_space<vmem>>, vector<16x256xf32>
    %c0_2 = arith.constant 0 : index
    %c0_3 = arith.constant 0 : index
    %c0_4 = arith.constant 0 : index
    %4 = vector.load %arg4[%c0_2, %c0_3, %c0_4] : memref<1x16x512xbf16, #tpu.memory_space<vmem>>, vector<1x16x512xbf16>
    %5 = vector.shape_cast %4 : vector<1x16x512xbf16> to vector<16x512xbf16>
    %c0_5 = arith.constant 0 : index
    %c0_6 = arith.constant 0 : index
    %c0_7 = arith.constant 0 : index
    %6 = vector.load %arg5[%c0_5, %c0_6, %c0_7] : memref<1x512x256xbf16, #tpu.memory_space<vmem>>, vector<1x512x256xbf16>
    %7 = vector.shape_cast %6 : vector<1x512x256xbf16> to vector<512x256xbf16>
    %cst = arith.constant dense<0.000000e+00> : vector<16x256xf32>
    %8 = tpu.matmul %5, %7, %cst {dimension_numbers = #tpu.dot_dimension_numbers<[1], [0], [0], [1], [0, 0, 1, 1], [], []>} : vector<16x512xbf16>, vector<512x256xbf16>, vector<16x256xf32> -> vector<16x256xf32>
    %9 = arith.addf %3, %8 : vector<16x256xf32>
    %c0_8 = arith.constant 0 : index
    %c0_9 = arith.constant 0 : index
    %10 = vector.load %arg8[%c0_8, %c0_9] : memref<16x256xf32, #tpu.memory_space<vmem>>, vector<16x256xf32>
    tpu.vector_store %arg8[%c0_8, %c0_9], %9 {strides = array<i32>} : memref<16x256xf32, #tpu.memory_space<vmem>>, vector<16x256xf32>,
    %c3_i32 = arith.constant 3 : i32
    %11 = arith.cmpi eq, %arg3, %c3_i32 : i32
    %12 = arith.extui %11 : i1 to i32
    %c0_i32_10 = arith.constant 0 : i32
    %13 = arith.cmpi ne, %12, %c0_i32_10 : i32
    scf.if %13 {
      %c0_11 = arith.constant 0 : index
      %c0_12 = arith.constant 0 : index
      %14 = vector.load %arg8[%c0_11, %c0_12] : memref<16x256xf32, #tpu.memory_space<vmem>>, vector<16x256xf32>
      %c0_13 = arith.constant 0 : index
      %c0_14 = arith.constant 0 : index
      %15 = vector.load %arg6[%c0_13, %c0_14] : memref<1x256xf32, #tpu.memory_space<vmem>>, vector<1x256xf32>
      %16 = vector.broadcast %15 : vector<1x256xf32> to vector<16x256xf32>
      %17 = arith.addf %14, %16 : vector<16x256xf32>
      %cst_15 = arith.constant 0.000000e+00 : f32
      %18 = vector.broadcast %cst_15 : f32 to vector<16x256xf32>
      %19 = arith.maximumf %17, %18 : vector<16x256xf32>
      %20 = arith.truncf %19 : vector<16x256xf32> to vector<16x256xbf16>
      %c0_16 = arith.constant 0 : index
      %c0_17 = arith.constant 0 : index
      %c0_18 = arith.constant 0 : index
      %21 = vector.load %arg7[%c0_16, %c0_17, %c0_18] : memref<1x16x256xbf16, #tpu.memory_space<vmem>>, vector<1x16x256xbf16>
      %22 = vector.shape_cast %21 : vector<1x16x256xbf16> to vector<16x256xbf16>
      %23 = vector.shape_cast %20 : vector<16x256xbf16> to vector<1x16x256xbf16>
      tpu.vector_store %arg7[%c0_16, %c0_17, %c0_18], %23 {strides = array<i32>} : memref<1x16x256xbf16, #tpu.memory_space<vmem>>, vector<1x16x256xbf16>,
    } else {
    }
    return
  }
  func.func @transform_0(%arg0: i32, %arg1: i32, %arg2: i32, %arg3: i32) -> (i32, i32, i32) {
    %c0_i32 = arith.constant 0 : i32
    return %arg0, %arg1, %arg3 : i32, i32, i32
  }
  func.func @transform_1(%arg0: i32, %arg1: i32, %arg2: i32, %arg3: i32) -> (i32, i32, i32) {
    %c0_i32 = arith.constant 0 : i32
    return %arg0, %arg3, %arg2 : i32, i32, i32
  }
  func.func @transform_2(%arg0: i32, %arg1: i32, %arg2: i32, %arg3: i32) -> (i32, i32) {
    %c0_i32 = arith.constant 0 : i32
    %c0_i32_0 = arith.constant 0 : i32
    return %c0_i32, %arg2 : i32, i32
  }
  func.func @transform_3(%arg0: i32, %arg1: i32, %arg2: i32, %arg3: i32) -> (i32, i32, i32) {
    %c0_i32 = arith.constant 0 : i32
    return %arg0, %arg1, %arg2 : i32, i32, i32
  }
}

module attributes {stable_mosaic.version = 11 : i64} {
  func.func @_bmm_affine_kernel(%arg0: i32, %arg1: i32, %arg2: i32, %arg3: i32, %arg4: memref<1x16x512xbf16, #tpu.memory_space<vmem>>, %arg5: memref<1x512x128xbf16, #tpu.memory_space<vmem>>, %arg6: memref<1x128xf32, #tpu.memory_space<vmem>>, %arg7: memref<1x16x128xbf16, #tpu.memory_space<vmem>>, %arg8: memref<16x128xf32, #tpu.memory_space<vmem>>) attributes {dimension_semantics = [#tpu.dimension_semantics<parallel>, #tpu.dimension_semantics<parallel>, #tpu.dimension_semantics<parallel>, #tpu.dimension_semantics<arbitrary>], iteration_bounds = array<i64: 4, 1, 1, 2>, scalar_prefetch = 0 : i64, scratch_operands = 1 : i64, tpu.core_type = #tpu.core_type<tc>, window_params = [{transform_indices = @transform_0, window_bounds = array<i64: 1, 16, 512>}, {transform_indices = @transform_1, window_bounds = array<i64: 1, 512, 128>}, {transform_indices = @transform_2, window_bounds = array<i64: 1, 128>}, {transform_indices = @transform_3, window_bounds = array<i64: 1, 16, 128>}]} {
    %c0_i32 = arith.constant 0 : i32
    %0 = arith.cmpi eq, %arg3, %c0_i32 : i32
    %1 = arith.extui %0 : i1 to i32
    %c0_i32_0 = arith.constant 0 : i32
    %2 = arith.cmpi ne, %1, %c0_i32_0 : i32
    scf.if %2 {
      %cst_11 = arith.constant 0.000000e+00 : f32
      %14 = vector.broadcast %cst_11 : f32 to vector<16x128xf32>
      %c0_12 = arith.constant 0 : index
      %c0_13 = arith.constant 0 : index
      %15 = vector.load %arg8[%c0_12, %c0_13] : memref<16x128xf32, #tpu.memory_space<vmem>>, vector<16x128xf32>
      tpu.vector_store %arg8[%c0_12, %c0_13], %14 {strides = array<i32>} : memref<16x128xf32, #tpu.memory_space<vmem>>, vector<16x128xf32>,
    } else {
    }
    %c0 = arith.constant 0 : index
    %c0_1 = arith.constant 0 : index
    %3 = vector.load %arg8[%c0, %c0_1] : memref<16x128xf32, #tpu.memory_space<vmem>>, vector<16x128xf32>
    %c0_2 = arith.constant 0 : index
    %c0_3 = arith.constant 0 : index
    %c0_4 = arith.constant 0 : index
    %4 = vector.load %arg4[%c0_2, %c0_3, %c0_4] : memref<1x16x512xbf16, #tpu.memory_space<vmem>>, vector<1x16x512xbf16>
    %5 = vector.shape_cast %4 : vector<1x16x512xbf16> to vector<16x512xbf16>
    %c0_5 = arith.constant 0 : index
    %c0_6 = arith.constant 0 : index
    %c0_7 = arith.constant 0 : index
    %6 = vector.load %arg5[%c0_5, %c0_6, %c0_7] : memref<1x512x128xbf16, #tpu.memory_space<vmem>>, vector<1x512x128xbf16>
    %7 = vector.shape_cast %6 : vector<1x512x128xbf16> to vector<512x128xbf16>
    %cst = arith.constant dense<0.000000e+00> : vector<16x128xf32>
    %8 = tpu.matmul %5, %7, %cst {dimension_numbers = #tpu.dot_dimension_numbers<[1], [0], [0], [1], [0, 0, 1, 1], [], []>} : vector<16x512xbf16>, vector<512x128xbf16>, vector<16x128xf32> -> vector<16x128xf32>
    %9 = arith.addf %3, %8 : vector<16x128xf32>
    %c0_8 = arith.constant 0 : index
    %c0_9 = arith.constant 0 : index
    %10 = vector.load %arg8[%c0_8, %c0_9] : memref<16x128xf32, #tpu.memory_space<vmem>>, vector<16x128xf32>
    tpu.vector_store %arg8[%c0_8, %c0_9], %9 {strides = array<i32>} : memref<16x128xf32, #tpu.memory_space<vmem>>, vector<16x128xf32>,
    %c1_i32 = arith.constant 1 : i32
    %11 = arith.cmpi eq, %arg3, %c1_i32 : i32
    %12 = arith.extui %11 : i1 to i32
    %c0_i32_10 = arith.constant 0 : i32
    %13 = arith.cmpi ne, %12, %c0_i32_10 : i32
    scf.if %13 {
      %c0_11 = arith.constant 0 : index
      %c0_12 = arith.constant 0 : index
      %14 = vector.load %arg8[%c0_11, %c0_12] : memref<16x128xf32, #tpu.memory_space<vmem>>, vector<16x128xf32>
      %c0_13 = arith.constant 0 : index
      %c0_14 = arith.constant 0 : index
      %15 = vector.load %arg6[%c0_13, %c0_14] : memref<1x128xf32, #tpu.memory_space<vmem>>, vector<1x128xf32>
      %16 = vector.broadcast %15 : vector<1x128xf32> to vector<16x128xf32>
      %17 = arith.addf %14, %16 : vector<16x128xf32>
      %cst_15 = arith.constant 0.000000e+00 : f32
      %18 = vector.broadcast %cst_15 : f32 to vector<16x128xf32>
      %19 = arith.maximumf %17, %18 : vector<16x128xf32>
      %20 = arith.truncf %19 : vector<16x128xf32> to vector<16x128xbf16>
      %c0_16 = arith.constant 0 : index
      %c0_17 = arith.constant 0 : index
      %c0_18 = arith.constant 0 : index
      %21 = vector.load %arg7[%c0_16, %c0_17, %c0_18] : memref<1x16x128xbf16, #tpu.memory_space<vmem>>, vector<1x16x128xbf16>
      %22 = vector.shape_cast %21 : vector<1x16x128xbf16> to vector<16x128xbf16>
      %23 = vector.shape_cast %20 : vector<16x128xbf16> to vector<1x16x128xbf16>
      tpu.vector_store %arg7[%c0_16, %c0_17, %c0_18], %23 {strides = array<i32>} : memref<1x16x128xbf16, #tpu.memory_space<vmem>>, vector<1x16x128xbf16>,
    } else {
    }
    return
  }
  func.func @transform_0(%arg0: i32, %arg1: i32, %arg2: i32, %arg3: i32) -> (i32, i32, i32) {
    %c0_i32 = arith.constant 0 : i32
    return %arg0, %arg1, %arg3 : i32, i32, i32
  }
  func.func @transform_1(%arg0: i32, %arg1: i32, %arg2: i32, %arg3: i32) -> (i32, i32, i32) {
    %c0_i32 = arith.constant 0 : i32
    return %arg0, %arg3, %arg2 : i32, i32, i32
  }
  func.func @transform_2(%arg0: i32, %arg1: i32, %arg2: i32, %arg3: i32) -> (i32, i32) {
    %c0_i32 = arith.constant 0 : i32
    %c0_i32_0 = arith.constant 0 : i32
    return %c0_i32, %arg2 : i32, i32
  }
  func.func @transform_3(%arg0: i32, %arg1: i32, %arg2: i32, %arg3: i32) -> (i32, i32, i32) {
    %c0_i32 = arith.constant 0 : i32
    return %arg0, %arg1, %arg2 : i32, i32, i32
  }
}

module attributes {stable_mosaic.version = 11 : i64} {
  func.func @_bmm_affine_kernel(%arg0: i32, %arg1: i32, %arg2: i32, %arg3: i32, %arg4: memref<1x32x512xbf16, #tpu.memory_space<vmem>>, %arg5: memref<1x512x128xbf16, #tpu.memory_space<vmem>>, %arg6: memref<1x128xf32, #tpu.memory_space<vmem>>, %arg7: memref<1x32x128xbf16, #tpu.memory_space<vmem>>, %arg8: memref<32x128xf32, #tpu.memory_space<vmem>>) attributes {dimension_semantics = [#tpu.dimension_semantics<parallel>, #tpu.dimension_semantics<parallel>, #tpu.dimension_semantics<parallel>, #tpu.dimension_semantics<arbitrary>], iteration_bounds = array<i64: 4, 1, 1, 1>, scalar_prefetch = 0 : i64, scratch_operands = 1 : i64, tpu.core_type = #tpu.core_type<tc>, window_params = [{transform_indices = @transform_0, window_bounds = array<i64: 1, 32, 512>}, {transform_indices = @transform_1, window_bounds = array<i64: 1, 512, 128>}, {transform_indices = @transform_2, window_bounds = array<i64: 1, 128>}, {transform_indices = @transform_3, window_bounds = array<i64: 1, 32, 128>}]} {
    %c0_i32 = arith.constant 0 : i32
    %0 = arith.cmpi eq, %arg3, %c0_i32 : i32
    %1 = arith.extui %0 : i1 to i32
    %c0_i32_0 = arith.constant 0 : i32
    %2 = arith.cmpi ne, %1, %c0_i32_0 : i32
    scf.if %2 {
      %cst_12 = arith.constant 0.000000e+00 : f32
      %14 = vector.broadcast %cst_12 : f32 to vector<32x128xf32>
      %c0_13 = arith.constant 0 : index
      %c0_14 = arith.constant 0 : index
      %15 = vector.load %arg8[%c0_13, %c0_14] : memref<32x128xf32, #tpu.memory_space<vmem>>, vector<32x128xf32>
      tpu.vector_store %arg8[%c0_13, %c0_14], %14 {strides = array<i32>} : memref<32x128xf32, #tpu.memory_space<vmem>>, vector<32x128xf32>,
    } else {
    }
    %c0 = arith.constant 0 : index
    %c0_1 = arith.constant 0 : index
    %3 = vector.load %arg8[%c0, %c0_1] : memref<32x128xf32, #tpu.memory_space<vmem>>, vector<32x128xf32>
    %c0_2 = arith.constant 0 : index
    %c0_3 = arith.constant 0 : index
    %c0_4 = arith.constant 0 : index
    %4 = vector.load %arg4[%c0_2, %c0_3, %c0_4] : memref<1x32x512xbf16, #tpu.memory_space<vmem>>, vector<1x32x512xbf16>
    %5 = vector.shape_cast %4 : vector<1x32x512xbf16> to vector<32x512xbf16>
    %c0_5 = arith.constant 0 : index
    %c0_6 = arith.constant 0 : index
    %c0_7 = arith.constant 0 : index
    %6 = vector.load %arg5[%c0_5, %c0_6, %c0_7] : memref<1x512x128xbf16, #tpu.memory_space<vmem>>, vector<1x512x128xbf16>
    %7 = vector.shape_cast %6 : vector<1x512x128xbf16> to vector<512x128xbf16>
    %cst = arith.constant dense<0.000000e+00> : vector<32x128xf32>
    %8 = tpu.matmul %5, %7, %cst {dimension_numbers = #tpu.dot_dimension_numbers<[1], [0], [0], [1], [0, 0, 1, 1], [], []>} : vector<32x512xbf16>, vector<512x128xbf16>, vector<32x128xf32> -> vector<32x128xf32>
    %9 = arith.addf %3, %8 : vector<32x128xf32>
    %c0_8 = arith.constant 0 : index
    %c0_9 = arith.constant 0 : index
    %10 = vector.load %arg8[%c0_8, %c0_9] : memref<32x128xf32, #tpu.memory_space<vmem>>, vector<32x128xf32>
    tpu.vector_store %arg8[%c0_8, %c0_9], %9 {strides = array<i32>} : memref<32x128xf32, #tpu.memory_space<vmem>>, vector<32x128xf32>,
    %c0_i32_10 = arith.constant 0 : i32
    %11 = arith.cmpi eq, %arg3, %c0_i32_10 : i32
    %12 = arith.extui %11 : i1 to i32
    %c0_i32_11 = arith.constant 0 : i32
    %13 = arith.cmpi ne, %12, %c0_i32_11 : i32
    scf.if %13 {
      %c0_12 = arith.constant 0 : index
      %c0_13 = arith.constant 0 : index
      %14 = vector.load %arg8[%c0_12, %c0_13] : memref<32x128xf32, #tpu.memory_space<vmem>>, vector<32x128xf32>
      %c0_14 = arith.constant 0 : index
      %c0_15 = arith.constant 0 : index
      %15 = vector.load %arg6[%c0_14, %c0_15] : memref<1x128xf32, #tpu.memory_space<vmem>>, vector<1x128xf32>
      %16 = vector.broadcast %15 : vector<1x128xf32> to vector<32x128xf32>
      %17 = arith.addf %14, %16 : vector<32x128xf32>
      %cst_16 = arith.constant 0.000000e+00 : f32
      %18 = vector.broadcast %cst_16 : f32 to vector<32x128xf32>
      %19 = arith.maximumf %17, %18 : vector<32x128xf32>
      %20 = arith.truncf %19 : vector<32x128xf32> to vector<32x128xbf16>
      %c0_17 = arith.constant 0 : index
      %c0_18 = arith.constant 0 : index
      %c0_19 = arith.constant 0 : index
      %21 = vector.load %arg7[%c0_17, %c0_18, %c0_19] : memref<1x32x128xbf16, #tpu.memory_space<vmem>>, vector<1x32x128xbf16>
      %22 = vector.shape_cast %21 : vector<1x32x128xbf16> to vector<32x128xbf16>
      %23 = vector.shape_cast %20 : vector<32x128xbf16> to vector<1x32x128xbf16>
      tpu.vector_store %arg7[%c0_17, %c0_18, %c0_19], %23 {strides = array<i32>} : memref<1x32x128xbf16, #tpu.memory_space<vmem>>, vector<1x32x128xbf16>,
    } else {
    }
    return
  }
  func.func @transform_0(%arg0: i32, %arg1: i32, %arg2: i32, %arg3: i32) -> (i32, i32, i32) {
    %c0_i32 = arith.constant 0 : i32
    return %arg0, %arg1, %arg3 : i32, i32, i32
  }
  func.func @transform_1(%arg0: i32, %arg1: i32, %arg2: i32, %arg3: i32) -> (i32, i32, i32) {
    %c0_i32 = arith.constant 0 : i32
    return %arg0, %arg3, %arg2 : i32, i32, i32
  }
  func.func @transform_2(%arg0: i32, %arg1: i32, %arg2: i32, %arg3: i32) -> (i32, i32) {
    %c0_i32 = arith.constant 0 : i32
    %c0_i32_0 = arith.constant 0 : i32
    return %c0_i32, %arg2 : i32, i32
  }
  func.func @transform_3(%arg0: i32, %arg1: i32, %arg2: i32, %arg3: i32) -> (i32, i32, i32) {
    %c0_i32 = arith.constant 0 : i32
    return %arg0, %arg1, %arg2 : i32, i32, i32
  }
}

module attributes {stable_mosaic.version = 11 : i64} {
  func.func @_bmm_affine_kernel(%arg0: i32, %arg1: i32, %arg2: i32, %arg3: i32, %arg4: memref<1x128x256xbf16, #tpu.memory_space<vmem>>, %arg5: memref<1x256x128xbf16, #tpu.memory_space<vmem>>, %arg6: memref<1x128xf32, #tpu.memory_space<vmem>>, %arg7: memref<1x128x128xf32, #tpu.memory_space<vmem>>, %arg8: memref<128x128xf32, #tpu.memory_space<vmem>>) attributes {dimension_semantics = [#tpu.dimension_semantics<parallel>, #tpu.dimension_semantics<parallel>, #tpu.dimension_semantics<parallel>, #tpu.dimension_semantics<arbitrary>], iteration_bounds = array<i64: 4, 1, 1, 1>, scalar_prefetch = 0 : i64, scratch_operands = 1 : i64, tpu.core_type = #tpu.core_type<tc>, window_params = [{transform_indices = @transform_0, window_bounds = array<i64: 1, 128, 256>}, {transform_indices = @transform_1, window_bounds = array<i64: 1, 256, 128>}, {transform_indices = @transform_2, window_bounds = array<i64: 1, 128>}, {transform_indices = @transform_3, window_bounds = array<i64: 1, 128, 128>}]} {
    %c0_i32 = arith.constant 0 : i32
    %0 = arith.cmpi eq, %arg3, %c0_i32 : i32
    %1 = arith.extui %0 : i1 to i32
    %c0_i32_0 = arith.constant 0 : i32
    %2 = arith.cmpi ne, %1, %c0_i32_0 : i32
    scf.if %2 {
      %cst_12 = arith.constant 0.000000e+00 : f32
      %14 = vector.broadcast %cst_12 : f32 to vector<128x128xf32>
      %c0_13 = arith.constant 0 : index
      %c0_14 = arith.constant 0 : index
      %15 = vector.load %arg8[%c0_13, %c0_14] : memref<128x128xf32, #tpu.memory_space<vmem>>, vector<128x128xf32>
      tpu.vector_store %arg8[%c0_13, %c0_14], %14 {strides = array<i32>} : memref<128x128xf32, #tpu.memory_space<vmem>>, vector<128x128xf32>,
    } else {
    }
    %c0 = arith.constant 0 : index
    %c0_1 = arith.constant 0 : index
    %3 = vector.load %arg8[%c0, %c0_1] : memref<128x128xf32, #tpu.memory_space<vmem>>, vector<128x128xf32>
    %c0_2 = arith.constant 0 : index
    %c0_3 = arith.constant 0 : index
    %c0_4 = arith.constant 0 : index
    %4 = vector.load %arg4[%c0_2, %c0_3, %c0_4] : memref<1x128x256xbf16, #tpu.memory_space<vmem>>, vector<1x128x256xbf16>
    %5 = vector.shape_cast %4 : vector<1x128x256xbf16> to vector<128x256xbf16>
    %c0_5 = arith.constant 0 : index
    %c0_6 = arith.constant 0 : index
    %c0_7 = arith.constant 0 : index
    %6 = vector.load %arg5[%c0_5, %c0_6, %c0_7] : memref<1x256x128xbf16, #tpu.memory_space<vmem>>, vector<1x256x128xbf16>
    %7 = vector.shape_cast %6 : vector<1x256x128xbf16> to vector<256x128xbf16>
    %cst = arith.constant dense<0.000000e+00> : vector<128x128xf32>
    %8 = tpu.matmul %5, %7, %cst {dimension_numbers = #tpu.dot_dimension_numbers<[1], [0], [0], [1], [0, 0, 1, 1], [], []>} : vector<128x256xbf16>, vector<256x128xbf16>, vector<128x128xf32> -> vector<128x128xf32>
    %9 = arith.addf %3, %8 : vector<128x128xf32>
    %c0_8 = arith.constant 0 : index
    %c0_9 = arith.constant 0 : index
    %10 = vector.load %arg8[%c0_8, %c0_9] : memref<128x128xf32, #tpu.memory_space<vmem>>, vector<128x128xf32>
    tpu.vector_store %arg8[%c0_8, %c0_9], %9 {strides = array<i32>} : memref<128x128xf32, #tpu.memory_space<vmem>>, vector<128x128xf32>,
    %c0_i32_10 = arith.constant 0 : i32
    %11 = arith.cmpi eq, %arg3, %c0_i32_10 : i32
    %12 = arith.extui %11 : i1 to i32
    %c0_i32_11 = arith.constant 0 : i32
    %13 = arith.cmpi ne, %12, %c0_i32_11 : i32
    scf.if %13 {
      %c0_12 = arith.constant 0 : index
      %c0_13 = arith.constant 0 : index
      %14 = vector.load %arg8[%c0_12, %c0_13] : memref<128x128xf32, #tpu.memory_space<vmem>>, vector<128x128xf32>
      %c0_14 = arith.constant 0 : index
      %c0_15 = arith.constant 0 : index
      %15 = vector.load %arg6[%c0_14, %c0_15] : memref<1x128xf32, #tpu.memory_space<vmem>>, vector<1x128xf32>
      %16 = vector.broadcast %15 : vector<1x128xf32> to vector<128x128xf32>
      %17 = arith.addf %14, %16 : vector<128x128xf32>
      %c0_16 = arith.constant 0 : index
      %c0_17 = arith.constant 0 : index
      %c0_18 = arith.constant 0 : index
      %18 = vector.load %arg7[%c0_16, %c0_17, %c0_18] : memref<1x128x128xf32, #tpu.memory_space<vmem>>, vector<1x128x128xf32>
      %19 = vector.shape_cast %18 : vector<1x128x128xf32> to vector<128x128xf32>
      %20 = vector.shape_cast %17 : vector<128x128xf32> to vector<1x128x128xf32>
      tpu.vector_store %arg7[%c0_16, %c0_17, %c0_18], %20 {strides = array<i32>} : memref<1x128x128xf32, #tpu.memory_space<vmem>>, vector<1x128x128xf32>,
    } else {
    }
    return
  }
  func.func @transform_0(%arg0: i32, %arg1: i32, %arg2: i32, %arg3: i32) -> (i32, i32, i32) {
    %c0_i32 = arith.constant 0 : i32
    return %arg0, %arg1, %arg3 : i32, i32, i32
  }
  func.func @transform_1(%arg0: i32, %arg1: i32, %arg2: i32, %arg3: i32) -> (i32, i32, i32) {
    %c0_i32 = arith.constant 0 : i32
    return %arg0, %arg3, %arg2 : i32, i32, i32
  }
  func.func @transform_2(%arg0: i32, %arg1: i32, %arg2: i32, %arg3: i32) -> (i32, i32) {
    %c0_i32 = arith.constant 0 : i32
    %c0_i32_0 = arith.constant 0 : i32
    return %c0_i32, %arg2 : i32, i32
  }
  func.func @transform_3(%arg0: i32, %arg1: i32, %arg2: i32, %arg3: i32) -> (i32, i32, i32) {
    %c0_i32 = arith.constant 0 : i32
    return %arg0, %arg1, %arg2 : i32, i32, i32
  }
}

</mosaic_0001>

<bundles_post_ra>
// kernel: bidirectional_flow_estimator.8
= control target key start
LH: loop header
LB: loop body
LE: loop exit
PB: predicated region body
PF: predicated region fallthrough
CT: control target
= control target key end

     0   :  { %s1355_s12 = smov 0   ;;  %s1357_s13 = smov 0   ;;  %s1544_s0 = inlined_call_operand.vmem [shape: bf16[1,128,512], index: 0, kind: input, shape index: {}]   ;;  %s1545_s1 = inlined_call_operand.vmem [shape: bf16[1,512,128], index: 1, kind: input, shape index: {}]   ;;  %s1546_s2 = inlined_call_operand.vmem [shape: f32[1,128], index: 2, kind: input, shape index: {}]   ;;  %s1547_s3 = inlined_call_operand.vmem [shape: bf16[1,128,128], index: 3, kind: output, shape index: {}]  }
   0x1   :  { %s1359_s14 = smov 0  }
   0x2 LB: > { %s35_s15 = sadd.s32 1, %s1329_s13  ;;  %p1014_p0 = scmp.ge.s32.totalorder %s1333_s14, 1  ;;  %s1333_s14 = sphi %s1359_s14, %s13_s14   ;;  %s1329_s13 = sphi %s1357_s13, %s1549_s13   ;;  %s1325_s12 = sphi %s1355_s12, %s1548_s12  }
   0x3   : > { %p37_p1 = scmp.ge.s32.totalorder %s35_s15, 2  ;;  %p212_p2 = scmp.lt.s32.totalorder %s1333_s14, 3 }
   0x5   : > { %s1551_s15 = smov (%p37_p1, %s35_s15), 0  ;;  %p213_p3 = pnand %p1014_p0, %p212_p2 }
   0x6   : > { %s1015_s17 = sshll.u32 (!%p213_p3), %s1325_s12, 3 }
   0x7   : > { %216 = sbr.rel (%p213_p3) target bundleno = 245 (0xf5), region = 32  ;;  %p271_p4 = scmp.lt.s32.totalorder (!%p213_p3), %s1015_s17, 15 }
   0xc   : > { %v1238_v0 = vld [vmem:[%s1545_s1 + $0x38] sm:$0xff]  ;;  %v1237_v4 = vld [vmem:[%s1545_s1 + $0x30] sm:$0xff]  ;;  %v1236_v8 = vld [vmem:[%s1545_s1 + $0x28] sm:$0xff]  ;;  %s1553_s17 = smov (!%p271_p4, %s1015_s17), 15 }
   0xd   : > { %v1246_v1 = vld [vmem:[%s1545_s1 + $0x78] sm:$0xff]  ;;  %684 = vmatpush.bf16.msra.mxu0 %v1238_v0  ;;  %v1245_v5 = vld [vmem:[%s1545_s1 + $0x70] sm:$0xff]  ;;  %v1244_v9 = vld [vmem:[%s1545_s1 + $0x68] sm:$0xff]  ;;  %s1214_s19 = sshll.u32 %s1553_s17, 4  ;;  %s1019_s18 = sshll.u32 %s1553_s17, 2 }
   0xe   : > { %v1254_v2 = vld [vmem:[%s1545_s1 + $0xb8] sm:$0xff]  ;;  %713 = vmatpush.bf16.msra.mxu1 %v1246_v1  ;;  %v1253_v6 = vld [vmem:[%s1545_s1 + $0xb0] sm:$0xff]  ;;  %v1252_v10 = vld [vmem:[%s1545_s1 + $0xa8] sm:$0xff]  ;;  %s1460_s12 = scalar_lea.vmem %s1544_s0, %s1214_s19  ;;  %s1523_s21 = scalar_lea.vmem %s1547_s3, %s1019_s18 }
   0xf   : > { %v1262_v3 = vld [vmem:[%s1545_s1 + $0xf8] sm:$0xff]  ;;  %742 = vmatpush.bf16.msra.mxu2 %v1254_v2  ;;  %v1261_v7 = vld [vmem:[%s1545_s1 + $0xf0] sm:$0xff]  ;;  %v1260_v11 = vld [vmem:[%s1545_s1 + $0xe8] sm:$0xff] }
  0x10   : > { %771 = vmatpush.bf16.msra.mxu3 %v1262_v3  ;;  %v1235_v12 = vld [vmem:[%s1545_s1 + $0x20] sm:$0xff]  ;;  %v1234_v16 = vld [vmem:[%s1545_s1 + $0x18] sm:$0xff]  ;;  %v1233_v20 = vld [vmem:[%s1545_s1 + $0x10] sm:$0xff] }
  0x11   : > { %685 = vmatpush.bf16.msra.mxu0 %v1237_v4  ;;  %v1243_v13 = vld [vmem:[%s1545_s1 + $0x60] sm:$0xff]  ;;  %v1242_v17 = vld [vmem:[%s1545_s1 + $0x58] sm:$0xff]  ;;  %v1241_v21 = vld [vmem:[%s1545_s1 + $0x50] sm:$0xff] }
  0x12   : > { %714 = vmatpush.bf16.msra.mxu1 %v1245_v5  ;;  %v1251_v14 = vld [vmem:[%s1545_s1 + $0xa0] sm:$0xff]  ;;  %v1250_v18 = vld [vmem:[%s1545_s1 + $0x98] sm:$0xff]  ;;  %v1249_v22 = vld [vmem:[%s1545_s1 + $0x90] sm:$0xff] }
  0x13   : > { %743 = vmatpush.bf16.msra.mxu2 %v1253_v6  ;;  %v1259_v15 = vld [vmem:[%s1545_s1 + $0xe0] sm:$0xff]  ;;  %v1258_v19 = vld [vmem:[%s1545_s1 + $0xd8] sm:$0xff]  ;;  %v1257_v23 = vld [vmem:[%s1545_s1 + $0xd0] sm:$0xff] }
  0x14   : > { %772 = vmatpush.bf16.msra.mxu3 %v1261_v7  ;;  %v1232_v24 = vld [vmem:[%s1545_s1 + $0x8] sm:$0xff]  ;;  %v1231_v28 = vld [vmem:[%s1545_s1] sm:$0xff]  ;;  %v1217_v33 = vld [vmem:[%s1460_s12 + $0xc] sm:$0xf0] }
  0x15   : > { %686 = vmatpush.bf16.msra.mxu0 %v1236_v8  ;;  %v1240_v25 = vld [vmem:[%s1545_s1 + $0x48] sm:$0xff]  ;;  %v1239_v29 = vld [vmem:[%s1545_s1 + $0x40] sm:$0xff]  ;;  %v1024_v35 = vld [vmem:[%s1460_s12 + $0x10] sm:$0xf0] }
  0x16   : > { %715 = vmatpush.bf16.msra.mxu1 %v1244_v9  ;;  %v1248_v26 = vld [vmem:[%s1545_s1 + $0x88] sm:$0xff]  ;;  %v1247_v30 = vld [vmem:[%s1545_s1 + $0x80] sm:$0xff]  ;;  %v1218_v37 = vld [vmem:[%s1460_s12 + $0x14] sm:$0xf0] }
  0x17   : > { %744 = vmatpush.bf16.msra.mxu2 %v1252_v10  ;;  %v1256_v27 = vld [vmem:[%s1545_s1 + $0xc8] sm:$0xff]  ;;  %v1255_v31 = vld [vmem:[%s1545_s1 + $0xc0] sm:$0xff]  ;;  %v1032_v39 = vld [vmem:[%s1460_s12 + $0x18] sm:$0xf0] }
  0x18   : > { %773 = vmatpush.bf16.msra.mxu3 %v1260_v11  ;;  %v1022_v32 = vld [vmem:[%s1460_s12] sm:$0xf]  ;;  %v1215_v34 = vld [vmem:[%s1460_s12 + $0x4] sm:$0xf]  ;;  %v1030_v36 = vld [vmem:[%s1460_s12 + $0x8] sm:$0xf] }
  0x19   : > { %687 = vmatpush.bf16.msra.mxu0 %v1235_v12  ;;  %v1216_v38 = vld [vmem:[%s1460_s12 + $0xc] sm:$0xf]  ;;  %v1023_v40 = vor.u32 %v1217_v33, %v1022_v32  ;;  %v1027_v41 = vor.u32 %v1215_v34, %v1024_v35  ;;  %v1031_v42 = vor.u32 %v1218_v37, %v1030_v36  ;;  %v1038_v44 = vld [vmem:[%s1460_s12 + $0x20] sm:$0xf]  ;;  %v1221_v45 = vld [vmem:[%s1460_s12 + $0x2c] sm:$0xf0] }
  0x1a   : > { %716 = vmatpush.bf16.msra.mxu1 %v1243_v13  ;;  %v1035_v43 = vor.u32 %v1216_v38, %v1032_v39  ;;  %v1219_v46 = vld [vmem:[%s1460_s12 + $0x24] sm:$0xf]  ;;  %v1040_v47 = vld [vmem:[%s1460_s12 + $0x30] sm:$0xf0]  ;;  %v1046_v48 = vld [vmem:[%s1460_s12 + $0x28] sm:$0xf]  ;;  %v1039_v52 = vor.u32 %v1221_v45, %v1038_v44 }
  0x1b   : > { %745 = vmatpush.bf16.msra.mxu2 %v1251_v14  ;;  %v1222_v49 = vld [vmem:[%s1460_s12 + $0x34] sm:$0xf0]  ;;  %v1220_v50 = vld [vmem:[%s1460_s12 + $0x2c] sm:$0xf]  ;;  %v1048_v51 = vld [vmem:[%s1460_s12 + $0x38] sm:$0xf0]  ;;  %v1043_v53 = vor.u32 %v1219_v46, %v1040_v47 }
  0x1c   : > { %774 = vmatpush.bf16.msra.mxu3 %v1259_v15  ;;  %v1047_v54 = vor.u32 %v1222_v49, %v1046_v48  ;;  %v1051_v55 = vor.u32 %v1220_v50, %v1048_v51  ;;  %v1054_v56 = vld [vmem:[%s1460_s12 + $0x40] sm:$0xf]  ;;  %v1225_v57 = vld [vmem:[%s1460_s12 + $0x4c] sm:$0xf0]  ;;  %v1223_v58 = vld [vmem:[%s1460_s12 + $0x44] sm:$0xf] }
  0x1d   : > { %688 = vmatpush.bf16.msra.mxu0 %v1234_v16  ;;  %v1056_v59 = vld [vmem:[%s1460_s12 + $0x50] sm:$0xf0]  ;;  %v1062_v60 = vld [vmem:[%s1460_s12 + $0x48] sm:$0xf]  ;;  %v1226_v61 = vld [vmem:[%s1460_s12 + $0x54] sm:$0xf0]  ;;  %v1055_v0 = vor.u32 %v1225_v57, %v1054_v56 }
  0x1e   : > { %717 = vmatpush.bf16.msra.mxu1 %v1242_v17  ;;  %v1224_v62 = vld [vmem:[%s1460_s12 + $0x4c] sm:$0xf]  ;;  %v1064_v63 = vld [vmem:[%s1460_s12 + $0x58] sm:$0xf0]  ;;  %v1059_v1 = vor.u32 %v1223_v58, %v1056_v59  ;;  %v1063_v2 = vor.u32 %v1226_v61, %v1062_v60  ;;  %v1070_v4 = vld [vmem:[%s1460_s12 + $0x60] sm:$0xf] }
  0x1f   : > { %746 = vmatpush.bf16.msra.mxu2 %v1250_v18  ;;  %v1067_v3 = vor.u32 %v1224_v62, %v1064_v63  ;;  %v1229_v5 = vld [vmem:[%s1460_s12 + $0x6c] sm:$0xf0]  ;;  %v1227_v6 = vld [vmem:[%s1460_s12 + $0x64] sm:$0xf]  ;;  %v1072_v7 = vld [vmem:[%s1460_s12 + $0x70] sm:$0xf0] }
  0x20   : > { %775 = vmatpush.bf16.msra.mxu3 %v1258_v19  ;;  %v1078_v8 = vld [vmem:[%s1460_s12 + $0x68] sm:$0xf]  ;;  %v1230_v9 = vld [vmem:[%s1460_s12 + $0x74] sm:$0xf0]  ;;  %v1228_v10 = vld [vmem:[%s1460_s12 + $0x6c] sm:$0xf]  ;;  %v1071_v12 = vor.u32 %v1229_v5, %v1070_v4  ;;  %v1075_v13 = vor.u32 %v1227_v6, %v1072_v7 }
  0x21   : > { %689 = vmatpush.bf16.msra.mxu0 %v1233_v20  ;;  %v1080_v11 = vld [vmem:[%s1460_s12 + $0x78] sm:$0xf0]  ;;  %v1079_v14 = vor.u32 %v1230_v9, %v1078_v8 }
  0x22   : > { %718 = vmatpush.bf16.msra.mxu1 %v1241_v21  ;;  %v1083_v15 = vor.u32 %v1228_v10, %v1080_v11 }
  0x23   : > { %747 = vmatpush.bf16.msra.mxu2 %v1249_v22 }
  0x24   : > { %776 = vmatpush.bf16.msra.mxu3 %v1257_v23 }
  0x25   : > { %690 = vmatpush.bf16.msra.mxu0 %v1232_v24 }
  0x26   : > { %719 = vmatpush.bf16.msra.mxu1 %v1240_v25  ;;  %v1515_v25 = vld [vmem:[%s1546_s2] ss:$0 sm:$0xff] }
  0x27   : > { %748 = vmatpush.bf16.msra.mxu2 %v1248_v26 }
  0x28   : > { %777 = vmatpush.bf16.msra.mxu3 %v1256_v27 }
  0x29   : > { %691 = vmatpush.bf16.msra.mxu0 %v1231_v28 }
  0x2a   : > { %720 = vmatpush.bf16.msra.mxu1 %v1239_v29 }
  0x2b   : > { %749 = vmatpush.bf16.msra.mxu2 %v1247_v30 }
  0x2c   : > { %778 = vmatpush.bf16.msra.mxu3 %v1255_v31  ;;  %692 = vmatmul.bf16.vlgmr.msra.gmra.mxu0 %v1023_v40 }
  0x2d   : > { %721 = vmatmul.bf16.vlgmr.msra.gmra.mxu1 %v1027_v41 }
  0x2e   : > { %750 = vmatmul.bf16.vlgmr.msra.gmra.mxu2 %v1031_v42 }
  0x2f   : > { %779 = vmatmul.bf16.vlgmr.msra.gmra.mxu3 %v1035_v43 }
  0x3c   : > { %697 = vmatmul.bf16.gmra.mxu0 %v1039_v52 }
  0x3d   : > { %726 = vmatmul.bf16.gmra.mxu1 %v1043_v53 }
  0x3e   : > { %755 = vmatmul.bf16.gmra.mxu2 %v1047_v54 }
  0x3f   : > { %784 = vmatmul.bf16.gmra.mxu3 %v1051_v55 }
  0x4c   : > { %702 = vmatmul.bf16.gmra.mxu0 %v1055_v0 }
  0x4d   : > { %731 = vmatmul.bf16.gmra.mxu1 %v1059_v1 }
  0x4e   : > { %760 = vmatmul.bf16.gmra.mxu2 %v1063_v2 }
  0x4f   : > { %789 = vmatmul.bf16.gmra.mxu3 %v1067_v3 }
  0x5c   : > { %707 = vmatmul.bf16.gmra.mxu0 %v1071_v12 }
  0x5d   : > { %736 = vmatmul.bf16.gmra.mxu1 %v1075_v13 }
  0x5e   : > { %765 = vmatmul.bf16.gmra.mxu2 %v1079_v14 }
  0x5f   : > { %794 = vmatmul.bf16.gmra.mxu3 %v1083_v15 }
  0xa9   : > { %v693_v16 = vpop.f32.mrf.mxu0 }
  0xaa   : > { %v722_v17 = vpop.f32.mrf.mxu1 }
  0xab   : > { %v723_v18 = vadd.f32 %v722_v17, %v693_v16 }
  0xb1   : > { %v751_v19 = vpop.f32.mrf.mxu2  ;;  %v695_v21 = vpop.f32.mrf.mxu0 }
  0xb2   : > { %v780_v20 = vpop.f32.mrf.mxu3  ;;  %v724_v22 = vpop.f32.mrf.mxu1  ;;  %v752_v23 = vadd.f32 %v751_v19, %v723_v18 }
  0xb3   : > { %v725_v26 = vadd.f32 %v724_v22, %v695_v21 }
  0xb4   : > { %v781_v24 = vadd.f32 %v780_v20, %v752_v23 }
  0xb6   : > { %v831_v32 = vadd.f32 %v1515_v25, %v781_v24 }
  0xb8   : > { %v839_v35 = vmax.f32 %v831_v32, 0.0 }
  0xb9   : > { %v753_v27 = vpop.f32.mrf.mxu2  ;;  %v698_v30 = vpop.f32.mrf.mxu0 }
  0xba   : > { %v782_v28 = vpop.f32.mrf.mxu3  ;;  %v754_v29 = vadd.f32 %v753_v27, %v725_v26  ;;  %v727_v31 = vpop.f32.mrf.mxu1 }
  0xbb   : > { %v728_v37 = vadd.f32 %v727_v31, %v698_v30 }
  0xbc   : > { %v783_v33 = vadd.f32 %v782_v28, %v754_v29 }
  0xbe   : > { %v832_v34 = vadd.f32 %v1515_v25, %v783_v33 }
  0xc0   : > { %v840_v36 = vmax.f32 %v832_v34, 0.0 }
  0xc1   : > { %v756_v38 = vpop.f32.mrf.mxu2  ;;  %v700_v41 = vpop.f32.mrf.mxu0 }
  0xc2   : > { %v785_v39 = vpop.f32.mrf.mxu3  ;;  %v1266_v40 = vpack.c.bf16 %v840_v36, %v839_v35  ;;  %v729_v42 = vpop.f32.mrf.mxu1  ;;  %v757_v43 = vadd.f32 %v756_v38, %v728_v37 }
  0xc3   : > { %v730_v45 = vadd.f32 %v729_v42, %v700_v41 }
  0xc4   : > { %1267 = vst [vmem:[%s1523_s21] sm:$0xff] %v1266_v40   ;;  %v786_v44 = vadd.f32 %v785_v39, %v757_v43 }
  0xc6   : > { %v833_v51 = vadd.f32 %v1515_v25, %v786_v44 }
  0xc8   : > { %v841_v54 = vmax.f32 %v833_v51, 0.0 }
  0xc9   : > { %v758_v46 = vpop.f32.mrf.mxu2  ;;  %v703_v49 = vpop.f32.mrf.mxu0 }
  0xca   : > { %v787_v47 = vpop.f32.mrf.mxu3  ;;  %v759_v48 = vadd.f32 %v758_v46, %v730_v45  ;;  %v732_v50 = vpop.f32.mrf.mxu1 }
  0xcb   : > { %v733_v56 = vadd.f32 %v732_v50, %v703_v49 }
  0xcc   : > { %v788_v52 = vadd.f32 %v787_v47, %v759_v48 }
  0xce   : > { %v834_v53 = vadd.f32 %v1515_v25, %v788_v52 }
  0xd0   : > { %v842_v55 = vmax.f32 %v834_v53, 0.0 }
  0xd1   : > { %v761_v57 = vpop.f32.mrf.mxu2  ;;  %v705_v60 = vpop.f32.mrf.mxu0 }
  0xd2   : > { %v790_v58 = vpop.f32.mrf.mxu3  ;;  %v1271_v59 = vpack.c.bf16 %v842_v55, %v841_v54  ;;  %v734_v61 = vpop.f32.mrf.mxu1  ;;  %v762_v62 = vadd.f32 %v761_v57, %v733_v56 }
  0xd3   : > { %v735_v0 = vadd.f32 %v734_v61, %v705_v60 }
  0xd4   : > { %1283 = vst [vmem:[%s1523_s21 + $0x8] sm:$0xff] %v1271_v59   ;;  %v791_v63 = vadd.f32 %v790_v58, %v762_v62 }
  0xd6   : > { %v835_v6 = vadd.f32 %v1515_v25, %v791_v63 }
  0xd8   : > { %v843_v9 = vmax.f32 %v835_v6, 0.0 }
  0xd9   : > { %v763_v1 = vpop.f32.mrf.mxu2  ;;  %v708_v4 = vpop.f32.mrf.mxu0 }
  0xda   : > { %v792_v2 = vpop.f32.mrf.mxu3  ;;  %v764_v3 = vadd.f32 %v763_v1, %v735_v0  ;;  %v737_v5 = vpop.f32.mrf.mxu1 }
  0xdb   : > { %v738_v11 = vadd.f32 %v737_v5, %v708_v4 }
  0xdc   : > { %v793_v7 = vadd.f32 %v792_v2, %v764_v3 }
  0xde   : > { %v836_v8 = vadd.f32 %v1515_v25, %v793_v7 }
  0xe0   : > { %v844_v10 = vmax.f32 %v836_v8, 0.0 }
  0xe1   : > { %v766_v12 = vpop.f32.mrf.mxu2  ;;  %v710_v16 = vpop.f32.mrf.mxu0 }
  0xe2   : > { %v795_v13 = vpop.f32.mrf.mxu3  ;;  %v1276_v14 = vpack.c.bf16 %v844_v10, %v843_v9  ;;  %v767_v15 = vadd.f32 %v766_v12, %v738_v11  ;;  %v739_v17 = vpop.f32.mrf.mxu1 }
  0xe3   : > { %v740_v19 = vadd.f32 %v739_v17, %v710_v16 }
  0xe4   : > { %1284 = vst [vmem:[%s1523_s21 + $0x10] sm:$0xff] %v1276_v14   ;;  %v796_v18 = vadd.f32 %v795_v13, %v767_v15 }
  0xe6   : > { %v837_v23 = vadd.f32 %v1515_v25, %v796_v18 }
  0xe8   : > { %v845_v27 = vmax.f32 %v837_v23, 0.0 }
  0xe9   : > { %v768_v20 = vpop.f32.mrf.mxu2 }
  0xea   : > { %v769_v21 = vadd.f32 %v768_v20, %v740_v19  ;;  %v797_v22 = vpop.f32.mrf.mxu3 }
  0xec   : > { %v798_v24 = vadd.f32 %v797_v22, %v769_v21 }
  0xee   : > { %v838_v26 = vadd.f32 %v1515_v25, %v798_v24 }
  0xf0   : > { %v846_v28 = vmax.f32 %v838_v26, 0.0 }
  0xf2   : > { %v1281_v29 = vpack.c.bf16 %v846_v28, %v845_v27 }
  0xf4   : > { %1285 = vst [vmem:[%s1523_s21 + $0x18] sm:$0xff] %v1281_v29  }
  0xf5 PF: > { %s13_s14 = sadd.s32 1, %s1333_s14   ;;  %s1548_s12 = smov %s1329_s13 }
  0xf6   : > { %p10_p5 = scmp.ge.s32.totalorder %s13_s14, 4   ;;  %s1549_s13 = smov %s1551_s15 }
  0xf8   :  { %12 = sbr.rel (!%p10_p5) target bundleno = 2 (0x2), region = 76 }

// kernel: bidirectional_flow_estimator.9
= control target key start
LH: loop header
LB: loop body
LE: loop exit
PB: predicated region body
PF: predicated region fallthrough
CT: control target
= control target key end

     0   :  { %s921_s12 = smov 0   ;;  %s923_s13 = smov 0   ;;  %s1045_s0 = inlined_call_operand.vmem [shape: bf16[1,32,1792], index: 0, kind: input, shape index: {}]   ;;  %s1046_s1 = inlined_call_operand.vmem [shape: bf16[1,1792,128], index: 1, kind: input, shape index: {}]   ;;  %s1047_s2 = inlined_call_operand.vmem [shape: f32[1,128], index: 2, kind: input, shape index: {}]   ;;  %s1048_s3 = inlined_call_operand.vmem [shape: bf16[1,32,128], index: 3, kind: output, shape index: {}]  }
   0x1   :  { %s925_s14 = smov 0   ;;  %s927_s15 = smov 0  }
   0x2   :  { %s929_s16 = smov 0   ;;  %s931_s17 = smov 0  }
   0x3   :  { %s933_s18 = smov 0  }
   0x4 LB: > { %s28_s19 = sadd.s32 1, %s890_s16  ;;  %s35_s20 = sadd.s32 1, %s894_s17  ;;  %s898_s18 = sphi %s933_s18, %s13_s18   ;;  %s894_s17 = sphi %s931_s17, %s1054_s17   ;;  %s890_s16 = sphi %s929_s16, %s1053_s16   ;;  %s886_s15 = sphi %s927_s15, %s1052_s15   ;;  %s882_s14 = sphi %s925_s14, %s1051_s14   ;;  %s878_s13 = sphi %s923_s13, %s1050_s13   ;;  %s874_s12 = sphi %s921_s12, %s1049_s12  }
   0x5   : > { %p29_p0 = scmp.ge.s32.totalorder %s28_s19, 7  ;;  %p57_p1 = scmp.ne.s32.totalorder %s878_s13, %s874_s12 }
   0x6   : > { %p58_p2 = scmp.eq.s32.totalorder %s898_s18, 0  ;;  %s50_s24 = sadd.s32 1, %s878_s13 }
   0x7   : > { %s1056_s19 = smov (%p29_p0, %s28_s19), 0  ;;  %s1058_s20 = smov (!%p29_p0, %s35_s20), %s894_s17 }
   0x8   : > { %p59_p3 = por %p58_p2, %p57_p1  ;;  %p37_p4 = scmp.ge.s32.totalorder %s1058_s20, 2 }
   0x9   : > { %s46_s21 = ssub.s32 %s890_s16, %s1056_s19  ;;  %p674_p6 = scmp.ge.s32.totalorder %s898_s18, 14 }
   0xa   : > { %s1060_s20 = smov (%p37_p4, %s1058_s20), 0 }
   0xb   : > { %s44_s22 = ssub.s32 %s894_s17, %s1060_s20  ;;  %175 = sbr.rel (%p674_p6) target bundleno = 26 (0x1a), region = 20 }
   0xc   : > { %s47_s23 = sor.u32 %s46_s21, %s44_s22 }
   0xd   : > { %p48_p5 = scmp.eq.s32.totalorder %s47_s23, 0 }
   0xf   : > { %s972_s25 = scalar_select %p48_p5, %s878_s13, %s50_s24  }
  0x10   : > { %178 = sbr.rel (!%p59_p3) target bundleno = 26 (0x1a), region = 24  ;;  %s180_s26 = sand.u32 (%p59_p3), 1, %s878_s13  }
  0x11   : > { %s677_s27 = sshll.u32 (%p59_p3), %s890_s16, 1  ;;  %s675_s28 = sshll.u32 (%p59_p3), %s180_s26, 4 }
  0x12   : > { %s785_s29 = smul.u32 (%p59_p3), 28, %s894_s17  ;;  %s182_s8 = scalar_lea.vmem (%p59_p3), [#allocation3], %s675_s28 }
  0x14   : > { %s186_s30 = sadd.s32 (%p59_p3), %s785_s29, %s677_s27 }
  0x15   : > { %s679_s4 = sshll.u32 %s186_s30, 2 }
  0x16   : > { %s190_s7 = scalar_lea.vmem %s1045_s0, %s679_s4 }
  0x17   : > { %v221_v0 = vld [vmem:[%s190_s7] sm:$0xff]  ;;  %v223_v1 = vld [vmem:[%s190_s7 + $0x38] sm:$0xff] }
  0x18   : > { %222 = vst [vmem:[%s182_s8] sm:$0xff] %v221_v0 }
  0x19   : > { %224 = vst [vmem:[%s182_s8 + $0x8] sm:$0xff] %v223_v1 }
  0x1a PF: > { %p680_p7 = scmp.ge.s32.totalorder %s898_s18, 1  ;;  %p245_p8 = scmp.lt.s32.totalorder %s898_s18, 15 }
  0x1c   : > { %p246_p9 = pnand %p680_p7, %p245_p8 }
  0x1d   : > { %s252_s9 = sand.u32 (!%p246_p9), 1, %s874_s12   ;;  %s682_s10 = sshll.u32 (!%p246_p9), %s882_s14, 5 }
  0x1e   : > { %249 = sbr.rel (%p246_p9) target bundleno = 232 (0xe8), region = 66  ;;  %s681_s11 = sshll.u32 (!%p246_p9), %s252_s9, 4 }
  0x1f   : > { %p302_p10 = scmp.lt.s32.totalorder (!%p246_p9), %s682_s10, 223  ;;  %s684_s21 = sshll.u32 (!%p246_p9), %s886_s15, 1 }
  0x20   : > { %p318_p11 = scmp.lt.s32.totalorder (!%p246_p9), %s684_s21, 3  ;;  %s996_s12 = scalar_lea.vmem (!%p246_p9), [#allocation3], %s681_s11 }
  0x21   : > { %p686_p12 = scmp.ne.s32.totalorder (!%p246_p9), %s882_s14, 0 }
  0x23   : > { %s1062_s10 = smov (!%p302_p10, %s682_s10), 223  ;;  %s1064_s21 = smov (!%p318_p11, %s684_s21), 3 }
  0x24   : > { %s683_s22 = sshll.u32 %s1062_s10, 2  ;;  %s685_s27 = sshll.u32 %s1064_s21, 2 }
  0x25   : > { %s989_s26 = scalar_lea.vmem %s1046_s1, %s683_s22  ;;  %s994_s30 = scalar_lea.vmem %s1048_s3, %s685_s27 }
  0x26   : > { %331 = sbr.rel (%p686_p12) target bundleno = 46 (0x2e), region = 74 }
  0x2b   : > { %v900_v2 = vmov 0.0  }
  0x2c   : > { %332 = vst [vmem:[#allocation2] sm:$0xff] %v900_v2 }
  0x2d   : > { %333 = vst [vmem:[#allocation2 + $0x8] sm:$0xff] %v900_v2 }
  0x2e PF: > { %v771_v3 = vld [vmem:[%s989_s26 + $0x38] sm:$0xff]  ;;  %v770_v5 = vld [vmem:[%s989_s26 + $0x30] sm:$0xff]  ;;  %v769_v7 = vld [vmem:[%s989_s26 + $0x28] sm:$0xff]  ;;  %p759_p13 = scmp.ne.s32.totalorder %s882_s14, 6 }
  0x2f   : > { %v779_v4 = vld [vmem:[%s989_s26 + $0x78] sm:$0xff]  ;;  %476 = vmatpush.bf16.msra.mxu0 %v771_v3  ;;  %v778_v6 = vld [vmem:[%s989_s26 + $0x70] sm:$0xff]  ;;  %v777_v8 = vld [vmem:[%s989_s26 + $0x68] sm:$0xff] }
  0x30   : > { %490 = vmatpush.bf16.msra.mxu1 %v779_v4  ;;  %v768_v9 = vld [vmem:[%s989_s26 + $0x20] sm:$0xff]  ;;  %v767_v11 = vld [vmem:[%s989_s26 + $0x18] sm:$0xff]  ;;  %v766_v13 = vld [vmem:[%s989_s26 + $0x10] sm:$0xff] }
  0x31   : > { %v776_v10 = vld [vmem:[%s989_s26 + $0x60] sm:$0xff]  ;;  %v775_v12 = vld [vmem:[%s989_s26 + $0x58] sm:$0xff]  ;;  %v774_v14 = vld [vmem:[%s989_s26 + $0x50] sm:$0xff] }
  0x32   : > { %v765_v15 = vld [vmem:[%s989_s26 + $0x8] sm:$0xff]  ;;  %v764_v17 = vld [vmem:[%s989_s26] sm:$0xff] }
  0x33   : > { %477 = vmatpush.bf16.msra.mxu0 %v770_v5  ;;  %v773_v16 = vld [vmem:[%s989_s26 + $0x48] sm:$0xff]  ;;  %v772_v18 = vld [vmem:[%s989_s26 + $0x40] sm:$0xff] }
  0x34   : > { %491 = vmatpush.bf16.msra.mxu1 %v778_v6  ;;  %v689_v19 = vld [vmem:[%s996_s12] sm:$0xf]  ;;  %v763_v20 = vld [vmem:[%s996_s12 + $0x4] sm:$0xf0]  ;;  %v762_v21 = vld [vmem:[%s996_s12 + $0x4] sm:$0xf] }
  0x35   : > { %v691_v22 = vld [vmem:[%s996_s12 + $0x8] sm:$0xf0]  ;;  %v690_v23 = vor.u32 %v763_v20, %v689_v19  ;;  %v334_v26 = vld [vmem:[#allocation2] sm:$0xff] }
  0x36   : > { %v694_v24 = vor.u32 %v762_v21, %v691_v22  ;;  %v335_v31 = vld [vmem:[#allocation2 + $0x8] sm:$0xff] }
  0x37   : > { %478 = vmatpush.bf16.msra.mxu0 %v769_v7 }
  0x38   : > { %492 = vmatpush.bf16.msra.mxu1 %v777_v8 }
  0x3b   : > { %479 = vmatpush.bf16.msra.mxu0 %v768_v9 }
  0x3c   : > { %493 = vmatpush.bf16.msra.mxu1 %v776_v10 }
  0x3f   : > { %480 = vmatpush.bf16.msra.mxu0 %v767_v11 }
  0x40   : > { %494 = vmatpush.bf16.msra.mxu1 %v775_v12 }
  0x43   : > { %481 = vmatpush.bf16.msra.mxu0 %v766_v13 }
  0x44   : > { %495 = vmatpush.bf16.msra.mxu1 %v774_v14 }
  0x47   : > { %482 = vmatpush.bf16.msra.mxu0 %v765_v15 }
  0x48   : > { %496 = vmatpush.bf16.msra.mxu1 %v773_v16 }
  0x4b   : > { %483 = vmatpush.bf16.msra.mxu0 %v764_v17 }
  0x4c   : > { %497 = vmatpush.bf16.msra.mxu1 %v772_v18 }
  0x4e   : > { %484 = vmatmul.bf16.vlgmr.msra.gmra.mxu0 %v690_v23 }
  0x4f   : > { %498 = vmatmul.bf16.vlgmr.msra.gmra.mxu1 %v694_v24 }
  0xcb   : > { %v485_v25 = vpop.f32.mrf.mxu0 }
  0xcc   : > { %v499_v27 = vpop.f32.mrf.mxu1 }
  0xcd   : > { %v500_v28 = vadd.f32 %v499_v27, %v485_v25 }
  0xcf   : > { %v504_v29 = vadd.f32 %v500_v28, %v334_v26 }
  0xd1   : > { %506 = vst [vmem:[#allocation2] sm:$0xff] %v504_v29 }
  0xd3   : > { %v487_v30 = vpop.f32.mrf.mxu0 }
  0xd4   : > { %v501_v32 = vpop.f32.mrf.mxu1 }
  0xd5   : > { %v502_v33 = vadd.f32 %v501_v32, %v487_v30  ;;  %511 = sbr.rel (%p759_p13) target bundleno = 232 (0xe8), region = 78 }
  0xd7   : > { %v505_v34 = vadd.f32 %v502_v33, %v335_v31 }
  0xd9   : > { %507 = vst [vmem:[#allocation2 + $0x8] sm:$0xff] %v505_v34 }
  0xda   : > { %v512_v35 = vld [vmem:[#allocation2] sm:$0xff] }
  0xdb   : > { %v843_v37 = vld [vmem:[%s1047_s2] ss:$0 sm:$0xff] }
  0xdc   : > { %v518_v38 = vadd.f32 %v843_v37, %v512_v35 }
  0xde   : > { %v520_v40 = vmax.f32 %v518_v38, 0.0 }
  0xe0   : > { %v513_v36 = vld [vmem:[#allocation2 + $0x8] sm:$0xff] }
  0xe1   : > { %v519_v39 = vadd.f32 %v843_v37, %v513_v36 }
  0xe3   : > { %v521_v41 = vmax.f32 %v519_v39, 0.0 }
  0xe5   : > { %v783_v42 = vpack.c.bf16 %v521_v41, %v520_v40 }
  0xe7   : > { %784 = vst [vmem:[%s994_s30] sm:$0xff] %v783_v42  }
  0xe8 PF: > { %s13_s18 = sadd.s32 1, %s898_s18   ;;  %s1049_s12 = smov %s878_s13 }
  0xe9   : > { %p10_p0 = scmp.ge.s32.totalorder %s13_s18, 16   ;;  %s1050_s13 = smov %s972_s25 }
  0xea   : > { %s1051_s14 = smov %s890_s16  ;;  %s1052_s15 = smov %s894_s17 }
  0xeb   : > { %s1053_s16 = smov %s1056_s19  ;;  %s1054_s17 = smov %s1060_s20 }
  0xec   :  { %12 = sbr.rel (!%p10_p0) target bundleno = 4 (0x4), region = 119 }

// kernel: squeeze.6
= control target key start
LH: loop header
LB: loop body
LE: loop exit
PB: predicated region body
PF: predicated region fallthrough
CT: control target
= control target key end

     0   :  { %s155_s0 = inlined_call_operand.vmem [shape: bf16[1,8,256], index: 0, kind: input, shape index: {}]   ;;  %s156_s1 = inlined_call_operand.vmem [shape: bf16[2,2,2,256], index: 1, kind: output, shape index: {}]  }
   0x1   :  { %v115_v0 = vld [vmem:[%s155_s0] sm:$0xff]  }
   0x2   :  { %v116_v1 = vunpack.c.l.bf16 %v115_v0  ;;  %v117_v2 = vunpack.c.h.bf16 %v115_v0 }
   0x4   :  { %33 = vst [vmem:[#allocation0] sm:$0x3] %v116_v1  }
   0x5   :  { %35 = vst [vmem:[#allocation0 + $0xe] sm:$0xc] %v116_v1  }
   0x6   :  { %37 = vst [vmem:[#allocation0 + $0x1c] sm:$0x30] %v116_v1  }
   0x7   :  { %39 = vst [vmem:[#allocation0 + $0x2a] sm:$0xc0] %v116_v1  }
   0x8   :  { %43 = vst [vmem:[#allocation0 + $0x8] sm:$0x3] %v117_v2  }
   0x9   :  { %45 = vst [vmem:[#allocation0 + $0x16] sm:$0xc] %v117_v2  }
   0xa   :  { %47 = vst [vmem:[#allocation0 + $0x24] sm:$0x30] %v117_v2  }
   0xb   :  { %49 = vst [vmem:[#allocation0 + $0x32] sm:$0xc0] %v117_v2   ;;  %v52_v3 = vld [vmem:[#allocation0] sm:$0x3] }
   0xc   :  { %v53_v4 = vpack.c.bf16 0.0, %v52_v3  ;;  %v65_v5 = vld [vmem:[#allocation0 + $0x10] sm:$0x3] }
   0xd   :  { %v66_v6 = vpack.c.bf16 0.0, %v65_v5  ;;  %v79_v7 = vld [vmem:[#allocation0 + $0x20] sm:$0x3] }
   0xe   :  { %56 = vst [vmem:[%s156_s1] sm:$0x1] %v53_v4  ;;  %v80_v8 = vpack.c.bf16 0.0, %v79_v7  ;;  %v93_v9 = vld [vmem:[#allocation0 + $0x30] sm:$0x3] }
   0xf   :  { %v58_v10 = vld [vmem:[#allocation0 + $0x8] sm:$0x3]  ;;  %108 = vst [vmem:[%s156_s1 + $0x2] sm:$0x1] %v66_v6  ;;  %v94_v11 = vpack.c.bf16 0.0, %v93_v9 }
  0x10   :  { %v59_v12 = vpack.c.bf16 0.0, %v58_v10  ;;  %v72_v13 = vld [vmem:[#allocation0 + $0x18] sm:$0x3]  ;;  %110 = vst [vmem:[%s156_s1 + $0x4] sm:$0x1] %v80_v8 }
  0x11   :  { %v73_v14 = vpack.c.bf16 0.0, %v72_v13  ;;  %v86_v15 = vld [vmem:[#allocation0 + $0x28] sm:$0x3]  ;;  %112 = vst [vmem:[%s156_s1 + $0x6] sm:$0x1] %v94_v11 }
  0x12   :  { %107 = vst [vmem:[%s156_s1 + $0x1] sm:$0x1] %v59_v12  ;;  %v87_v16 = vpack.c.bf16 0.0, %v86_v15  ;;  %v100_v17 = vld [vmem:[#allocation0 + $0x38] sm:$0x3] }
  0x13   :  { %109 = vst [vmem:[%s156_s1 + $0x3] sm:$0x1] %v73_v14  ;;  %v101_v18 = vpack.c.bf16 0.0, %v100_v17 }
  0x14   :  { %111 = vst [vmem:[%s156_s1 + $0x5] sm:$0x1] %v87_v16 }
  0x15   :  { %113 = vst [vmem:[%s156_s1 + $0x7] sm:$0x1] %v101_v18 }

// kernel: bidirectional_flow_estimator.10
= control target key start
LH: loop header
LB: loop body
LE: loop exit
PB: predicated region body
PF: predicated region fallthrough
CT: control target
= control target key end

     0   :  { %s1872_s0 = inlined_call_operand.vmem [shape: bf16[1,16,3584], index: 0, kind: input, shape index: {}]   ;;  %s1873_s1 = inlined_call_operand.vmem [shape: bf16[1,3584,256], index: 1, kind: input, shape index: {}]   ;;  %s1874_s2 = inlined_call_operand.vmem [shape: f32[1,256], index: 2, kind: input, shape index: {}]   ;;  %s1875_s3 = inlined_call_operand.vmem [shape: bf16[1,16,256], index: 3, kind: output, shape index: {}]  }
   0x1   :  { %1877 = sst [smem:[#allocation7_spill]] %s1872_s0 }
   0x2   :  { %1878 = sst [smem:[#allocation8_spill]] %s1873_s1 }
   0x3   :  { %s1518_s12 = smov 0   ;;  %s1520_s13 = smov 0  }
   0x4   :  { %s1522_s14 = smov 0   ;;  %s1524_s15 = smov 0  }
   0x5   :  { %s1526_s16 = smov 0   ;;  %s1528_s17 = smov 0  }
   0x6   :  { %s1530_s18 = smov 0   ;;  %s1532_s19 = smov 0  }
   0x7   :  { %s1534_s20 = smov 0   ;;  %s1536_s21 = smov 0  }
   0x8   :  { %s1538_s22 = smov 0  }
   0x9 LB: > { %s1111_s23 = sadd.s32 4294967295, %s1495_s22   ;;  %s28_s24 = sadd.s32 1, %s1487_s20  ;;  %s1495_s22 = sphi %s1538_s22, %s13_s22   ;;  %s1491_s21 = sphi %s1536_s21, %s1895_s21   ;;  %s1487_s20 = sphi %s1534_s20, %s1894_s20   ;;  %s1483_s19 = sphi %s1532_s19, %s1893_s19   ;;  %s1479_s18 = sphi %s1530_s18, %s1892_s18   ;;  %s1475_s17 = sphi %s1528_s17, %s1891_s17   ;;  %s1471_s16 = sphi %s1526_s16, %s1890_s16   ;;  %s1467_s15 = sphi %s1524_s15, %s1889_s15   ;;  %s1463_s14 = sphi %s1522_s14, %s1888_s14   ;;  %s1459_s13 = sphi %s1520_s13, %s1887_s13   ;;  %s1455_s12 = sphi %s1518_s12, %s1886_s12  }
   0xa   : > { %p29_p0 = scmp.ge.s32.totalorder %s28_s24, 7  ;;  %s31_s25 = sadd.s32 1, %s1491_s21 }
   0xb   : > { %s50_s26 = sadd.s32 1, %s1475_s17  ;;  %p57_p1 = scmp.ne.s32.totalorder %s1475_s17, %s1471_s16 }
   0xc   : > { %s1897_s24 = smov (%p29_p0, %s28_s24), 0  ;;  %s1899_s25 = smov (!%p29_p0, %s31_s25), %s1491_s21 }
   0xd   : > { %s46_s27 = ssub.s32 %s1487_s20, %s1897_s24  ;;  %p58_p2 = scmp.eq.s32.totalorder %s1495_s22, 0 }
   0xe   : > { %p33_p3 = scmp.ge.s32.totalorder %s1899_s25, 2  ;;  %p48_p4 = scmp.eq.s32.totalorder %s46_s27, 0 }
   0xf   : > { %p1585_p5 = por %p58_p2, %p57_p1  ;;  %s80_s29 = sadd.s32 1, %s1467_s15 }
  0x10   : > { %s1901_s25 = smov (%p33_p3, %s1899_s25), 0  ;;  %p87_p6 = scmp.ne.s32.totalorder %s1467_s15, %s1463_s14 }
  0x11   : > { %1880 = sst [smem:[#allocation6_spill]] %s1901_s25  ;;  %s76_s4 = ssub.s32 %s1491_s21, %s1901_s25 }
  0x12   : > { %s1593_s30 = scalar_select %p48_p4, %s1475_s17, %s50_s26  }
  0x13   : > { %s77_s5 = sor.u32 %s76_s4, %s46_s27  ;;  %p134_p7 = scmp.eq.s32.totalorder %s76_s4, 0 }
  0x14   : > { %p78_p8 = scmp.eq.s32.totalorder %s77_s5, 0  ;;  %p1599_p9 = por %p87_p6, %p58_p2 }
  0x15   : > { %s136_s7 = sadd.s32 1, %s1459_s13  ;;  %p146_p10 = scmp.ne.s32.totalorder %s1459_s13, %s1455_s12 }
  0x16   : > { %s1607_s8 = scalar_select %p78_p8, %s1467_s15, %s80_s29  }
  0x17   : > { %s1610_s9 = scalar_select %p134_p7, %s1459_s13, %s136_s7  }
  0x18   : > { %p147_p11 = scmp.eq.s32.totalorder %s1111_s23, 13  ;;  %p1114_p13 = scmp.ge.s32.totalorder %s1495_s22, 14 }
  0x1a   : > { %p1612_p12 = por %p147_p11, %p146_p10  ;;  %169 = sbr.rel (%p1114_p13) target bundleno = 119 (0x77), region = 16 }
  0x1f   : > { %172 = sbr.rel (!%p1585_p5) target bundleno = 45 (0x2d), region = 20  ;;  %s174_s11 = sand.u32 (%p1585_p5), 1, %s1475_s17  }
  0x20   : > { %s1276_s26 = sshll.u32 (%p1585_p5), %s1487_s20, 4  ;;  %s1115_s27 = sshll.u32 (%p1585_p5), %s174_s11, 5 }
  0x21   : > { %s1883_s0 = sld [smem:[#allocation7_spill]] (%p1585_p5)  ;;  %s176_s23 = scalar_lea.vmem (%p1585_p5), [#allocation3], %s1115_s27 }
  0x27   : > { %s184_s5 = scalar_lea.vmem %s1883_s0, %s1276_s26 }
  0x28   : > { %v197_v0 = vld [vmem:[%s184_s5] sm:$0xff]  ;;  %v199_v1 = vld [vmem:[%s184_s5 + $0x8] sm:$0xff]  ;;  %v201_v2 = vld [vmem:[%s184_s5 + $0x70] sm:$0xff] }
  0x29   : > { %198 = vst [vmem:[%s176_s23] sm:$0xff] %v197_v0  ;;  %v203_v3 = vld [vmem:[%s184_s5 + $0x78] sm:$0xff] }
  0x2a   : > { %200 = vst [vmem:[%s176_s23 + $0x8] sm:$0xff] %v199_v1 }
  0x2b   : > { %202 = vst [vmem:[%s176_s23 + $0x10] sm:$0xff] %v201_v2 }
  0x2c   : > { %204 = vst [vmem:[%s176_s23 + $0x18] sm:$0xff] %v203_v3 }
  0x2d PF: > { %210 = sbr.rel (!%p1599_p9) target bundleno = 119 (0x77), region = 43  ;;  %s212_s28 = sand.u32 (%p1599_p9), 1, %s1467_s15  }
  0x2e   : > { %s1277_s7 = sshll.u32 (%p1599_p9), %s1487_s20, 7  ;;  %s1118_s11 = sshll.u32 (%p1599_p9), %s212_s28, 8 }
  0x2f   : > { %s217_s26 = sadd.s32 (%p1599_p9), %s1491_s21, %s1277_s7  ;;  %s1884_s1 = sld [smem:[#allocation8_spill]] (%p1599_p9) }
  0x30   : > { %s1121_s29 = sshll.u32 (%p1599_p9), %s217_s26, 2  ;;  %s1637_s6 = scalar_lea.vmem (%p1599_p9), [#allocation4], %s1118_s11 }
  0x35   : > { %s1632_s27 = scalar_lea.vmem %s1884_s1, %s1121_s29 }
  0x36   : > { %v238_v4 = vld [vmem:[%s1632_s27] sm:$0xf]  ;;  %v240_v5 = vld [vmem:[%s1632_s27 + $0x8] sm:$0xf]  ;;  %v242_v6 = vld [vmem:[%s1632_s27 + $0x10] sm:$0xf] }
  0x37   : > { %239 = vst [vmem:[%s1637_s6] sm:$0xf] %v238_v4  ;;  %v244_v7 = vld [vmem:[%s1632_s27 + $0x18] sm:$0xf]  ;;  %v246_v8 = vld [vmem:[%s1632_s27 + $0x20] sm:$0xf] }
  0x38   : > { %241 = vst [vmem:[%s1637_s6 + $0x4] sm:$0xf] %v240_v5  ;;  %v248_v9 = vld [vmem:[%s1632_s27 + $0x28] sm:$0xf]  ;;  %v250_v10 = vld [vmem:[%s1632_s27 + $0x30] sm:$0xf] }
  0x39   : > { %243 = vst [vmem:[%s1637_s6 + $0x8] sm:$0xf] %v242_v6  ;;  %v252_v11 = vld [vmem:[%s1632_s27 + $0x38] sm:$0xf]  ;;  %v254_v12 = vld [vmem:[%s1632_s27 + $0x40] sm:$0xf] }
  0x3a   : > { %245 = vst [vmem:[%s1637_s6 + $0xc] sm:$0xf] %v244_v7  ;;  %v256_v13 = vld [vmem:[%s1632_s27 + $0x48] sm:$0xf]  ;;  %v258_v14 = vld [vmem:[%s1632_s27 + $0x50] sm:$0xf] }
  0x3b   : > { %247 = vst [vmem:[%s1637_s6 + $0x10] sm:$0xf] %v246_v8  ;;  %v260_v15 = vld [vmem:[%s1632_s27 + $0x58] sm:$0xf]  ;;  %v262_v16 = vld [vmem:[%s1632_s27 + $0x60] sm:$0xf] }
  0x3c   : > { %249 = vst [vmem:[%s1637_s6 + $0x14] sm:$0xf] %v248_v9  ;;  %v264_v17 = vld [vmem:[%s1632_s27 + $0x68] sm:$0xf]  ;;  %v266_v18 = vld [vmem:[%s1632_s27 + $0x70] sm:$0xf] }
  0x3d   : > { %251 = vst [vmem:[%s1637_s6 + $0x18] sm:$0xf] %v250_v10  ;;  %v268_v19 = vld [vmem:[%s1632_s27 + $0x78] sm:$0xf]  ;;  %v270_v20 = vld [vmem:[%s1632_s27 + $0x80] sm:$0xf] }
  0x3e   : > { %253 = vst [vmem:[%s1637_s6 + $0x1c] sm:$0xf] %v252_v11  ;;  %v272_v21 = vld [vmem:[%s1632_s27 + $0x88] sm:$0xf]  ;;  %v274_v22 = vld [vmem:[%s1632_s27 + $0x90] sm:$0xf] }
  0x3f   : > { %255 = vst [vmem:[%s1637_s6 + $0x20] sm:$0xf] %v254_v12  ;;  %v276_v23 = vld [vmem:[%s1632_s27 + $0x98] sm:$0xf]  ;;  %v278_v24 = vld [vmem:[%s1632_s27 + $0xa0] sm:$0xf] }
  0x40   : > { %257 = vst [vmem:[%s1637_s6 + $0x24] sm:$0xf] %v256_v13  ;;  %v280_v25 = vld [vmem:[%s1632_s27 + $0xa8] sm:$0xf]  ;;  %v282_v26 = vld [vmem:[%s1632_s27 + $0xb0] sm:$0xf] }
  0x41   : > { %259 = vst [vmem:[%s1637_s6 + $0x28] sm:$0xf] %v258_v14  ;;  %v284_v27 = vld [vmem:[%s1632_s27 + $0xb8] sm:$0xf]  ;;  %v286_v28 = vld [vmem:[%s1632_s27 + $0xc0] sm:$0xf] }
  0x42   : > { %261 = vst [vmem:[%s1637_s6 + $0x2c] sm:$0xf] %v260_v15  ;;  %v288_v29 = vld [vmem:[%s1632_s27 + $0xc8] sm:$0xf]  ;;  %v290_v30 = vld [vmem:[%s1632_s27 + $0xd0] sm:$0xf] }
  0x43   : > { %263 = vst [vmem:[%s1637_s6 + $0x30] sm:$0xf] %v262_v16  ;;  %v292_v31 = vld [vmem:[%s1632_s27 + $0xd8] sm:$0xf]  ;;  %v294_v32 = vld [vmem:[%s1632_s27 + $0xe0] sm:$0xf] }
  0x44   : > { %265 = vst [vmem:[%s1637_s6 + $0x34] sm:$0xf] %v264_v17  ;;  %v296_v33 = vld [vmem:[%s1632_s27 + $0xe8] sm:$0xf]  ;;  %v298_v34 = vld [vmem:[%s1632_s27 + $0xf0] sm:$0xf] }
  0x45   : > { %267 = vst [vmem:[%s1637_s6 + $0x38] sm:$0xf] %v266_v18  ;;  %v300_v35 = vld [vmem:[%s1632_s27 + $0xf8] sm:$0xf]  ;;  %v302_v36 = vld [vmem:[%s1632_s27 + $0x100] sm:$0xf] }
  0x46   : > { %269 = vst [vmem:[%s1637_s6 + $0x3c] sm:$0xf] %v268_v19  ;;  %v304_v37 = vld [vmem:[%s1632_s27 + $0x108] sm:$0xf]  ;;  %v306_v38 = vld [vmem:[%s1632_s27 + $0x110] sm:$0xf] }
  0x47   : > { %271 = vst [vmem:[%s1637_s6 + $0x40] sm:$0xf] %v270_v20  ;;  %v308_v39 = vld [vmem:[%s1632_s27 + $0x118] sm:$0xf]  ;;  %v310_v40 = vld [vmem:[%s1632_s27 + $0x120] sm:$0xf] }
  0x48   : > { %273 = vst [vmem:[%s1637_s6 + $0x44] sm:$0xf] %v272_v21  ;;  %v312_v41 = vld [vmem:[%s1632_s27 + $0x128] sm:$0xf]  ;;  %v314_v42 = vld [vmem:[%s1632_s27 + $0x130] sm:$0xf] }
  0x49   : > { %275 = vst [vmem:[%s1637_s6 + $0x48] sm:$0xf] %v274_v22  ;;  %v316_v43 = vld [vmem:[%s1632_s27 + $0x138] sm:$0xf]  ;;  %v318_v44 = vld [vmem:[%s1632_s27 + $0x140] sm:$0xf] }
  0x4a   : > { %277 = vst [vmem:[%s1637_s6 + $0x4c] sm:$0xf] %v276_v23  ;;  %v320_v45 = vld [vmem:[%s1632_s27 + $0x148] sm:$0xf]  ;;  %v322_v46 = vld [vmem:[%s1632_s27 + $0x150] sm:$0xf] }
  0x4b   : > { %279 = vst [vmem:[%s1637_s6 + $0x50] sm:$0xf] %v278_v24  ;;  %v324_v47 = vld [vmem:[%s1632_s27 + $0x158] sm:$0xf]  ;;  %v326_v48 = vld [vmem:[%s1632_s27 + $0x160] sm:$0xf] }
  0x4c   : > { %281 = vst [vmem:[%s1637_s6 + $0x54] sm:$0xf] %v280_v25  ;;  %v328_v49 = vld [vmem:[%s1632_s27 + $0x168] sm:$0xf]  ;;  %v330_v50 = vld [vmem:[%s1632_s27 + $0x170] sm:$0xf] }
  0x4d   : > { %283 = vst [vmem:[%s1637_s6 + $0x58] sm:$0xf] %v282_v26  ;;  %v332_v51 = vld [vmem:[%s1632_s27 + $0x178] sm:$0xf]  ;;  %v334_v52 = vld [vmem:[%s1632_s27 + $0x180] sm:$0xf] }
  0x4e   : > { %285 = vst [vmem:[%s1637_s6 + $0x5c] sm:$0xf] %v284_v27  ;;  %v336_v53 = vld [vmem:[%s1632_s27 + $0x188] sm:$0xf]  ;;  %v338_v54 = vld [vmem:[%s1632_s27 + $0x190] sm:$0xf] }
  0x4f   : > { %287 = vst [vmem:[%s1637_s6 + $0x60] sm:$0xf] %v286_v28  ;;  %v340_v55 = vld [vmem:[%s1632_s27 + $0x198] sm:$0xf]  ;;  %v342_v56 = vld [vmem:[%s1632_s27 + $0x1a0] sm:$0xf] }
  0x50   : > { %289 = vst [vmem:[%s1637_s6 + $0x64] sm:$0xf] %v288_v29  ;;  %v344_v57 = vld [vmem:[%s1632_s27 + $0x1a8] sm:$0xf]  ;;  %v346_v58 = vld [vmem:[%s1632_s27 + $0x1b0] sm:$0xf] }
  0x51   : > { %291 = vst [vmem:[%s1637_s6 + $0x68] sm:$0xf] %v290_v30  ;;  %v348_v59 = vld [vmem:[%s1632_s27 + $0x1b8] sm:$0xf]  ;;  %v350_v60 = vld [vmem:[%s1632_s27 + $0x1c0] sm:$0xf] }
  0x52   : > { %293 = vst [vmem:[%s1637_s6 + $0x6c] sm:$0xf] %v292_v31  ;;  %v352_v61 = vld [vmem:[%s1632_s27 + $0x1c8] sm:$0xf]  ;;  %v354_v62 = vld [vmem:[%s1632_s27 + $0x1d0] sm:$0xf] }
  0x53   : > { %295 = vst [vmem:[%s1637_s6 + $0x70] sm:$0xf] %v294_v32  ;;  %v356_v63 = vld [vmem:[%s1632_s27 + $0x1d8] sm:$0xf]  ;;  %v358_v0 = vld [vmem:[%s1632_s27 + $0x1e0] sm:$0xf] }
  0x54   : > { %297 = vst [vmem:[%s1637_s6 + $0x74] sm:$0xf] %v296_v33  ;;  %v360_v1 = vld [vmem:[%s1632_s27 + $0x1e8] sm:$0xf]  ;;  %v362_v2 = vld [vmem:[%s1632_s27 + $0x1f0] sm:$0xf] }
  0x55   : > { %299 = vst [vmem:[%s1637_s6 + $0x78] sm:$0xf] %v298_v34  ;;  %v364_v3 = vld [vmem:[%s1632_s27 + $0x1f8] sm:$0xf] }
  0x56   : > { %301 = vst [vmem:[%s1637_s6 + $0x7c] sm:$0xf] %v300_v35 }
  0x57   : > { %303 = vst [vmem:[%s1637_s6 + $0x80] sm:$0xf] %v302_v36 }
  0x58   : > { %305 = vst [vmem:[%s1637_s6 + $0x84] sm:$0xf] %v304_v37 }
  0x59   : > { %307 = vst [vmem:[%s1637_s6 + $0x88] sm:$0xf] %v306_v38 }
  0x5a   : > { %309 = vst [vmem:[%s1637_s6 + $0x8c] sm:$0xf] %v308_v39 }
  0x5b   : > { %311 = vst [vmem:[%s1637_s6 + $0x90] sm:$0xf] %v310_v40 }
  0x5c   : > { %313 = vst [vmem:[%s1637_s6 + $0x94] sm:$0xf] %v312_v41 }
  0x5d   : > { %315 = vst [vmem:[%s1637_s6 + $0x98] sm:$0xf] %v314_v42 }
  0x5e   : > { %317 = vst [vmem:[%s1637_s6 + $0x9c] sm:$0xf] %v316_v43 }
  0x5f   : > { %319 = vst [vmem:[%s1637_s6 + $0xa0] sm:$0xf] %v318_v44 }
  0x60   : > { %321 = vst [vmem:[%s1637_s6 + $0xa4] sm:$0xf] %v320_v45 }
  0x61   : > { %323 = vst [vmem:[%s1637_s6 + $0xa8] sm:$0xf] %v322_v46 }
  0x62   : > { %325 = vst [vmem:[%s1637_s6 + $0xac] sm:$0xf] %v324_v47 }
  0x63   : > { %327 = vst [vmem:[%s1637_s6 + $0xb0] sm:$0xf] %v326_v48 }
  0x64   : > { %329 = vst [vmem:[%s1637_s6 + $0xb4] sm:$0xf] %v328_v49 }
  0x65   : > { %331 = vst [vmem:[%s1637_s6 + $0xb8] sm:$0xf] %v330_v50 }
  0x66   : > { %333 = vst [vmem:[%s1637_s6 + $0xbc] sm:$0xf] %v332_v51 }
  0x67   : > { %335 = vst [vmem:[%s1637_s6 + $0xc0] sm:$0xf] %v334_v52 }
  0x68   : > { %337 = vst [vmem:[%s1637_s6 + $0xc4] sm:$0xf] %v336_v53 }
  0x69   : > { %339 = vst [vmem:[%s1637_s6 + $0xc8] sm:$0xf] %v338_v54 }
  0x6a   : > { %341 = vst [vmem:[%s1637_s6 + $0xcc] sm:$0xf] %v340_v55 }
  0x6b   : > { %343 = vst [vmem:[%s1637_s6 + $0xd0] sm:$0xf] %v342_v56 }
  0x6c   : > { %345 = vst [vmem:[%s1637_s6 + $0xd4] sm:$0xf] %v344_v57 }
  0x6d   : > { %347 = vst [vmem:[%s1637_s6 + $0xd8] sm:$0xf] %v346_v58 }
  0x6e   : > { %349 = vst [vmem:[%s1637_s6 + $0xdc] sm:$0xf] %v348_v59 }
  0x6f   : > { %351 = vst [vmem:[%s1637_s6 + $0xe0] sm:$0xf] %v350_v60 }
  0x70   : > { %353 = vst [vmem:[%s1637_s6 + $0xe4] sm:$0xf] %v352_v61 }
  0x71   : > { %355 = vst [vmem:[%s1637_s6 + $0xe8] sm:$0xf] %v354_v62 }
  0x72   : > { %357 = vst [vmem:[%s1637_s6 + $0xec] sm:$0xf] %v356_v63 }
  0x73   : > { %359 = vst [vmem:[%s1637_s6 + $0xf0] sm:$0xf] %v358_v0 }
  0x74   : > { %361 = vst [vmem:[%s1637_s6 + $0xf4] sm:$0xf] %v360_v1 }
  0x75   : > { %363 = vst [vmem:[%s1637_s6 + $0xf8] sm:$0xf] %v362_v2 }
  0x76   : > { %365 = vst [vmem:[%s1637_s6 + $0xfc] sm:$0xf] %v364_v3 }
  0x77 PF: > { %p1122_p0 = scmp.ge.s32.totalorder %s1495_s22, 1  ;;  %p522_p1 = scmp.lt.s32.totalorder %s1495_s22, 15 }
  0x79   : > { %p523_p2 = pnand %p1122_p0, %p522_p1 }
  0x7a   : > { %s529_s0 = sand.u32 (!%p523_p2), 1, %s1471_s16   ;;  %s536_s5 = sand.u32 (!%p523_p2), 1, %s1463_s14  }
  0x7b   : > { %526 = sbr.rel (%p523_p2) target bundleno = 341 (0x155), region = 88  ;;  %s1123_s23 = sshll.u32 (!%p523_p2), %s529_s0, 5 }
  0x7c   : > { %s1124_s28 = sshll.u32 (!%p523_p2), %s536_s5, 8  ;;  %s562_s7 = sand.u32 (!%p523_p2), 1, %s1455_s12  }
  0x7d   : > { %p568_p3 = scmp.lt.s32.totalorder (!%p523_p2), %s1483_s19, 1  ;;  %s1125_s11 = sshll.u32 (!%p523_p2), %s562_s7, 3 }
  0x7e   : > { %s1777_s6 = scalar_lea.vmem (!%p523_p2), [#allocation3], %s1123_s23  ;;  %s1779_s1 = scalar_lea.vmem (!%p523_p2), [#allocation4], %s1124_s28 }
  0x7f   : > { %s1781_s25 = scalar_lea.vmem (!%p523_p2), [#allocation5], %s1125_s11  ;;  %p1126_p4 = scmp.ne.s32.totalorder (!%p523_p2), %s1479_s18, 0 }
  0x80   : > { %s1771_s26 = scalar_select %p568_p3, %s1483_s19, 1 }
  0x81   : > { %575 = sbr.rel (%p1126_p4) target bundleno = 137 (0x89), region = 100 }
  0x82   : > { %s570_s27 = scalar_lea.vmem %s1874_s2, %s1771_s26 }
  0x86   : > { %v1497_v4 = vmov 0.0  }
  0x87   : > { %576 = vst [vmem:[#allocation2] sm:$0xff] %v1497_v4 }
  0x88   : > { %577 = vst [vmem:[#allocation2 + $0x8] sm:$0xff] %v1497_v4 }
  0x89 PF: > { %v1289_v5 = vld [vmem:[%s1779_s1 + $0x38] sm:$0xff]  ;;  %v1288_v9 = vld [vmem:[%s1779_s1 + $0x30] sm:$0xff]  ;;  %v1287_v13 = vld [vmem:[%s1779_s1 + $0x28] sm:$0xff]  ;;  %p1271_p5 = scmp.ne.s32.totalorder %s1479_s18, 6 }
  0x8a   : > { %v1297_v6 = vld [vmem:[%s1779_s1 + $0x78] sm:$0xff]  ;;  %860 = vmatpush.bf16.msra.mxu0 %v1289_v5  ;;  %v1296_v10 = vld [vmem:[%s1779_s1 + $0x70] sm:$0xff]  ;;  %v1295_v14 = vld [vmem:[%s1779_s1 + $0x68] sm:$0xff] }
  0x8b   : > { %v1305_v7 = vld [vmem:[%s1779_s1 + $0xb8] sm:$0xff]  ;;  %874 = vmatpush.bf16.msra.mxu1 %v1297_v6  ;;  %v1304_v11 = vld [vmem:[%s1779_s1 + $0xb0] sm:$0xff]  ;;  %v1303_v15 = vld [vmem:[%s1779_s1 + $0xa8] sm:$0xff] }
  0x8c   : > { %v1313_v8 = vld [vmem:[%s1779_s1 + $0xf8] sm:$0xff]  ;;  %888 = vmatpush.bf16.msra.mxu2 %v1305_v7  ;;  %v1312_v12 = vld [vmem:[%s1779_s1 + $0xf0] sm:$0xff]  ;;  %v1311_v16 = vld [vmem:[%s1779_s1 + $0xe8] sm:$0xff] }
  0x8d   : > { %902 = vmatpush.bf16.msra.mxu3 %v1313_v8  ;;  %v1286_v17 = vld [vmem:[%s1779_s1 + $0x20] sm:$0xff]  ;;  %v1285_v21 = vld [vmem:[%s1779_s1 + $0x18] sm:$0xff]  ;;  %v1284_v25 = vld [vmem:[%s1779_s1 + $0x10] sm:$0xff] }
  0x8e   : > { %861 = vmatpush.bf16.msra.mxu0 %v1288_v9  ;;  %v1294_v18 = vld [vmem:[%s1779_s1 + $0x60] sm:$0xff]  ;;  %v1293_v22 = vld [vmem:[%s1779_s1 + $0x58] sm:$0xff]  ;;  %v1292_v26 = vld [vmem:[%s1779_s1 + $0x50] sm:$0xff] }
  0x8f   : > { %875 = vmatpush.bf16.msra.mxu1 %v1296_v10  ;;  %v1302_v19 = vld [vmem:[%s1779_s1 + $0xa0] sm:$0xff]  ;;  %v1301_v23 = vld [vmem:[%s1779_s1 + $0x98] sm:$0xff]  ;;  %v1300_v27 = vld [vmem:[%s1779_s1 + $0x90] sm:$0xff] }
  0x90   : > { %889 = vmatpush.bf16.msra.mxu2 %v1304_v11  ;;  %v1310_v20 = vld [vmem:[%s1779_s1 + $0xe0] sm:$0xff]  ;;  %v1309_v24 = vld [vmem:[%s1779_s1 + $0xd8] sm:$0xff]  ;;  %v1308_v28 = vld [vmem:[%s1779_s1 + $0xd0] sm:$0xff] }
  0x91   : > { %903 = vmatpush.bf16.msra.mxu3 %v1312_v12  ;;  %v1283_v29 = vld [vmem:[%s1779_s1 + $0x8] sm:$0xff]  ;;  %v1282_v33 = vld [vmem:[%s1779_s1] sm:$0xff]  ;;  %v1280_v38 = vld [vmem:[%s1777_s6 + $0xc] sm:$0xf0] }
  0x92   : > { %862 = vmatpush.bf16.msra.mxu0 %v1287_v13  ;;  %v1291_v30 = vld [vmem:[%s1779_s1 + $0x48] sm:$0xff]  ;;  %v1290_v34 = vld [vmem:[%s1779_s1 + $0x40] sm:$0xff]  ;;  %v1131_v40 = vld [vmem:[%s1777_s6 + $0x10] sm:$0xf0] }
  0x93   : > { %876 = vmatpush.bf16.msra.mxu1 %v1295_v14  ;;  %v1299_v31 = vld [vmem:[%s1779_s1 + $0x88] sm:$0xff]  ;;  %v1298_v35 = vld [vmem:[%s1779_s1 + $0x80] sm:$0xff]  ;;  %v1281_v42 = vld [vmem:[%s1777_s6 + $0x14] sm:$0xf0] }
  0x94   : > { %890 = vmatpush.bf16.msra.mxu2 %v1303_v15  ;;  %v1307_v32 = vld [vmem:[%s1779_s1 + $0xc8] sm:$0xff]  ;;  %v1306_v36 = vld [vmem:[%s1779_s1 + $0xc0] sm:$0xff]  ;;  %v1139_v44 = vld [vmem:[%s1777_s6 + $0x18] sm:$0xf0] }
  0x95   : > { %904 = vmatpush.bf16.msra.mxu3 %v1311_v16  ;;  %v1129_v37 = vld [vmem:[%s1777_s6] sm:$0xf]  ;;  %v1278_v39 = vld [vmem:[%s1777_s6 + $0x4] sm:$0xf]  ;;  %v1137_v41 = vld [vmem:[%s1777_s6 + $0x8] sm:$0xf] }
  0x96   : > { %863 = vmatpush.bf16.msra.mxu0 %v1286_v17  ;;  %v1279_v43 = vld [vmem:[%s1777_s6 + $0xc] sm:$0xf]  ;;  %v1130_v45 = vor.u32 %v1280_v38, %v1129_v37  ;;  %v1134_v46 = vor.u32 %v1278_v39, %v1131_v40  ;;  %v1138_v47 = vor.u32 %v1281_v42, %v1137_v41  ;;  %v578_v55 = vld [vmem:[#allocation2] sm:$0xff]  ;;  %v579_v63 = vld [vmem:[#allocation2 + $0x8] sm:$0xff] }
  0x97   : > { %877 = vmatpush.bf16.msra.mxu1 %v1294_v18  ;;  %v1142_v48 = vor.u32 %v1279_v43, %v1139_v44 }
  0x98   : > { %891 = vmatpush.bf16.msra.mxu2 %v1302_v19 }
  0x99   : > { %905 = vmatpush.bf16.msra.mxu3 %v1310_v20 }
  0x9a   : > { %864 = vmatpush.bf16.msra.mxu0 %v1285_v21 }
  0x9b   : > { %878 = vmatpush.bf16.msra.mxu1 %v1293_v22 }
  0x9c   : > { %892 = vmatpush.bf16.msra.mxu2 %v1301_v23 }
  0x9d   : > { %906 = vmatpush.bf16.msra.mxu3 %v1309_v24 }
  0x9e   : > { %865 = vmatpush.bf16.msra.mxu0 %v1284_v25 }
  0x9f   : > { %879 = vmatpush.bf16.msra.mxu1 %v1292_v26 }
  0xa0   : > { %893 = vmatpush.bf16.msra.mxu2 %v1300_v27 }
  0xa1   : > { %907 = vmatpush.bf16.msra.mxu3 %v1308_v28 }
  0xa2   : > { %866 = vmatpush.bf16.msra.mxu0 %v1283_v29 }
  0xa3   : > { %880 = vmatpush.bf16.msra.mxu1 %v1291_v30 }
  0xa4   : > { %894 = vmatpush.bf16.msra.mxu2 %v1299_v31 }
  0xa5   : > { %908 = vmatpush.bf16.msra.mxu3 %v1307_v32 }
  0xa6   : > { %867 = vmatpush.bf16.msra.mxu0 %v1282_v33 }
  0xa7   : > { %881 = vmatpush.bf16.msra.mxu1 %v1290_v34 }
  0xa8   : > { %895 = vmatpush.bf16.msra.mxu2 %v1298_v35 }
  0xa9   : > { %909 = vmatpush.bf16.msra.mxu3 %v1306_v36  ;;  %868 = vmatmul.bf16.vlgmr.msra.gmra.mxu0 %v1130_v45 }
  0xaa   : > { %882 = vmatmul.bf16.vlgmr.msra.gmra.mxu1 %v1134_v46 }
  0xab   : > { %896 = vmatmul.bf16.vlgmr.msra.gmra.mxu2 %v1138_v47 }
  0xac   : > { %910 = vmatmul.bf16.vlgmr.msra.gmra.mxu3 %v1142_v48 }
 0x126   : > { %v869_v49 = vpop.f32.mrf.mxu0 }
 0x127   : > { %v883_v50 = vpop.f32.mrf.mxu1 }
 0x128   : > { %v884_v51 = vadd.f32 %v883_v50, %v869_v49 }
 0x12e   : > { %v897_v52 = vpop.f32.mrf.mxu2  ;;  %v871_v57 = vpop.f32.mrf.mxu0 }
 0x12f   : > { %v911_v53 = vpop.f32.mrf.mxu3  ;;  %v898_v54 = vadd.f32 %v897_v52, %v884_v51  ;;  %v885_v58 = vpop.f32.mrf.mxu1 }
 0x130   : > { %v886_v60 = vadd.f32 %v885_v58, %v871_v57 }
 0x131   : > { %v912_v56 = vadd.f32 %v911_v53, %v898_v54 }
 0x133   : > { %v916_v59 = vadd.f32 %v912_v56, %v578_v55 }
 0x135   : > { %918 = vst [vmem:[#allocation2] sm:$0xff] %v916_v59 }
 0x136   : > { %v899_v61 = vpop.f32.mrf.mxu2 }
 0x137   : > { %v900_v62 = vadd.f32 %v899_v61, %v886_v60  ;;  %v913_v0 = vpop.f32.mrf.mxu3 }
 0x139   : > { %v914_v1 = vadd.f32 %v913_v0, %v900_v62  ;;  %923 = sbr.rel (%p1271_p5) target bundleno = 332 (0x14c), region = 104 }
 0x13b   : > { %v917_v2 = vadd.f32 %v914_v1, %v579_v63 }
 0x13d   : > { %919 = vst [vmem:[#allocation2 + $0x8] sm:$0xff] %v917_v2 }
 0x13e   : > { %v924_v3 = vld [vmem:[#allocation2] sm:$0xff] }
 0x13f   : > { %v1408_v5 = vld [vmem:[%s570_s27] ss:$0 sm:$0xff] }
 0x140   : > { %v930_v6 = vadd.f32 %v1408_v5, %v924_v3 }
 0x142   : > { %v932_v8 = vmax.f32 %v930_v6, 0.0 }
 0x144   : > { %v925_v4 = vld [vmem:[#allocation2 + $0x8] sm:$0xff] }
 0x145   : > { %v931_v7 = vadd.f32 %v1408_v5, %v925_v4 }
 0x147   : > { %v933_v9 = vmax.f32 %v931_v7, 0.0 }
 0x149   : > { %v1317_v10 = vpack.c.bf16 %v933_v9, %v932_v8 }
 0x14b   : > { %1318 = vst [vmem:[%s1781_s25] sm:$0xff] %v1317_v10  }
 0x14c PF: > { %944 = sbr.rel (!%p1612_p12) target bundleno = 341 (0x155), region = 108  ;;  %s1273_s14 = sshll.u32 (%p1612_p12), %s1483_s19, 2 }
 0x14d   : > { %s951_s0 = scalar_lea.vmem (%p1612_p12), %s1875_s3, %s1273_s14 }
 0x152   : > { %v968_v11 = vld [vmem:[%s1781_s25] sm:$0xf]  ;;  %v970_v12 = vld [vmem:[%s1781_s25 + $0x4] sm:$0xf] }
 0x153   : > { %969 = vst [vmem:[%s951_s0] sm:$0xf] %v968_v11 }
 0x154   : > { %971 = vst [vmem:[%s951_s0 + $0x8] sm:$0xf] %v970_v12 }
 0x155 PF: > { %s13_s22 = sadd.s32 1, %s1495_s22   ;;  %s1885_s25 = sld [smem:[#allocation6_spill]] }
 0x156   : > { %p10_p6 = scmp.ge.s32.totalorder %s13_s22, 16   ;;  %s1886_s12 = smov %s1459_s13 }
 0x157   : > { %s1887_s13 = smov %s1610_s9  ;;  %s1888_s14 = smov %s1467_s15 }
 0x158   : > { %s1889_s15 = smov %s1607_s8  ;;  %s1890_s16 = smov %s1475_s17 }
 0x159   : > { %s1891_s17 = smov %s1593_s30  ;;  %s1892_s18 = smov %s1487_s20 }
 0x15a   : > { %s1893_s19 = smov %s1491_s21  ;;  %s1894_s20 = smov %s1897_s24 }
 0x15b   : > { %s1895_s21 = smov %s1885_s25  ;;  %12 = sbr.rel (!%p10_p6) target bundleno = 9 (0x9), region = 191 }

// kernel: bidirectional_flow_estimator.11
= control target key start
LH: loop header
LB: loop body
LE: loop exit
PB: predicated region body
PF: predicated region fallthrough
CT: control target
= control target key end

     0   :  { %s2337_s0 = inlined_call_operand.vmem [shape: bf16[1,16,2560], index: 0, kind: input, shape index: {}]   ;;  %s2338_s1 = inlined_call_operand.vmem [shape: bf16[1,2560,512], index: 1, kind: input, shape index: {}]   ;;  %s2339_s2 = inlined_call_operand.vmem [shape: f32[1,512], index: 2, kind: input, shape index: {}]   ;;  %s2340_s3 = inlined_call_operand.vmem [shape: bf16[1,16,512], index: 3, kind: output, shape index: {}]  }
   0x1   :  { %2342 = sst [smem:[#allocation7_spill]] %s2337_s0 }
   0x2   :  { %2343 = sst [smem:[#allocation8_spill]] %s2338_s1 }
   0x3   :  { %s1871_s12 = smov 0   ;;  %s1873_s13 = smov 0  }
   0x4   :  { %s1875_s14 = smov 0   ;;  %s1877_s15 = smov 0  }
   0x5   :  { %s1879_s16 = smov 0   ;;  %s1881_s17 = smov 0  }
   0x6   :  { %s1883_s18 = smov 0   ;;  %s1885_s19 = smov 0  }
   0x7   :  { %s1887_s20 = smov 0   ;;  %s1889_s21 = smov 0  }
   0x8   :  { %s1891_s22 = smov 0  }
   0x9 LB: > { %s1306_s23 = sadd.s32 4294967295, %s1848_s22   ;;  %s28_s24 = sadd.s32 1, %s1840_s20  ;;  %s1848_s22 = sphi %s1891_s22, %s13_s22   ;;  %s1844_s21 = sphi %s1889_s21, %s2360_s21   ;;  %s1840_s20 = sphi %s1887_s20, %s2359_s20   ;;  %s1836_s19 = sphi %s1885_s19, %s2358_s19   ;;  %s1832_s18 = sphi %s1883_s18, %s2357_s18   ;;  %s1828_s17 = sphi %s1881_s17, %s2356_s17   ;;  %s1824_s16 = sphi %s1879_s16, %s2355_s16   ;;  %s1820_s15 = sphi %s1877_s15, %s2354_s15   ;;  %s1816_s14 = sphi %s1875_s14, %s2353_s14   ;;  %s1812_s13 = sphi %s1873_s13, %s2352_s13   ;;  %s1808_s12 = sphi %s1871_s12, %s2351_s12  }
   0xa   : > { %p29_p0 = scmp.ge.s32.totalorder %s28_s24, 5  ;;  %s31_s25 = sadd.s32 1, %s1844_s21 }
   0xb   : > { %s50_s26 = sadd.s32 1, %s1828_s17  ;;  %p57_p1 = scmp.ne.s32.totalorder %s1828_s17, %s1824_s16 }
   0xc   : > { %s2362_s24 = smov (%p29_p0, %s28_s24), 0  ;;  %s2364_s25 = smov (!%p29_p0, %s31_s25), %s1844_s21 }
   0xd   : > { %s46_s27 = ssub.s32 %s1840_s20, %s2362_s24  ;;  %p58_p2 = scmp.eq.s32.totalorder %s1848_s22, 0 }
   0xe   : > { %p33_p3 = scmp.ge.s32.totalorder %s2364_s25, 2  ;;  %p48_p4 = scmp.eq.s32.totalorder %s46_s27, 0 }
   0xf   : > { %p1938_p5 = por %p58_p2, %p57_p1  ;;  %s80_s29 = sadd.s32 1, %s1820_s15 }
  0x10   : > { %s2366_s25 = smov (%p33_p3, %s2364_s25), 0  ;;  %p87_p6 = scmp.ne.s32.totalorder %s1820_s15, %s1816_s14 }
  0x11   : > { %2345 = sst [smem:[#allocation6_spill]] %s2366_s25  ;;  %s76_s4 = ssub.s32 %s1844_s21, %s2366_s25 }
  0x12   : > { %s1946_s30 = scalar_select %p48_p4, %s1828_s17, %s50_s26  }
  0x13   : > { %s77_s5 = sor.u32 %s76_s4, %s46_s27  ;;  %p134_p7 = scmp.eq.s32.totalorder %s76_s4, 0 }
  0x14   : > { %p78_p8 = scmp.eq.s32.totalorder %s77_s5, 0  ;;  %p1952_p9 = por %p87_p6, %p58_p2 }
  0x15   : > { %s136_s7 = sadd.s32 1, %s1812_s13  ;;  %p146_p10 = scmp.ne.s32.totalorder %s1812_s13, %s1808_s12 }
  0x16   : > { %s1960_s8 = scalar_select %p78_p8, %s1820_s15, %s80_s29  }
  0x17   : > { %s1963_s9 = scalar_select %p134_p7, %s1812_s13, %s136_s7  }
  0x18   : > { %p147_p11 = scmp.eq.s32.totalorder %s1306_s23, 9  ;;  %p1309_p13 = scmp.ge.s32.totalorder %s1848_s22, 10 }
  0x1a   : > { %p1965_p12 = por %p147_p11, %p146_p10  ;;  %169 = sbr.rel (%p1309_p13) target bundleno = 119 (0x77), region = 16 }
  0x1f   : > { %172 = sbr.rel (!%p1938_p5) target bundleno = 45 (0x2d), region = 20  ;;  %s174_s11 = sand.u32 (%p1938_p5), 1, %s1828_s17  }
  0x20   : > { %s1602_s26 = sshll.u32 (%p1938_p5), %s1840_s20, 4  ;;  %s1310_s27 = sshll.u32 (%p1938_p5), %s174_s11, 5 }
  0x21   : > { %s2348_s0 = sld [smem:[#allocation7_spill]] (%p1938_p5)  ;;  %s176_s23 = scalar_lea.vmem (%p1938_p5), [#allocation3], %s1310_s27 }
  0x27   : > { %s184_s5 = scalar_lea.vmem %s2348_s0, %s1602_s26 }
  0x28   : > { %v197_v0 = vld [vmem:[%s184_s5] sm:$0xff]  ;;  %v199_v1 = vld [vmem:[%s184_s5 + $0x8] sm:$0xff]  ;;  %v201_v2 = vld [vmem:[%s184_s5 + $0x50] sm:$0xff] }
  0x29   : > { %198 = vst [vmem:[%s176_s23] sm:$0xff] %v197_v0  ;;  %v203_v3 = vld [vmem:[%s184_s5 + $0x58] sm:$0xff] }
  0x2a   : > { %200 = vst [vmem:[%s176_s23 + $0x8] sm:$0xff] %v199_v1 }
  0x2b   : > { %202 = vst [vmem:[%s176_s23 + $0x10] sm:$0xff] %v201_v2 }
  0x2c   : > { %204 = vst [vmem:[%s176_s23 + $0x18] sm:$0xff] %v203_v3 }
  0x2d PF: > { %210 = sbr.rel (!%p1952_p9) target bundleno = 119 (0x77), region = 43  ;;  %s212_s28 = sand.u32 (%p1952_p9), 1, %s1820_s15  }
  0x2e   : > { %s1315_s7 = sshll.u32 (%p1952_p9), %s1844_s21, 1  ;;  %s1313_s11 = sshll.u32 (%p1952_p9), %s212_s28, 9 }
  0x2f   : > { %s1603_s26 = sshll.u32 (%p1952_p9), %s1840_s20, 8  ;;  %s2349_s1 = sld [smem:[#allocation8_spill]] (%p1952_p9) }
  0x30   : > { %s218_s29 = sadd.s32 (%p1952_p9), %s1603_s26, %s1315_s7  ;;  %s1990_s6 = scalar_lea.vmem (%p1952_p9), [#allocation4], %s1313_s11 }
  0x31   : > { %s1317_s4 = sshll.u32 (%p1952_p9), %s218_s29, 2 }
  0x35   : > { %s1985_s5 = scalar_lea.vmem %s2349_s1, %s1317_s4 }
  0x36   : > { %v377_v4 = vld [vmem:[%s1985_s5] sm:$0xff]  ;;  %v379_v5 = vld [vmem:[%s1985_s5 + $0x10] sm:$0xff] }
  0x37   : > { %v381_v6 = vld [vmem:[%s1985_s5 + $0x20] sm:$0xff]  ;;  %378 = vst [vmem:[%s1990_s6] sm:$0xff] %v377_v4  ;;  %v383_v7 = vld [vmem:[%s1985_s5 + $0x30] sm:$0xff] }
  0x38   : > { %380 = vst [vmem:[%s1990_s6 + $0x8] sm:$0xff] %v379_v5  ;;  %v385_v8 = vld [vmem:[%s1985_s5 + $0x40] sm:$0xff]  ;;  %v387_v9 = vld [vmem:[%s1985_s5 + $0x50] sm:$0xff] }
  0x39   : > { %382 = vst [vmem:[%s1990_s6 + $0x10] sm:$0xff] %v381_v6  ;;  %v389_v10 = vld [vmem:[%s1985_s5 + $0x60] sm:$0xff]  ;;  %v391_v11 = vld [vmem:[%s1985_s5 + $0x70] sm:$0xff] }
  0x3a   : > { %384 = vst [vmem:[%s1990_s6 + $0x18] sm:$0xff] %v383_v7  ;;  %v393_v12 = vld [vmem:[%s1985_s5 + $0x80] sm:$0xff]  ;;  %v395_v13 = vld [vmem:[%s1985_s5 + $0x90] sm:$0xff] }
  0x3b   : > { %386 = vst [vmem:[%s1990_s6 + $0x20] sm:$0xff] %v385_v8  ;;  %v397_v14 = vld [vmem:[%s1985_s5 + $0xa0] sm:$0xff]  ;;  %v399_v15 = vld [vmem:[%s1985_s5 + $0xb0] sm:$0xff] }
  0x3c   : > { %388 = vst [vmem:[%s1990_s6 + $0x28] sm:$0xff] %v387_v9  ;;  %v401_v16 = vld [vmem:[%s1985_s5 + $0xc0] sm:$0xff]  ;;  %v403_v17 = vld [vmem:[%s1985_s5 + $0xd0] sm:$0xff] }
  0x3d   : > { %390 = vst [vmem:[%s1990_s6 + $0x30] sm:$0xff] %v389_v10  ;;  %v405_v18 = vld [vmem:[%s1985_s5 + $0xe0] sm:$0xff]  ;;  %v407_v19 = vld [vmem:[%s1985_s5 + $0xf0] sm:$0xff] }
  0x3e   : > { %392 = vst [vmem:[%s1990_s6 + $0x38] sm:$0xff] %v391_v11  ;;  %v409_v20 = vld [vmem:[%s1985_s5 + $0x100] sm:$0xff]  ;;  %v411_v21 = vld [vmem:[%s1985_s5 + $0x110] sm:$0xff] }
  0x3f   : > { %394 = vst [vmem:[%s1990_s6 + $0x40] sm:$0xff] %v393_v12  ;;  %v413_v22 = vld [vmem:[%s1985_s5 + $0x120] sm:$0xff]  ;;  %v415_v23 = vld [vmem:[%s1985_s5 + $0x130] sm:$0xff] }
  0x40   : > { %396 = vst [vmem:[%s1990_s6 + $0x48] sm:$0xff] %v395_v13  ;;  %v417_v24 = vld [vmem:[%s1985_s5 + $0x140] sm:$0xff]  ;;  %v419_v25 = vld [vmem:[%s1985_s5 + $0x150] sm:$0xff] }
  0x41   : > { %398 = vst [vmem:[%s1990_s6 + $0x50] sm:$0xff] %v397_v14  ;;  %v421_v26 = vld [vmem:[%s1985_s5 + $0x160] sm:$0xff]  ;;  %v423_v27 = vld [vmem:[%s1985_s5 + $0x170] sm:$0xff] }
  0x42   : > { %400 = vst [vmem:[%s1990_s6 + $0x58] sm:$0xff] %v399_v15  ;;  %v425_v28 = vld [vmem:[%s1985_s5 + $0x180] sm:$0xff]  ;;  %v427_v29 = vld [vmem:[%s1985_s5 + $0x190] sm:$0xff] }
  0x43   : > { %402 = vst [vmem:[%s1990_s6 + $0x60] sm:$0xff] %v401_v16  ;;  %v429_v30 = vld [vmem:[%s1985_s5 + $0x1a0] sm:$0xff]  ;;  %v431_v31 = vld [vmem:[%s1985_s5 + $0x1b0] sm:$0xff] }
  0x44   : > { %404 = vst [vmem:[%s1990_s6 + $0x68] sm:$0xff] %v403_v17  ;;  %v433_v32 = vld [vmem:[%s1985_s5 + $0x1c0] sm:$0xff]  ;;  %v435_v33 = vld [vmem:[%s1985_s5 + $0x1d0] sm:$0xff] }
  0x45   : > { %406 = vst [vmem:[%s1990_s6 + $0x70] sm:$0xff] %v405_v18  ;;  %v437_v34 = vld [vmem:[%s1985_s5 + $0x1e0] sm:$0xff]  ;;  %v439_v35 = vld [vmem:[%s1985_s5 + $0x1f0] sm:$0xff] }
  0x46   : > { %408 = vst [vmem:[%s1990_s6 + $0x78] sm:$0xff] %v407_v19  ;;  %v441_v36 = vld [vmem:[%s1985_s5 + $0x200] sm:$0xff]  ;;  %v443_v37 = vld [vmem:[%s1985_s5 + $0x210] sm:$0xff] }
  0x47   : > { %410 = vst [vmem:[%s1990_s6 + $0x80] sm:$0xff] %v409_v20  ;;  %v445_v38 = vld [vmem:[%s1985_s5 + $0x220] sm:$0xff]  ;;  %v447_v39 = vld [vmem:[%s1985_s5 + $0x230] sm:$0xff] }
  0x48   : > { %412 = vst [vmem:[%s1990_s6 + $0x88] sm:$0xff] %v411_v21  ;;  %v449_v40 = vld [vmem:[%s1985_s5 + $0x240] sm:$0xff]  ;;  %v451_v41 = vld [vmem:[%s1985_s5 + $0x250] sm:$0xff] }
  0x49   : > { %414 = vst [vmem:[%s1990_s6 + $0x90] sm:$0xff] %v413_v22  ;;  %v453_v42 = vld [vmem:[%s1985_s5 + $0x260] sm:$0xff]  ;;  %v455_v43 = vld [vmem:[%s1985_s5 + $0x270] sm:$0xff] }
  0x4a   : > { %416 = vst [vmem:[%s1990_s6 + $0x98] sm:$0xff] %v415_v23  ;;  %v457_v44 = vld [vmem:[%s1985_s5 + $0x280] sm:$0xff]  ;;  %v459_v45 = vld [vmem:[%s1985_s5 + $0x290] sm:$0xff] }
  0x4b   : > { %418 = vst [vmem:[%s1990_s6 + $0xa0] sm:$0xff] %v417_v24  ;;  %v461_v46 = vld [vmem:[%s1985_s5 + $0x2a0] sm:$0xff]  ;;  %v463_v47 = vld [vmem:[%s1985_s5 + $0x2b0] sm:$0xff] }
  0x4c   : > { %420 = vst [vmem:[%s1990_s6 + $0xa8] sm:$0xff] %v419_v25  ;;  %v465_v48 = vld [vmem:[%s1985_s5 + $0x2c0] sm:$0xff]  ;;  %v467_v49 = vld [vmem:[%s1985_s5 + $0x2d0] sm:$0xff] }
  0x4d   : > { %422 = vst [vmem:[%s1990_s6 + $0xb0] sm:$0xff] %v421_v26  ;;  %v469_v50 = vld [vmem:[%s1985_s5 + $0x2e0] sm:$0xff]  ;;  %v471_v51 = vld [vmem:[%s1985_s5 + $0x2f0] sm:$0xff] }
  0x4e   : > { %424 = vst [vmem:[%s1990_s6 + $0xb8] sm:$0xff] %v423_v27  ;;  %v473_v52 = vld [vmem:[%s1985_s5 + $0x300] sm:$0xff]  ;;  %v475_v53 = vld [vmem:[%s1985_s5 + $0x310] sm:$0xff] }
  0x4f   : > { %426 = vst [vmem:[%s1990_s6 + $0xc0] sm:$0xff] %v425_v28  ;;  %v477_v54 = vld [vmem:[%s1985_s5 + $0x320] sm:$0xff]  ;;  %v479_v55 = vld [vmem:[%s1985_s5 + $0x330] sm:$0xff] }
  0x50   : > { %428 = vst [vmem:[%s1990_s6 + $0xc8] sm:$0xff] %v427_v29  ;;  %v481_v56 = vld [vmem:[%s1985_s5 + $0x340] sm:$0xff]  ;;  %v483_v57 = vld [vmem:[%s1985_s5 + $0x350] sm:$0xff] }
  0x51   : > { %430 = vst [vmem:[%s1990_s6 + $0xd0] sm:$0xff] %v429_v30  ;;  %v485_v58 = vld [vmem:[%s1985_s5 + $0x360] sm:$0xff]  ;;  %v487_v59 = vld [vmem:[%s1985_s5 + $0x370] sm:$0xff] }
  0x52   : > { %432 = vst [vmem:[%s1990_s6 + $0xd8] sm:$0xff] %v431_v31  ;;  %v489_v60 = vld [vmem:[%s1985_s5 + $0x380] sm:$0xff]  ;;  %v491_v61 = vld [vmem:[%s1985_s5 + $0x390] sm:$0xff] }
  0x53   : > { %434 = vst [vmem:[%s1990_s6 + $0xe0] sm:$0xff] %v433_v32  ;;  %v493_v62 = vld [vmem:[%s1985_s5 + $0x3a0] sm:$0xff]  ;;  %v495_v63 = vld [vmem:[%s1985_s5 + $0x3b0] sm:$0xff] }
  0x54   : > { %436 = vst [vmem:[%s1990_s6 + $0xe8] sm:$0xff] %v435_v33  ;;  %v497_v0 = vld [vmem:[%s1985_s5 + $0x3c0] sm:$0xff]  ;;  %v499_v1 = vld [vmem:[%s1985_s5 + $0x3d0] sm:$0xff] }
  0x55   : > { %438 = vst [vmem:[%s1990_s6 + $0xf0] sm:$0xff] %v437_v34  ;;  %v501_v2 = vld [vmem:[%s1985_s5 + $0x3e0] sm:$0xff]  ;;  %v503_v3 = vld [vmem:[%s1985_s5 + $0x3f0] sm:$0xff] }
  0x56   : > { %440 = vst [vmem:[%s1990_s6 + $0xf8] sm:$0xff] %v439_v35 }
  0x57   : > { %442 = vst [vmem:[%s1990_s6 + $0x100] sm:$0xff] %v441_v36 }
  0x58   : > { %444 = vst [vmem:[%s1990_s6 + $0x108] sm:$0xff] %v443_v37 }
  0x59   : > { %446 = vst [vmem:[%s1990_s6 + $0x110] sm:$0xff] %v445_v38 }
  0x5a   : > { %448 = vst [vmem:[%s1990_s6 + $0x118] sm:$0xff] %v447_v39 }
  0x5b   : > { %450 = vst [vmem:[%s1990_s6 + $0x120] sm:$0xff] %v449_v40 }
  0x5c   : > { %452 = vst [vmem:[%s1990_s6 + $0x128] sm:$0xff] %v451_v41 }
  0x5d   : > { %454 = vst [vmem:[%s1990_s6 + $0x130] sm:$0xff] %v453_v42 }
  0x5e   : > { %456 = vst [vmem:[%s1990_s6 + $0x138] sm:$0xff] %v455_v43 }
  0x5f   : > { %458 = vst [vmem:[%s1990_s6 + $0x140] sm:$0xff] %v457_v44 }
  0x60   : > { %460 = vst [vmem:[%s1990_s6 + $0x148] sm:$0xff] %v459_v45 }
  0x61   : > { %462 = vst [vmem:[%s1990_s6 + $0x150] sm:$0xff] %v461_v46 }
  0x62   : > { %464 = vst [vmem:[%s1990_s6 + $0x158] sm:$0xff] %v463_v47 }
  0x63   : > { %466 = vst [vmem:[%s1990_s6 + $0x160] sm:$0xff] %v465_v48 }
  0x64   : > { %468 = vst [vmem:[%s1990_s6 + $0x168] sm:$0xff] %v467_v49 }
  0x65   : > { %470 = vst [vmem:[%s1990_s6 + $0x170] sm:$0xff] %v469_v50 }
  0x66   : > { %472 = vst [vmem:[%s1990_s6 + $0x178] sm:$0xff] %v471_v51 }
  0x67   : > { %474 = vst [vmem:[%s1990_s6 + $0x180] sm:$0xff] %v473_v52 }
  0x68   : > { %476 = vst [vmem:[%s1990_s6 + $0x188] sm:$0xff] %v475_v53 }
  0x69   : > { %478 = vst [vmem:[%s1990_s6 + $0x190] sm:$0xff] %v477_v54 }
  0x6a   : > { %480 = vst [vmem:[%s1990_s6 + $0x198] sm:$0xff] %v479_v55 }
  0x6b   : > { %482 = vst [vmem:[%s1990_s6 + $0x1a0] sm:$0xff] %v481_v56 }
  0x6c   : > { %484 = vst [vmem:[%s1990_s6 + $0x1a8] sm:$0xff] %v483_v57 }
  0x6d   : > { %486 = vst [vmem:[%s1990_s6 + $0x1b0] sm:$0xff] %v485_v58 }
  0x6e   : > { %488 = vst [vmem:[%s1990_s6 + $0x1b8] sm:$0xff] %v487_v59 }
  0x6f   : > { %490 = vst [vmem:[%s1990_s6 + $0x1c0] sm:$0xff] %v489_v60 }
  0x70   : > { %492 = vst [vmem:[%s1990_s6 + $0x1c8] sm:$0xff] %v491_v61 }
  0x71   : > { %494 = vst [vmem:[%s1990_s6 + $0x1d0] sm:$0xff] %v493_v62 }
  0x72   : > { %496 = vst [vmem:[%s1990_s6 + $0x1d8] sm:$0xff] %v495_v63 }
  0x73   : > { %498 = vst [vmem:[%s1990_s6 + $0x1e0] sm:$0xff] %v497_v0 }
  0x74   : > { %500 = vst [vmem:[%s1990_s6 + $0x1e8] sm:$0xff] %v499_v1 }
  0x75   : > { %502 = vst [vmem:[%s1990_s6 + $0x1f0] sm:$0xff] %v501_v2 }
  0x76   : > { %504 = vst [vmem:[%s1990_s6 + $0x1f8] sm:$0xff] %v503_v3 }
  0x77 PF: > { %p1318_p0 = scmp.ge.s32.totalorder %s1848_s22, 1  ;;  %p517_p1 = scmp.lt.s32.totalorder %s1848_s22, 11 }
  0x79   : > { %p518_p2 = pnand %p1318_p0, %p517_p1 }
  0x7a   : > { %s524_s0 = sand.u32 (!%p518_p2), 1, %s1824_s16   ;;  %s531_s23 = sand.u32 (!%p518_p2), 1, %s1816_s14  }
  0x7b   : > { %521 = sbr.rel (%p518_p2) target bundleno = 377 (0x179), region = 85  ;;  %s1319_s28 = sshll.u32 (!%p518_p2), %s524_s0, 5 }
  0x7c   : > { %s1320_s7 = sshll.u32 (!%p518_p2), %s531_s23, 9  ;;  %s558_s11 = sand.u32 (!%p518_p2), 1, %s1808_s12  }
  0x7d   : > { %s1322_s26 = sshll.u32 (!%p518_p2), %s1836_s19, 1  ;;  %s1321_s29 = sshll.u32 (!%p518_p2), %s558_s11, 4 }
  0x7e   : > { %p566_p3 = scmp.lt.s32.totalorder (!%p518_p2), %s1322_s26, 3  ;;  %s2129_s6 = scalar_lea.vmem (!%p518_p2), [#allocation3], %s1319_s28 }
  0x7f   : > { %s2131_s1 = scalar_lea.vmem (!%p518_p2), [#allocation4], %s1320_s7  ;;  %s2133_s25 = scalar_lea.vmem (!%p518_p2), [#allocation5], %s1321_s29 }
  0x80   : > { %s2368_s26 = smov (!%p566_p3, %s1322_s26), 3  ;;  %p1323_p4 = scmp.ne.s32.totalorder %s1832_s18, 0 }
  0x81   : > { %s568_s5 = scalar_lea.vmem %s2339_s2, %s2368_s26 }
  0x82   : > { %575 = sbr.rel (%p1323_p4) target bundleno = 140 (0x8c), region = 97 }
  0x87   : > { %v1850_v4 = vmov 0.0  }
  0x88   : > { %576 = vst [vmem:[#allocation2 + $0x10] sm:$0xff] %v1850_v4 }
  0x89   : > { %577 = vst [vmem:[#allocation2] sm:$0xff] %v1850_v4 }
  0x8a   : > { %578 = vst [vmem:[#allocation2 + $0x18] sm:$0xff] %v1850_v4 }
  0x8b   : > { %579 = vst [vmem:[#allocation2 + $0x8] sm:$0xff] %v1850_v4 }
  0x8c PF: > { %v1398_v5 = vld [vmem:[%s2131_s1 + $0x70] sm:$0xf]  ;;  %v1623_v6 = vld [vmem:[%s2131_s1 + $0x74] sm:$0xf0]  ;;  %v1390_v16 = vld [vmem:[%s2131_s1 + $0x60] sm:$0xf] }
  0x8d   : > { %v1462_v7 = vld [vmem:[%s2131_s1 + $0xf0] sm:$0xf]  ;;  %v1399_v8 = vor.u32 %v1623_v6, %v1398_v5  ;;  %v1639_v9 = vld [vmem:[%s2131_s1 + $0xf4] sm:$0xf0]  ;;  %v1621_v18 = vld [vmem:[%s2131_s1 + $0x64] sm:$0xf0] }
  0x8e   : > { %v1526_v10 = vld [vmem:[%s2131_s1 + $0x170] sm:$0xf]  ;;  %v1655_v11 = vld [vmem:[%s2131_s1 + $0x174] sm:$0xf0]  ;;  %v1463_v12 = vor.u32 %v1639_v9, %v1462_v7  ;;  %v1454_v19 = vld [vmem:[%s2131_s1 + $0xe0] sm:$0xf]  ;;  %v1391_v21 = vor.u32 %v1621_v18, %v1390_v16 }
  0x8f   : > { %v1527_v13 = vor.u32 %v1655_v11, %v1526_v10  ;;  %v1590_v14 = vld [vmem:[%s2131_s1 + $0x1f0] sm:$0xf]  ;;  %v1671_v15 = vld [vmem:[%s2131_s1 + $0x1f4] sm:$0xf0]  ;;  %992 = vmatpush.bf16.msra.mxu0 %v1399_v8  ;;  %v1637_v20 = vld [vmem:[%s2131_s1 + $0xe4] sm:$0xf0] }
  0x90   : > { %v1591_v17 = vor.u32 %v1671_v15, %v1590_v14  ;;  %1006 = vmatpush.bf16.msra.mxu1 %v1463_v12  ;;  %v1455_v22 = vor.u32 %v1637_v20, %v1454_v19  ;;  %v1518_v23 = vld [vmem:[%s2131_s1 + $0x160] sm:$0xf]  ;;  %v1653_v24 = vld [vmem:[%s2131_s1 + $0x164] sm:$0xf0]  ;;  %v1382_v28 = vld [vmem:[%s2131_s1 + $0x50] sm:$0xf] }
  0x91   : > { %1020 = vmatpush.bf16.msra.mxu2 %v1527_v13  ;;  %v1582_v25 = vld [vmem:[%s2131_s1 + $0x1e0] sm:$0xf]  ;;  %v1519_v26 = vor.u32 %v1653_v24, %v1518_v23  ;;  %v1669_v27 = vld [vmem:[%s2131_s1 + $0x1e4] sm:$0xf0]  ;;  %v1619_v29 = vld [vmem:[%s2131_s1 + $0x54] sm:$0xf0] }
  0x92   : > { %1034 = vmatpush.bf16.msra.mxu3 %v1591_v17  ;;  %v1583_v30 = vor.u32 %v1669_v27, %v1582_v25  ;;  %v1446_v31 = vld [vmem:[%s2131_s1 + $0xd0] sm:$0xf]  ;;  %v1635_v32 = vld [vmem:[%s2131_s1 + $0xd4] sm:$0xf0]  ;;  %v1383_v34 = vor.u32 %v1619_v29, %v1382_v28  ;;  %v1374_v40 = vld [vmem:[%s2131_s1 + $0x40] sm:$0xf] }
  0x93   : > { %v1510_v33 = vld [vmem:[%s2131_s1 + $0x150] sm:$0xf]  ;;  %993 = vmatpush.bf16.msra.mxu0 %v1391_v21  ;;  %v1651_v35 = vld [vmem:[%s2131_s1 + $0x154] sm:$0xf0]  ;;  %v1447_v38 = vor.u32 %v1635_v32, %v1446_v31  ;;  %v1617_v41 = vld [vmem:[%s2131_s1 + $0x44] sm:$0xf0] }
  0x94   : > { %v1574_v36 = vld [vmem:[%s2131_s1 + $0x1d0] sm:$0xf]  ;;  %v1667_v37 = vld [vmem:[%s2131_s1 + $0x1d4] sm:$0xf0]  ;;  %1007 = vmatpush.bf16.msra.mxu1 %v1455_v22  ;;  %v1511_v39 = vor.u32 %v1651_v35, %v1510_v33  ;;  %v1438_v42 = vld [vmem:[%s2131_s1 + $0xc0] sm:$0xf]  ;;  %v1375_v49 = vor.u32 %v1617_v41, %v1374_v40 }
  0x95   : > { %1021 = vmatpush.bf16.msra.mxu2 %v1519_v26  ;;  %v1575_v43 = vor.u32 %v1667_v37, %v1574_v36  ;;  %v1633_v44 = vld [vmem:[%s2131_s1 + $0xc4] sm:$0xf0]  ;;  %v1502_v45 = vld [vmem:[%s2131_s1 + $0x140] sm:$0xf]  ;;  %v1366_v52 = vld [vmem:[%s2131_s1 + $0x30] sm:$0xf] }
  0x96   : > { %1035 = vmatpush.bf16.msra.mxu3 %v1583_v30  ;;  %v1649_v46 = vld [vmem:[%s2131_s1 + $0x144] sm:$0xf0]  ;;  %v1566_v47 = vld [vmem:[%s2131_s1 + $0x1c0] sm:$0xf]  ;;  %v1439_v50 = vor.u32 %v1633_v44, %v1438_v42  ;;  %v1615_v53 = vld [vmem:[%s2131_s1 + $0x34] sm:$0xf0] }
  0x97   : > { %v1665_v48 = vld [vmem:[%s2131_s1 + $0x1c4] sm:$0xf0]  ;;  %994 = vmatpush.bf16.msra.mxu0 %v1383_v34  ;;  %v1503_v51 = vor.u32 %v1649_v46, %v1502_v45  ;;  %v1430_v54 = vld [vmem:[%s2131_s1 + $0xb0] sm:$0xf]  ;;  %v1631_v56 = vld [vmem:[%s2131_s1 + $0xb4] sm:$0xf0]  ;;  %v1367_v61 = vor.u32 %v1615_v53, %v1366_v52 }
  0x98   : > { %1008 = vmatpush.bf16.msra.mxu1 %v1447_v38  ;;  %v1567_v55 = vor.u32 %v1665_v48, %v1566_v47  ;;  %v1494_v57 = vld [vmem:[%s2131_s1 + $0x130] sm:$0xf]  ;;  %v1647_v58 = vld [vmem:[%s2131_s1 + $0x134] sm:$0xf0]  ;;  %v1431_v62 = vor.u32 %v1631_v56, %v1430_v54  ;;  %v1358_v0 = vld [vmem:[%s2131_s1 + $0x20] sm:$0xf] }
  0x99   : > { %1022 = vmatpush.bf16.msra.mxu2 %v1511_v39  ;;  %v1558_v59 = vld [vmem:[%s2131_s1 + $0x1b0] sm:$0xf]  ;;  %v1663_v60 = vld [vmem:[%s2131_s1 + $0x1b4] sm:$0xf0]  ;;  %v1495_v63 = vor.u32 %v1647_v58, %v1494_v57  ;;  %v1613_v1 = vld [vmem:[%s2131_s1 + $0x24] sm:$0xf0] }
  0x9a   : > { %1036 = vmatpush.bf16.msra.mxu3 %v1575_v43  ;;  %v1422_v2 = vld [vmem:[%s2131_s1 + $0xa0] sm:$0xf]  ;;  %v1559_v3 = vor.u32 %v1663_v60, %v1558_v59  ;;  %v1629_v4 = vld [vmem:[%s2131_s1 + $0xa4] sm:$0xf0]  ;;  %v1359_v9 = vor.u32 %v1613_v1, %v1358_v0  ;;  %v1350_v12 = vld [vmem:[%s2131_s1 + $0x10] sm:$0xf] }
  0x9b   : > { %995 = vmatpush.bf16.msra.mxu0 %v1375_v49  ;;  %v1486_v5 = vld [vmem:[%s2131_s1 + $0x120] sm:$0xf]  ;;  %v1645_v6 = vld [vmem:[%s2131_s1 + $0x124] sm:$0xf0]  ;;  %v1423_v10 = vor.u32 %v1629_v4, %v1422_v2  ;;  %v1611_v13 = vld [vmem:[%s2131_s1 + $0x14] sm:$0xf0] }
  0x9c   : > { %1009 = vmatpush.bf16.msra.mxu1 %v1439_v50  ;;  %v1550_v7 = vld [vmem:[%s2131_s1 + $0x1a0] sm:$0xf]  ;;  %v1661_v8 = vld [vmem:[%s2131_s1 + $0x1a4] sm:$0xf0]  ;;  %v1487_v11 = vor.u32 %v1645_v6, %v1486_v5  ;;  %v1414_v14 = vld [vmem:[%s2131_s1 + $0x90] sm:$0xf]  ;;  %v1351_v22 = vor.u32 %v1611_v13, %v1350_v12 }
  0x9d   : > { %1023 = vmatpush.bf16.msra.mxu2 %v1503_v51  ;;  %v1551_v15 = vor.u32 %v1661_v8, %v1550_v7  ;;  %v1627_v16 = vld [vmem:[%s2131_s1 + $0x94] sm:$0xf0]  ;;  %v1478_v17 = vld [vmem:[%s2131_s1 + $0x110] sm:$0xf]  ;;  %v1342_v21 = vld [vmem:[%s2131_s1] sm:$0xf] }
  0x9e   : > { %1037 = vmatpush.bf16.msra.mxu3 %v1567_v55  ;;  %v1643_v18 = vld [vmem:[%s2131_s1 + $0x114] sm:$0xf0]  ;;  %v1542_v19 = vld [vmem:[%s2131_s1 + $0x190] sm:$0xf]  ;;  %v1609_v23 = vld [vmem:[%s2131_s1 + $0x4] sm:$0xf0]  ;;  %v1415_v26 = vor.u32 %v1627_v16, %v1414_v14 }
  0x9f   : > { %996 = vmatpush.bf16.msra.mxu0 %v1367_v61  ;;  %v1659_v20 = vld [vmem:[%s2131_s1 + $0x194] sm:$0xf0]  ;;  %v1406_v24 = vld [vmem:[%s2131_s1 + $0x80] sm:$0xf]  ;;  %v1625_v25 = vld [vmem:[%s2131_s1 + $0x84] sm:$0xf0]  ;;  %v1479_v27 = vor.u32 %v1643_v18, %v1478_v17  ;;  %v1343_v38 = vor.u32 %v1609_v23, %v1342_v21 }
  0xa0   : > { %1010 = vmatpush.bf16.msra.mxu1 %v1431_v62  ;;  %v1470_v28 = vld [vmem:[%s2131_s1 + $0x100] sm:$0xf]  ;;  %v1641_v29 = vld [vmem:[%s2131_s1 + $0x104] sm:$0xf0]  ;;  %v1543_v31 = vor.u32 %v1659_v20, %v1542_v19  ;;  %v1622_v33 = vld [vmem:[%s2131_s1 + $0x74] sm:$0xf]  ;;  %v1407_v42 = vor.u32 %v1625_v25, %v1406_v24 }
  0xa1   : > { %1024 = vmatpush.bf16.msra.mxu2 %v1495_v63  ;;  %v1534_v30 = vld [vmem:[%s2131_s1 + $0x180] sm:$0xf]  ;;  %v1657_v32 = vld [vmem:[%s2131_s1 + $0x184] sm:$0xf0]  ;;  %v1400_v34 = vld [vmem:[%s2131_s1 + $0x78] sm:$0xf0]  ;;  %v1471_v43 = vor.u32 %v1641_v29, %v1470_v28 }
  0xa2   : > { %1038 = vmatpush.bf16.msra.mxu3 %v1559_v3  ;;  %v1638_v35 = vld [vmem:[%s2131_s1 + $0xf4] sm:$0xf]  ;;  %v1464_v36 = vld [vmem:[%s2131_s1 + $0xf8] sm:$0xf0]  ;;  %v1620_v44 = vld [vmem:[%s2131_s1 + $0x64] sm:$0xf]  ;;  %v1535_v48 = vor.u32 %v1657_v32, %v1534_v30  ;;  %v1403_v49 = vor.u32 %v1622_v33, %v1400_v34 }
  0xa3   : > { %997 = vmatpush.bf16.msra.mxu0 %v1359_v9  ;;  %v1654_v37 = vld [vmem:[%s2131_s1 + $0x174] sm:$0xf]  ;;  %v1528_v39 = vld [vmem:[%s2131_s1 + $0x178] sm:$0xf0]  ;;  %v1392_v45 = vld [vmem:[%s2131_s1 + $0x68] sm:$0xf0]  ;;  %v1467_v54 = vor.u32 %v1638_v35, %v1464_v36 }
  0xa4   : > { %1011 = vmatpush.bf16.msra.mxu1 %v1423_v10  ;;  %v1670_v40 = vld [vmem:[%s2131_s1 + $0x1f4] sm:$0xf]  ;;  %v1592_v41 = vld [vmem:[%s2131_s1 + $0x1f8] sm:$0xf0]  ;;  %v1334_v46 = vld [vmem:[%s2129_s6 + $0x8] sm:$0xf]  ;;  %v1531_v55 = vor.u32 %v1654_v37, %v1528_v39  ;;  %v1395_v4 = vor.u32 %v1620_v44, %v1392_v45 }
  0xa5   : > { %1025 = vmatpush.bf16.msra.mxu2 %v1487_v11  ;;  %v1607_v47 = vld [vmem:[%s2129_s6 + $0x14] sm:$0xf0]  ;;  %v1636_v50 = vld [vmem:[%s2131_s1 + $0xe4] sm:$0xf]  ;;  %v1456_v51 = vld [vmem:[%s2131_s1 + $0xe8] sm:$0xf0]  ;;  %v1595_v59 = vor.u32 %v1670_v40, %v1592_v41 }
  0xa6   : > { %1039 = vmatpush.bf16.msra.mxu3 %v1551_v15  ;;  %v1652_v52 = vld [vmem:[%s2131_s1 + $0x164] sm:$0xf]  ;;  %v1520_v53 = vld [vmem:[%s2131_s1 + $0x168] sm:$0xf0]  ;;  %v1336_v57 = vld [vmem:[%s2129_s6 + $0x18] sm:$0xf0]  ;;  %v2219_v60 = vor.u32 %v1607_v47, %v1334_v46  ;;  %v1459_v6 = vor.u32 %v1636_v50, %v1456_v51 }
  0xa7   : > { %998 = vmatpush.bf16.msra.mxu0 %v1351_v22  ;;  %v1605_v56 = vld [vmem:[%s2129_s6 + $0xc] sm:$0xf]  ;;  %v1326_v58 = vld [vmem:[%s2129_s6] sm:$0xf]  ;;  %v1606_v61 = vld [vmem:[%s2129_s6 + $0xc] sm:$0xf0]  ;;  %v1523_v7 = vor.u32 %v1652_v52, %v1520_v53 }
  0xa8   : > { %1012 = vmatpush.bf16.msra.mxu1 %v1415_v26  ;;  %v1604_v62 = vld [vmem:[%s2129_s6 + $0x4] sm:$0xf]  ;;  %v1328_v63 = vld [vmem:[%s2129_s6 + $0x10] sm:$0xf0]  ;;  %v1584_v1 = vld [vmem:[%s2131_s1 + $0x1e8] sm:$0xf0]  ;;  %v2226_v2 = vor.u32 %v1605_v56, %v1336_v57  ;;  %v2228_v3 = vor.u32 %v1606_v61, %v1326_v58 }
  0xa9   : > { %1026 = vmatpush.bf16.msra.mxu2 %v1479_v27  ;;  %v1668_v0 = vld [vmem:[%s2131_s1 + $0x1e4] sm:$0xf]  ;;  %v2230_v5 = vor.u32 %v1604_v62, %v1328_v63  ;;  %v1618_v8 = vld [vmem:[%s2131_s1 + $0x54] sm:$0xf]  ;;  %v1384_v9 = vld [vmem:[%s2131_s1 + $0x58] sm:$0xf0] }
  0xaa   : > { %1040 = vmatpush.bf16.msra.mxu3 %v1543_v31  ;;  %v1634_v10 = vld [vmem:[%s2131_s1 + $0xd4] sm:$0xf]  ;;  %v1587_v11 = vor.u32 %v1668_v0, %v1584_v1  ;;  %v1448_v12 = vld [vmem:[%s2131_s1 + $0xd8] sm:$0xf0]  ;;  %v1387_v17 = vor.u32 %v1618_v8, %v1384_v9  ;;  %v1616_v20 = vld [vmem:[%s2131_s1 + $0x44] sm:$0xf] }
  0xab   : > { %999 = vmatpush.bf16.msra.mxu0 %v1343_v38  ;;  %v1650_v13 = vld [vmem:[%s2131_s1 + $0x154] sm:$0xf]  ;;  %v1512_v14 = vld [vmem:[%s2131_s1 + $0x158] sm:$0xf0]  ;;  %v1451_v18 = vor.u32 %v1634_v10, %v1448_v12  ;;  %v1376_v21 = vld [vmem:[%s2131_s1 + $0x48] sm:$0xf0] }
  0xac   : > { %1013 = vmatpush.bf16.msra.mxu1 %v1407_v42  ;;  %v1666_v15 = vld [vmem:[%s2131_s1 + $0x1d4] sm:$0xf]  ;;  %v1576_v16 = vld [vmem:[%s2131_s1 + $0x1d8] sm:$0xf0]  ;;  %v1515_v19 = vor.u32 %v1650_v13, %v1512_v14  ;;  %v1632_v22 = vld [vmem:[%s2131_s1 + $0xc4] sm:$0xf]  ;;  %v1379_v29 = vor.u32 %v1616_v20, %v1376_v21 }
  0xad   : > { %1027 = vmatpush.bf16.msra.mxu2 %v1471_v43  ;;  %v1579_v23 = vor.u32 %v1666_v15, %v1576_v16  ;;  %v1440_v24 = vld [vmem:[%s2131_s1 + $0xc8] sm:$0xf0]  ;;  %v1648_v25 = vld [vmem:[%s2131_s1 + $0x144] sm:$0xf]  ;;  %v1614_v32 = vld [vmem:[%s2131_s1 + $0x34] sm:$0xf] }
  0xae   : > { %1041 = vmatpush.bf16.msra.mxu3 %v1535_v48  ;;  %1000 = vmatmul.bf16.vlgmr.msra.gmra.mxu0 %v2228_v3  ;;  %v1504_v26 = vld [vmem:[%s2131_s1 + $0x148] sm:$0xf0]  ;;  %v1664_v27 = vld [vmem:[%s2131_s1 + $0x1c4] sm:$0xf]  ;;  %v1443_v30 = vor.u32 %v1632_v22, %v1440_v24  ;;  %v1368_v33 = vld [vmem:[%s2131_s1 + $0x38] sm:$0xf0] }
  0xaf   : > { %1048 = vmatpush.bf16.msrb.mxu0 %v1403_v49  ;;  %1014 = vmatmul.bf16.vlgmr.msra.gmra.mxu1 %v2230_v5  ;;  %v1568_v28 = vld [vmem:[%s2131_s1 + $0x1c8] sm:$0xf0]  ;;  %v1507_v31 = vor.u32 %v1648_v25, %v1504_v26  ;;  %v1630_v34 = vld [vmem:[%s2131_s1 + $0xb4] sm:$0xf]  ;;  %v1432_v36 = vld [vmem:[%s2131_s1 + $0xb8] sm:$0xf0]  ;;  %v1371_v41 = vor.u32 %v1614_v32, %v1368_v33 }
  0xb0   : > { %1062 = vmatpush.bf16.msrb.mxu1 %v1467_v54  ;;  %1028 = vmatmul.bf16.vlgmr.msra.gmra.mxu2 %v2219_v60  ;;  %v1571_v35 = vor.u32 %v1664_v27, %v1568_v28  ;;  %v1646_v37 = vld [vmem:[%s2131_s1 + $0x134] sm:$0xf]  ;;  %v1496_v38 = vld [vmem:[%s2131_s1 + $0x138] sm:$0xf0]  ;;  %v1435_v42 = vor.u32 %v1630_v34, %v1432_v36  ;;  %v1612_v44 = vld [vmem:[%s2131_s1 + $0x24] sm:$0xf] }
  0xb1   : > { %1076 = vmatpush.bf16.msrb.mxu2 %v1531_v55  ;;  %1042 = vmatmul.bf16.vlgmr.msra.gmra.mxu3 %v2226_v2  ;;  %v1662_v39 = vld [vmem:[%s2131_s1 + $0x1b4] sm:$0xf]  ;;  %v1560_v40 = vld [vmem:[%s2131_s1 + $0x1b8] sm:$0xf0]  ;;  %v1499_v43 = vor.u32 %v1646_v37, %v1496_v38  ;;  %v1360_v45 = vld [vmem:[%s2131_s1 + $0x28] sm:$0xf0] }
  0xb2   : > { %1090 = vmatpush.bf16.msrb.mxu3 %v1595_v59  ;;  %v1628_v46 = vld [vmem:[%s2131_s1 + $0xa4] sm:$0xf]  ;;  %v1563_v47 = vor.u32 %v1662_v39, %v1560_v40  ;;  %v1424_v48 = vld [vmem:[%s2131_s1 + $0xa8] sm:$0xf0]  ;;  %v1363_v53 = vor.u32 %v1612_v44, %v1360_v45  ;;  %v1610_v56 = vld [vmem:[%s2131_s1 + $0x14] sm:$0xf] }
  0xb3   : > { %1049 = vmatpush.bf16.msrb.mxu0 %v1395_v4  ;;  %v1644_v49 = vld [vmem:[%s2131_s1 + $0x124] sm:$0xf]  ;;  %v1488_v50 = vld [vmem:[%s2131_s1 + $0x128] sm:$0xf0]  ;;  %v1427_v54 = vor.u32 %v1628_v46, %v1424_v48  ;;  %v1352_v57 = vld [vmem:[%s2131_s1 + $0x18] sm:$0xf0] }
  0xb4   : > { %1063 = vmatpush.bf16.msrb.mxu1 %v1459_v6  ;;  %v1660_v51 = vld [vmem:[%s2131_s1 + $0x1a4] sm:$0xf]  ;;  %v1552_v52 = vld [vmem:[%s2131_s1 + $0x1a8] sm:$0xf0]  ;;  %v1491_v55 = vor.u32 %v1644_v49, %v1488_v50  ;;  %v1626_v58 = vld [vmem:[%s2131_s1 + $0x94] sm:$0xf]  ;;  %v1355_v4 = vor.u32 %v1610_v56, %v1352_v57 }
  0xb5   : > { %1077 = vmatpush.bf16.msrb.mxu2 %v1523_v7  ;;  %v1555_v59 = vor.u32 %v1660_v51, %v1552_v52  ;;  %v1416_v61 = vld [vmem:[%s2131_s1 + $0x98] sm:$0xf0]  ;;  %v1642_v62 = vld [vmem:[%s2131_s1 + $0x114] sm:$0xf]  ;;  %v1608_v8 = vld [vmem:[%s2131_s1 + $0x4] sm:$0xf] }
  0xb6   : > { %1091 = vmatpush.bf16.msrb.mxu3 %v1587_v11  ;;  %v1480_v63 = vld [vmem:[%s2131_s1 + $0x118] sm:$0xf0]  ;;  %v1658_v0 = vld [vmem:[%s2131_s1 + $0x194] sm:$0xf]  ;;  %v1419_v6 = vor.u32 %v1626_v58, %v1416_v61  ;;  %v1344_v9 = vld [vmem:[%s2131_s1 + $0x8] sm:$0xf0] }
  0xb7   : > { %1050 = vmatpush.bf16.msrb.mxu0 %v1387_v17  ;;  %v1544_v1 = vld [vmem:[%s2131_s1 + $0x198] sm:$0xf0]  ;;  %v1483_v7 = vor.u32 %v1642_v62, %v1480_v63  ;;  %v1624_v10 = vld [vmem:[%s2131_s1 + $0x84] sm:$0xf]  ;;  %v1408_v12 = vld [vmem:[%s2131_s1 + $0x88] sm:$0xf0]  ;;  %v1347_v17 = vor.u32 %v1608_v8, %v1344_v9 }
  0xb8   : > { %1064 = vmatpush.bf16.msrb.mxu1 %v1451_v18  ;;  %v1547_v11 = vor.u32 %v1658_v0, %v1544_v1  ;;  %v1640_v13 = vld [vmem:[%s2131_s1 + $0x104] sm:$0xf]  ;;  %v1472_v14 = vld [vmem:[%s2131_s1 + $0x108] sm:$0xf0]  ;;  %v1411_v18 = vor.u32 %v1624_v10, %v1408_v12  ;;  %v580_v27 = vld [vmem:[#allocation2 + $0x10] sm:$0xff]  ;;  %p1596_p5 = scmp.ne.s32.totalorder %s1832_s18, 4 }
  0xb9   : > { %1078 = vmatpush.bf16.msrb.mxu2 %v1515_v19  ;;  %v1656_v15 = vld [vmem:[%s2131_s1 + $0x184] sm:$0xf]  ;;  %v1536_v16 = vld [vmem:[%s2131_s1 + $0x188] sm:$0xf0]  ;;  %v1475_v19 = vor.u32 %v1640_v13, %v1472_v14  ;;  %v582_v34 = vld [vmem:[#allocation2 + $0x18] sm:$0xff] }
  0xba   : > { %1092 = vmatpush.bf16.msrb.mxu3 %v1579_v23  ;;  %v1539_v20 = vor.u32 %v1656_v15, %v1536_v16  ;;  %v583_v49 = vld [vmem:[#allocation2 + $0x8] sm:$0xff] }
  0xbb   : > { %1051 = vmatpush.bf16.msrb.mxu0 %v1379_v29 }
  0xbc   : > { %1065 = vmatpush.bf16.msrb.mxu1 %v1443_v30 }
  0xbd   : > { %1079 = vmatpush.bf16.msrb.mxu2 %v1507_v31 }
  0xbe   : > { %1093 = vmatpush.bf16.msrb.mxu3 %v1571_v35 }
  0xbf   : > { %1052 = vmatpush.bf16.msrb.mxu0 %v1371_v41  ;;  %v581_v41 = vld [vmem:[#allocation2] sm:$0xff] }
  0xc0   : > { %1066 = vmatpush.bf16.msrb.mxu1 %v1435_v42 }
  0xc1   : > { %1080 = vmatpush.bf16.msrb.mxu2 %v1499_v43 }
  0xc2   : > { %1094 = vmatpush.bf16.msrb.mxu3 %v1563_v47 }
  0xc3   : > { %1053 = vmatpush.bf16.msrb.mxu0 %v1363_v53 }
  0xc4   : > { %1067 = vmatpush.bf16.msrb.mxu1 %v1427_v54 }
  0xc5   : > { %1081 = vmatpush.bf16.msrb.mxu2 %v1491_v55 }
  0xc6   : > { %1095 = vmatpush.bf16.msrb.mxu3 %v1555_v59 }
  0xc7   : > { %1054 = vmatpush.bf16.msrb.mxu0 %v1355_v4 }
  0xc8   : > { %1068 = vmatpush.bf16.msrb.mxu1 %v1419_v6 }
  0xc9   : > { %1082 = vmatpush.bf16.msrb.mxu2 %v1483_v7 }
  0xca   : > { %1096 = vmatpush.bf16.msrb.mxu3 %v1547_v11 }
  0xcb   : > { %1055 = vmatpush.bf16.msrb.mxu0 %v1347_v17 }
  0xcc   : > { %1069 = vmatpush.bf16.msrb.mxu1 %v1411_v18 }
  0xcd   : > { %1083 = vmatpush.bf16.msrb.mxu2 %v1475_v19 }
  0xce   : > { %1097 = vmatpush.bf16.msrb.mxu3 %v1539_v20  ;;  %1056 = vmatmul.bf16.vlgmr.msrb.gmra.mxu0 %v2228_v3 }
  0xcf   : > { %1070 = vmatmul.bf16.vlgmr.msrb.gmra.mxu1 %v2230_v5 }
  0xd0   : > { %1084 = vmatmul.bf16.vlgmr.msrb.gmra.mxu2 %v2219_v60 }
  0xd1   : > { %1098 = vmatmul.bf16.vlgmr.msrb.gmra.mxu3 %v2226_v2 }
 0x12b   : > { %v1001_v21 = vpop.f32.mrf.mxu0 }
 0x12c   : > { %v1015_v22 = vpop.f32.mrf.mxu1 }
 0x12d   : > { %v1016_v23 = vadd.f32 %v1015_v22, %v1001_v21 }
 0x133   : > { %v1029_v24 = vpop.f32.mrf.mxu2  ;;  %v1003_v29 = vpop.f32.mrf.mxu0 }
 0x134   : > { %v1030_v25 = vadd.f32 %v1029_v24, %v1016_v23  ;;  %v1043_v26 = vpop.f32.mrf.mxu3  ;;  %v1017_v30 = vpop.f32.mrf.mxu1 }
 0x135   : > { %v1018_v32 = vadd.f32 %v1017_v30, %v1003_v29 }
 0x136   : > { %v1044_v28 = vadd.f32 %v1043_v26, %v1030_v25 }
 0x138   : > { %v1104_v31 = vadd.f32 %v1044_v28, %v580_v27 }
 0x13a   : > { %1108 = vst [vmem:[#allocation2 + $0x10] sm:$0xff] %v1104_v31 }
 0x13b   : > { %v1031_v3 = vpop.f32.mrf.mxu2 }
 0x13c   : > { %v1032_v33 = vadd.f32 %v1031_v3, %v1018_v32  ;;  %v1045_v5 = vpop.f32.mrf.mxu3 }
 0x13e   : > { %v1046_v60 = vadd.f32 %v1045_v5, %v1032_v33 }
 0x140   : > { %v1106_v35 = vadd.f32 %v1046_v60, %v582_v34 }
 0x142   : > { %1110 = vst [vmem:[#allocation2 + $0x18] sm:$0xff] %v1106_v35 }
 0x14b   : > { %v1057_v2 = vpop.f32.mrf.mxu0 }
 0x14c   : > { %v1071_v36 = vpop.f32.mrf.mxu1 }
 0x14d   : > { %v1072_v37 = vadd.f32 %v1071_v36, %v1057_v2 }
 0x153   : > { %v1085_v38 = vpop.f32.mrf.mxu2  ;;  %v1059_v43 = vpop.f32.mrf.mxu0 }
 0x154   : > { %v1086_v39 = vadd.f32 %v1085_v38, %v1072_v37  ;;  %v1099_v40 = vpop.f32.mrf.mxu3  ;;  %v1073_v44 = vpop.f32.mrf.mxu1 }
 0x155   : > { %v1074_v46 = vadd.f32 %v1073_v44, %v1059_v43 }
 0x156   : > { %v1100_v42 = vadd.f32 %v1099_v40, %v1086_v39 }
 0x158   : > { %v1105_v45 = vadd.f32 %v1100_v42, %v581_v41 }
 0x15a   : > { %1109 = vst [vmem:[#allocation2] sm:$0xff] %v1105_v45 }
 0x15b   : > { %v1087_v47 = vpop.f32.mrf.mxu2 }
 0x15c   : > { %v1088_v48 = vadd.f32 %v1087_v47, %v1074_v46  ;;  %v1101_v50 = vpop.f32.mrf.mxu3 }
 0x15e   : > { %v1102_v51 = vadd.f32 %v1101_v50, %v1088_v48  ;;  %1115 = sbr.rel (%p1596_p5) target bundleno = 369 (0x171), region = 101 }
 0x160   : > { %v1107_v52 = vadd.f32 %v1102_v51, %v583_v49 }
 0x162   : > { %1111 = vst [vmem:[#allocation2 + $0x8] sm:$0xff] %v1107_v52 }
 0x163   : > { %v1116_v53 = vld [vmem:[#allocation2 + $0x10] sm:$0xff]  ;;  %v1117_v54 = vld [vmem:[#allocation2] sm:$0xff]  ;;  %v1118_v58 = vld [vmem:[#allocation2 + $0x18] sm:$0xff] }
 0x164   : > { %v1120_v55 = vld [vmem:[%s568_s5] sm:$0x3] }
 0x165   : > { %v1122_v56 = vperm.slane %v1120_v55, 0  ;;  %v1123_v57 = vperm.slane %v1120_v55, 1 }
 0x167   : > { %v1126_v61 = vadd.f32 %v1122_v56, %v1116_v53  ;;  %v1127_v62 = vadd.f32 %v1123_v57, %v1117_v54  ;;  %v1128_v63 = vadd.f32 %v1122_v56, %v1118_v58 }
 0x169   : > { %v1119_v59 = vld [vmem:[#allocation2 + $0x8] sm:$0xff]  ;;  %v1130_v1 = vmax.f32 %v1126_v61, 0.0  ;;  %v1131_v4 = vmax.f32 %v1127_v62, 0.0  ;;  %v1132_v6 = vmax.f32 %v1128_v63, 0.0 }
 0x16a   : > { %v1129_v0 = vadd.f32 %v1123_v57, %v1119_v59 }
 0x16b   : > { %v1134_v8 = vpack.c.bf16 %v1131_v4, %v1130_v1 }
 0x16c   : > { %v1133_v7 = vmax.f32 %v1129_v0, 0.0 }
 0x16d   : > { %1136 = vst [vmem:[%s2133_s25] sm:$0xff] %v1134_v8 }
 0x16e   : > { %v1135_v9 = vpack.c.bf16 %v1133_v7, %v1132_v6 }
 0x170   : > { %1137 = vst [vmem:[%s2133_s25 + $0x8] sm:$0xff] %v1135_v9 }
 0x171 PF: > { %1144 = sbr.rel (!%p1965_p12) target bundleno = 377 (0x179), region = 105  ;;  %s1672_s14 = sshll.u32 (%p1965_p12), %s1836_s19, 3 }
 0x172   : > { %s1152_s0 = scalar_lea.vmem (%p1965_p12), %s2340_s3, %s1672_s14 }
 0x174   : > { %v1183_v10 = vld [vmem:[%s2133_s25] sm:$0xff] (%p1965_p12) }
 0x175   : > { %1184 = vst [vmem:[%s1152_s0] sm:$0xff] (%p1965_p12), %v1183_v10 }
 0x177   : > { %v1185_v11 = vld [vmem:[%s2133_s25 + $0x8] sm:$0xff] }
 0x178   : > { %1186 = vst [vmem:[%s1152_s0 + $0x10] sm:$0xff] %v1185_v11 }
 0x179 PF: > { %s13_s22 = sadd.s32 1, %s1848_s22   ;;  %s2350_s25 = sld [smem:[#allocation6_spill]] }
 0x17a   : > { %p10_p6 = scmp.ge.s32.totalorder %s13_s22, 12   ;;  %s2351_s12 = smov %s1812_s13 }
 0x17b   : > { %s2352_s13 = smov %s1963_s9  ;;  %s2353_s14 = smov %s1820_s15 }
 0x17c   : > { %s2354_s15 = smov %s1960_s8  ;;  %s2355_s16 = smov %s1828_s17 }
 0x17d   : > { %s2356_s17 = smov %s1946_s30  ;;  %s2357_s18 = smov %s1840_s20 }
 0x17e   : > { %s2358_s19 = smov %s1844_s21  ;;  %s2359_s20 = smov %s2362_s24 }
 0x17f   : > { %s2360_s21 = smov %s2350_s25  ;;  %12 = sbr.rel (!%p10_p6) target bundleno = 9 (0x9), region = 185 }

// kernel: bidirectional_flow_estimator.12
= control target key start
LH: loop header
LB: loop body
LE: loop exit
PB: predicated region body
PF: predicated region fallthrough
CT: control target
= control target key end

     0   :  { %s1550_s12 = smov 0   ;;  %s1552_s13 = smov 0   ;;  %s1808_s0 = inlined_call_operand.vmem [shape: bf16[4,16,2048], index: 0, kind: input, shape index: {}]   ;;  %s1809_s1 = inlined_call_operand.vmem [shape: bf16[4,2048,256], index: 1, kind: input, shape index: {}]   ;;  %s1810_s2 = inlined_call_operand.vmem [shape: f32[1,256], index: 2, kind: input, shape index: {}]   ;;  %s1811_s3 = inlined_call_operand.vmem [shape: bf16[4,16,256], index: 3, kind: output, shape index: {}]  }
   0x1   :  { %s1554_s14 = smov 0   ;;  %s1556_s15 = smov 0  }
   0x2   :  { %s1558_s16 = smov 0   ;;  %s1560_s17 = smov 0  }
   0x3   :  { %s1562_s18 = smov 0  }
   0x4 LB: > { %s28_s19 = sadd.s32 1, %s1519_s16  ;;  %s39_s20 = sadd.s32 1, %s1523_s17  ;;  %s1527_s18 = sphi %s1562_s18, %s13_s18   ;;  %s1523_s17 = sphi %s1560_s17, %s1817_s17   ;;  %s1519_s16 = sphi %s1558_s16, %s1816_s16   ;;  %s1515_s15 = sphi %s1556_s15, %s1815_s15   ;;  %s1511_s14 = sphi %s1554_s14, %s1814_s14   ;;  %s1507_s13 = sphi %s1552_s13, %s1813_s13   ;;  %s1503_s12 = sphi %s1550_s12, %s1812_s12  }
   0x5   : > { %p29_p0 = scmp.ge.s32.totalorder %s28_s19, 4  ;;  %p57_p1 = scmp.ne.s32.totalorder %s1507_s13, %s1503_s12 }
   0x6   : > { %p58_p2 = scmp.eq.s32.totalorder %s1527_s18, 0  ;;  %s50_s24 = sadd.s32 1, %s1507_s13 }
   0x7   : > { %s1819_s19 = smov (%p29_p0, %s28_s19), 0  ;;  %s1821_s20 = smov (!%p29_p0, %s39_s20), %s1523_s17 }
   0x8   : > { %p59_p3 = por %p58_p2, %p57_p1  ;;  %p41_p4 = scmp.ge.s32.totalorder %s1821_s20, 4 }
   0x9   : > { %s46_s21 = ssub.s32 %s1519_s16, %s1819_s19  ;;  %p1058_p6 = scmp.ge.s32.totalorder %s1527_s18, 16 }
   0xa   : > { %s1823_s20 = smov (%p41_p4, %s1821_s20), 0 }
   0xb   : > { %s43_s22 = ssub.s32 %s1523_s17, %s1823_s20  ;;  %177 = sbr.rel (%p1058_p6) target bundleno = 27 (0x1b), region = 20 }
   0xc   : > { %s47_s23 = sor.u32 %s46_s21, %s43_s22 }
   0xd   : > { %p48_p5 = scmp.eq.s32.totalorder %s47_s23, 0 }
   0xf   : > { %s1601_s25 = scalar_select %p48_p5, %s1507_s13, %s50_s24  }
  0x10   : > { %180 = sbr.rel (!%p59_p3) target bundleno = 27 (0x1b), region = 24  ;;  %s182_s26 = sand.u32 (%p59_p3), 1, %s1507_s13  }
  0x11   : > { %s1060_s27 = sshll.u32 (%p59_p3), %s1519_s16, 2  ;;  %s1059_s28 = sshll.u32 (%p59_p3), %s182_s26, 5 }
  0x12   : > { %s1061_s29 = sshll.u32 (%p59_p3), %s1523_s17, 5  ;;  %s184_s8 = scalar_lea.vmem (%p59_p3), [#allocation3], %s1059_s28 }
  0x13   : > { %s190_s30 = sadd.s32 (%p59_p3), %s1061_s29, %s1060_s27 }
  0x14   : > { %s1062_s4 = sshll.u32 (%p59_p3), %s190_s30, 2 }
  0x15   : > { %s192_s7 = scalar_lea.vmem %s1808_s0, %s1062_s4 }
  0x16   : > { %v205_v0 = vld [vmem:[%s192_s7] sm:$0xff]  ;;  %v207_v1 = vld [vmem:[%s192_s7 + $0x8] sm:$0xff] }
  0x17   : > { %v209_v2 = vld [vmem:[%s192_s7 + $0x40] sm:$0xff]  ;;  %206 = vst [vmem:[%s184_s8] sm:$0xff] %v205_v0  ;;  %v211_v3 = vld [vmem:[%s192_s7 + $0x48] sm:$0xff] }
  0x18   : > { %208 = vst [vmem:[%s184_s8 + $0x8] sm:$0xff] %v207_v1 }
  0x19   : > { %210 = vst [vmem:[%s184_s8 + $0x10] sm:$0xff] %v209_v2 }
  0x1a   : > { %212 = vst [vmem:[%s184_s8 + $0x18] sm:$0xff] %v211_v3 }
  0x1b PF: > { %p1063_p7 = scmp.ge.s32.totalorder %s1527_s18, 1  ;;  %p236_p8 = scmp.lt.s32.totalorder %s1527_s18, 17 }
  0x1d   : > { %p237_p9 = pnand %p1063_p7, %p236_p8 }
  0x1e   : > { %s243_s9 = sand.u32 (!%p237_p9), 1, %s1503_s12   ;;  %s1065_s10 = sshll.u32 (!%p237_p9), %s1511_s14, 6 }
  0x1f   : > { %240 = sbr.rel (%p237_p9) target bundleno = 278 (0x116), region = 51  ;;  %s1064_s11 = sshll.u32 (!%p237_p9), %s243_s9, 5 }
  0x20   : > { %p297_p10 = scmp.lt.s32.totalorder (!%p237_p9), %s1515_s15, 3  ;;  %p299_p11 = scmp.lt.s32.totalorder (!%p237_p9), %s1065_s10, 255 }
  0x21   : > { %s1626_s5 = scalar_lea.vmem (!%p237_p9), [#allocation3], %s1064_s11  ;;  %p1071_p12 = scmp.ne.s32.totalorder (!%p237_p9), %s1511_s14, 0 }
  0x24   : > { %s1825_s15 = smov (!%p297_p10, %s1515_s15), 3  ;;  %s1827_s10 = smov (!%p299_p11, %s1065_s10), 255 }
  0x25   : > { %s1067_s21 = sshll.u32 %s1825_s15, 9  ;;  %s1347_s22 = sshll.u32 %s1825_s15, 4 }
  0x26   : > { %s1066_s23 = sshll.u32 %s1827_s10, 1  ;;  %s1619_s27 = scalar_lea.vmem %s1811_s3, %s1347_s22 }
  0x27   : > { %s306_s28 = sadd.s32 %s1067_s21, %s1066_s23  ;;  %335 = sbr.rel (%p1071_p12) target bundleno = 49 (0x31), region = 59 }
  0x28   : > { %s1068_s29 = sshll.u32 %s306_s28, 2 }
  0x29   : > { %s1624_s12 = scalar_lea.vmem %s1809_s1, %s1068_s29 }
  0x2c   : > { %v1529_v4 = vmov 0.0  }
  0x2d   : > { %336 = vst [vmem:[#allocation2 + $0x10] sm:$0xff] %v1529_v4 }
  0x2e   : > { %337 = vst [vmem:[#allocation2] sm:$0xff] %v1529_v4 }
  0x2f   : > { %338 = vst [vmem:[#allocation2 + $0x18] sm:$0xff] %v1529_v4 }
  0x30   : > { %339 = vst [vmem:[#allocation2 + $0x8] sm:$0xff] %v1529_v4 }
  0x31 PF: > { %v1146_v5 = vld [vmem:[%s1624_s12 + $0x70] sm:$0xf]  ;;  %v1367_v6 = vld [vmem:[%s1624_s12 + $0x74] sm:$0xf0]  ;;  %v1138_v16 = vld [vmem:[%s1624_s12 + $0x60] sm:$0xf] }
  0x32   : > { %v1210_v7 = vld [vmem:[%s1624_s12 + $0xf0] sm:$0xf]  ;;  %v1147_v8 = vor.u32 %v1367_v6, %v1146_v5  ;;  %v1383_v9 = vld [vmem:[%s1624_s12 + $0xf4] sm:$0xf0]  ;;  %v1365_v18 = vld [vmem:[%s1624_s12 + $0x64] sm:$0xf0] }
  0x33   : > { %v1274_v10 = vld [vmem:[%s1624_s12 + $0x170] sm:$0xf]  ;;  %v1399_v11 = vld [vmem:[%s1624_s12 + $0x174] sm:$0xf0]  ;;  %v1211_v12 = vor.u32 %v1383_v9, %v1210_v7  ;;  %v1202_v19 = vld [vmem:[%s1624_s12 + $0xe0] sm:$0xf]  ;;  %v1139_v21 = vor.u32 %v1365_v18, %v1138_v16 }
  0x34   : > { %v1275_v13 = vor.u32 %v1399_v11, %v1274_v10  ;;  %v1338_v14 = vld [vmem:[%s1624_s12 + $0x1f0] sm:$0xf]  ;;  %v1415_v15 = vld [vmem:[%s1624_s12 + $0x1f4] sm:$0xf0]  ;;  %752 = vmatpush.bf16.msra.mxu0 %v1147_v8  ;;  %v1381_v20 = vld [vmem:[%s1624_s12 + $0xe4] sm:$0xf0] }
  0x35   : > { %v1339_v17 = vor.u32 %v1415_v15, %v1338_v14  ;;  %766 = vmatpush.bf16.msra.mxu1 %v1211_v12  ;;  %v1203_v22 = vor.u32 %v1381_v20, %v1202_v19  ;;  %v1266_v23 = vld [vmem:[%s1624_s12 + $0x160] sm:$0xf]  ;;  %v1397_v24 = vld [vmem:[%s1624_s12 + $0x164] sm:$0xf0]  ;;  %v1130_v28 = vld [vmem:[%s1624_s12 + $0x50] sm:$0xf] }
  0x36   : > { %780 = vmatpush.bf16.msra.mxu2 %v1275_v13  ;;  %v1330_v25 = vld [vmem:[%s1624_s12 + $0x1e0] sm:$0xf]  ;;  %v1267_v26 = vor.u32 %v1397_v24, %v1266_v23  ;;  %v1413_v27 = vld [vmem:[%s1624_s12 + $0x1e4] sm:$0xf0]  ;;  %v1363_v29 = vld [vmem:[%s1624_s12 + $0x54] sm:$0xf0] }
  0x37   : > { %794 = vmatpush.bf16.msra.mxu3 %v1339_v17  ;;  %v1331_v30 = vor.u32 %v1413_v27, %v1330_v25  ;;  %v1194_v31 = vld [vmem:[%s1624_s12 + $0xd0] sm:$0xf]  ;;  %v1379_v32 = vld [vmem:[%s1624_s12 + $0xd4] sm:$0xf0]  ;;  %v1131_v34 = vor.u32 %v1363_v29, %v1130_v28  ;;  %v1122_v40 = vld [vmem:[%s1624_s12 + $0x40] sm:$0xf] }
  0x38   : > { %v1258_v33 = vld [vmem:[%s1624_s12 + $0x150] sm:$0xf]  ;;  %753 = vmatpush.bf16.msra.mxu0 %v1139_v21  ;;  %v1395_v35 = vld [vmem:[%s1624_s12 + $0x154] sm:$0xf0]  ;;  %v1195_v38 = vor.u32 %v1379_v32, %v1194_v31  ;;  %v1361_v41 = vld [vmem:[%s1624_s12 + $0x44] sm:$0xf0] }
  0x39   : > { %v1322_v36 = vld [vmem:[%s1624_s12 + $0x1d0] sm:$0xf]  ;;  %v1411_v37 = vld [vmem:[%s1624_s12 + $0x1d4] sm:$0xf0]  ;;  %767 = vmatpush.bf16.msra.mxu1 %v1203_v22  ;;  %v1259_v39 = vor.u32 %v1395_v35, %v1258_v33  ;;  %v1186_v42 = vld [vmem:[%s1624_s12 + $0xc0] sm:$0xf]  ;;  %v1123_v49 = vor.u32 %v1361_v41, %v1122_v40 }
  0x3a   : > { %781 = vmatpush.bf16.msra.mxu2 %v1267_v26  ;;  %v1323_v43 = vor.u32 %v1411_v37, %v1322_v36  ;;  %v1377_v44 = vld [vmem:[%s1624_s12 + $0xc4] sm:$0xf0]  ;;  %v1250_v45 = vld [vmem:[%s1624_s12 + $0x140] sm:$0xf]  ;;  %v1114_v52 = vld [vmem:[%s1624_s12 + $0x30] sm:$0xf] }
  0x3b   : > { %795 = vmatpush.bf16.msra.mxu3 %v1331_v30  ;;  %v1393_v46 = vld [vmem:[%s1624_s12 + $0x144] sm:$0xf0]  ;;  %v1314_v47 = vld [vmem:[%s1624_s12 + $0x1c0] sm:$0xf]  ;;  %v1187_v50 = vor.u32 %v1377_v44, %v1186_v42  ;;  %v1359_v53 = vld [vmem:[%s1624_s12 + $0x34] sm:$0xf0] }
  0x3c   : > { %v1409_v48 = vld [vmem:[%s1624_s12 + $0x1c4] sm:$0xf0]  ;;  %754 = vmatpush.bf16.msra.mxu0 %v1131_v34  ;;  %v1251_v51 = vor.u32 %v1393_v46, %v1250_v45  ;;  %v1178_v54 = vld [vmem:[%s1624_s12 + $0xb0] sm:$0xf]  ;;  %v1375_v56 = vld [vmem:[%s1624_s12 + $0xb4] sm:$0xf0]  ;;  %v1115_v61 = vor.u32 %v1359_v53, %v1114_v52 }
  0x3d   : > { %768 = vmatpush.bf16.msra.mxu1 %v1195_v38  ;;  %v1315_v55 = vor.u32 %v1409_v48, %v1314_v47  ;;  %v1242_v57 = vld [vmem:[%s1624_s12 + $0x130] sm:$0xf]  ;;  %v1391_v58 = vld [vmem:[%s1624_s12 + $0x134] sm:$0xf0]  ;;  %v1179_v62 = vor.u32 %v1375_v56, %v1178_v54  ;;  %v1106_v0 = vld [vmem:[%s1624_s12 + $0x20] sm:$0xf] }
  0x3e   : > { %782 = vmatpush.bf16.msra.mxu2 %v1259_v39  ;;  %v1306_v59 = vld [vmem:[%s1624_s12 + $0x1b0] sm:$0xf]  ;;  %v1407_v60 = vld [vmem:[%s1624_s12 + $0x1b4] sm:$0xf0]  ;;  %v1243_v63 = vor.u32 %v1391_v58, %v1242_v57  ;;  %v1357_v1 = vld [vmem:[%s1624_s12 + $0x24] sm:$0xf0] }
  0x3f   : > { %796 = vmatpush.bf16.msra.mxu3 %v1323_v43  ;;  %v1170_v2 = vld [vmem:[%s1624_s12 + $0xa0] sm:$0xf]  ;;  %v1307_v3 = vor.u32 %v1407_v60, %v1306_v59  ;;  %v1373_v4 = vld [vmem:[%s1624_s12 + $0xa4] sm:$0xf0]  ;;  %v1107_v9 = vor.u32 %v1357_v1, %v1106_v0  ;;  %v1098_v12 = vld [vmem:[%s1624_s12 + $0x10] sm:$0xf] }
  0x40   : > { %755 = vmatpush.bf16.msra.mxu0 %v1123_v49  ;;  %v1234_v5 = vld [vmem:[%s1624_s12 + $0x120] sm:$0xf]  ;;  %v1389_v6 = vld [vmem:[%s1624_s12 + $0x124] sm:$0xf0]  ;;  %v1171_v10 = vor.u32 %v1373_v4, %v1170_v2  ;;  %v1355_v13 = vld [vmem:[%s1624_s12 + $0x14] sm:$0xf0] }
  0x41   : > { %769 = vmatpush.bf16.msra.mxu1 %v1187_v50  ;;  %v1298_v7 = vld [vmem:[%s1624_s12 + $0x1a0] sm:$0xf]  ;;  %v1405_v8 = vld [vmem:[%s1624_s12 + $0x1a4] sm:$0xf0]  ;;  %v1235_v11 = vor.u32 %v1389_v6, %v1234_v5  ;;  %v1162_v14 = vld [vmem:[%s1624_s12 + $0x90] sm:$0xf]  ;;  %v1099_v22 = vor.u32 %v1355_v13, %v1098_v12 }
  0x42   : > { %783 = vmatpush.bf16.msra.mxu2 %v1251_v51  ;;  %v1299_v15 = vor.u32 %v1405_v8, %v1298_v7  ;;  %v1371_v16 = vld [vmem:[%s1624_s12 + $0x94] sm:$0xf0]  ;;  %v1226_v17 = vld [vmem:[%s1624_s12 + $0x110] sm:$0xf]  ;;  %v1090_v21 = vld [vmem:[%s1624_s12] sm:$0xf] }
  0x43   : > { %797 = vmatpush.bf16.msra.mxu3 %v1315_v55  ;;  %v1387_v18 = vld [vmem:[%s1624_s12 + $0x114] sm:$0xf0]  ;;  %v1290_v19 = vld [vmem:[%s1624_s12 + $0x190] sm:$0xf]  ;;  %v1353_v23 = vld [vmem:[%s1624_s12 + $0x4] sm:$0xf0]  ;;  %v1163_v26 = vor.u32 %v1371_v16, %v1162_v14 }
  0x44   : > { %756 = vmatpush.bf16.msra.mxu0 %v1115_v61  ;;  %v1403_v20 = vld [vmem:[%s1624_s12 + $0x194] sm:$0xf0]  ;;  %v1154_v24 = vld [vmem:[%s1624_s12 + $0x80] sm:$0xf]  ;;  %v1369_v25 = vld [vmem:[%s1624_s12 + $0x84] sm:$0xf0]  ;;  %v1227_v27 = vor.u32 %v1387_v18, %v1226_v17  ;;  %v1091_v38 = vor.u32 %v1353_v23, %v1090_v21 }
  0x45   : > { %770 = vmatpush.bf16.msra.mxu1 %v1179_v62  ;;  %v1218_v28 = vld [vmem:[%s1624_s12 + $0x100] sm:$0xf]  ;;  %v1385_v29 = vld [vmem:[%s1624_s12 + $0x104] sm:$0xf0]  ;;  %v1291_v31 = vor.u32 %v1403_v20, %v1290_v19  ;;  %v1366_v33 = vld [vmem:[%s1624_s12 + $0x74] sm:$0xf]  ;;  %v1155_v42 = vor.u32 %v1369_v25, %v1154_v24 }
  0x46   : > { %784 = vmatpush.bf16.msra.mxu2 %v1243_v63  ;;  %v1282_v30 = vld [vmem:[%s1624_s12 + $0x180] sm:$0xf]  ;;  %v1401_v32 = vld [vmem:[%s1624_s12 + $0x184] sm:$0xf0]  ;;  %v1148_v34 = vld [vmem:[%s1624_s12 + $0x78] sm:$0xf0]  ;;  %v1219_v43 = vor.u32 %v1385_v29, %v1218_v28 }
  0x47   : > { %798 = vmatpush.bf16.msra.mxu3 %v1307_v3  ;;  %v1382_v35 = vld [vmem:[%s1624_s12 + $0xf4] sm:$0xf]  ;;  %v1212_v36 = vld [vmem:[%s1624_s12 + $0xf8] sm:$0xf0]  ;;  %v1364_v44 = vld [vmem:[%s1624_s12 + $0x64] sm:$0xf]  ;;  %v1283_v48 = vor.u32 %v1401_v32, %v1282_v30  ;;  %v1151_v49 = vor.u32 %v1366_v33, %v1148_v34 }
  0x48   : > { %757 = vmatpush.bf16.msra.mxu0 %v1107_v9  ;;  %v1398_v37 = vld [vmem:[%s1624_s12 + $0x174] sm:$0xf]  ;;  %v1276_v39 = vld [vmem:[%s1624_s12 + $0x178] sm:$0xf0]  ;;  %v1140_v45 = vld [vmem:[%s1624_s12 + $0x68] sm:$0xf0]  ;;  %v1215_v54 = vor.u32 %v1382_v35, %v1212_v36 }
  0x49   : > { %771 = vmatpush.bf16.msra.mxu1 %v1171_v10  ;;  %v1414_v40 = vld [vmem:[%s1624_s12 + $0x1f4] sm:$0xf]  ;;  %v1340_v41 = vld [vmem:[%s1624_s12 + $0x1f8] sm:$0xf0]  ;;  %v1082_v46 = vld [vmem:[%s1626_s5 + $0x8] sm:$0xf]  ;;  %v1279_v55 = vor.u32 %v1398_v37, %v1276_v39  ;;  %v1143_v4 = vor.u32 %v1364_v44, %v1140_v45 }
  0x4a   : > { %785 = vmatpush.bf16.msra.mxu2 %v1235_v11  ;;  %v1351_v47 = vld [vmem:[%s1626_s5 + $0x14] sm:$0xf0]  ;;  %v1380_v50 = vld [vmem:[%s1624_s12 + $0xe4] sm:$0xf]  ;;  %v1204_v51 = vld [vmem:[%s1624_s12 + $0xe8] sm:$0xf0]  ;;  %v1343_v59 = vor.u32 %v1414_v40, %v1340_v41 }
  0x4b   : > { %799 = vmatpush.bf16.msra.mxu3 %v1299_v15  ;;  %v1396_v52 = vld [vmem:[%s1624_s12 + $0x164] sm:$0xf]  ;;  %v1268_v53 = vld [vmem:[%s1624_s12 + $0x168] sm:$0xf0]  ;;  %v1084_v57 = vld [vmem:[%s1626_s5 + $0x18] sm:$0xf0]  ;;  %v1712_v60 = vor.u32 %v1351_v47, %v1082_v46  ;;  %v1207_v6 = vor.u32 %v1380_v50, %v1204_v51 }
  0x4c   : > { %758 = vmatpush.bf16.msra.mxu0 %v1099_v22  ;;  %v1349_v56 = vld [vmem:[%s1626_s5 + $0xc] sm:$0xf]  ;;  %v1074_v58 = vld [vmem:[%s1626_s5] sm:$0xf]  ;;  %v1350_v61 = vld [vmem:[%s1626_s5 + $0xc] sm:$0xf0]  ;;  %v1271_v7 = vor.u32 %v1396_v52, %v1268_v53 }
  0x4d   : > { %772 = vmatpush.bf16.msra.mxu1 %v1163_v26  ;;  %v1348_v62 = vld [vmem:[%s1626_s5 + $0x4] sm:$0xf]  ;;  %v1076_v63 = vld [vmem:[%s1626_s5 + $0x10] sm:$0xf0]  ;;  %v1332_v1 = vld [vmem:[%s1624_s12 + $0x1e8] sm:$0xf0]  ;;  %v1719_v2 = vor.u32 %v1349_v56, %v1084_v57  ;;  %v1721_v3 = vor.u32 %v1350_v61, %v1074_v58 }
  0x4e   : > { %786 = vmatpush.bf16.msra.mxu2 %v1227_v27  ;;  %v1412_v0 = vld [vmem:[%s1624_s12 + $0x1e4] sm:$0xf]  ;;  %v1723_v5 = vor.u32 %v1348_v62, %v1076_v63  ;;  %v1362_v8 = vld [vmem:[%s1624_s12 + $0x54] sm:$0xf]  ;;  %v1132_v9 = vld [vmem:[%s1624_s12 + $0x58] sm:$0xf0] }
  0x4f   : > { %800 = vmatpush.bf16.msra.mxu3 %v1291_v31  ;;  %v1378_v10 = vld [vmem:[%s1624_s12 + $0xd4] sm:$0xf]  ;;  %v1335_v11 = vor.u32 %v1412_v0, %v1332_v1  ;;  %v1196_v12 = vld [vmem:[%s1624_s12 + $0xd8] sm:$0xf0]  ;;  %v1135_v17 = vor.u32 %v1362_v8, %v1132_v9  ;;  %v1360_v20 = vld [vmem:[%s1624_s12 + $0x44] sm:$0xf] }
  0x50   : > { %759 = vmatpush.bf16.msra.mxu0 %v1091_v38  ;;  %v1394_v13 = vld [vmem:[%s1624_s12 + $0x154] sm:$0xf]  ;;  %v1260_v14 = vld [vmem:[%s1624_s12 + $0x158] sm:$0xf0]  ;;  %v1199_v18 = vor.u32 %v1378_v10, %v1196_v12  ;;  %v1124_v21 = vld [vmem:[%s1624_s12 + $0x48] sm:$0xf0] }
  0x51   : > { %773 = vmatpush.bf16.msra.mxu1 %v1155_v42  ;;  %v1410_v15 = vld [vmem:[%s1624_s12 + $0x1d4] sm:$0xf]  ;;  %v1324_v16 = vld [vmem:[%s1624_s12 + $0x1d8] sm:$0xf0]  ;;  %v1263_v19 = vor.u32 %v1394_v13, %v1260_v14  ;;  %v1376_v22 = vld [vmem:[%s1624_s12 + $0xc4] sm:$0xf]  ;;  %v1127_v29 = vor.u32 %v1360_v20, %v1124_v21 }
  0x52   : > { %787 = vmatpush.bf16.msra.mxu2 %v1219_v43  ;;  %v1327_v23 = vor.u32 %v1410_v15, %v1324_v16  ;;  %v1188_v24 = vld [vmem:[%s1624_s12 + $0xc8] sm:$0xf0]  ;;  %v1392_v25 = vld [vmem:[%s1624_s12 + $0x144] sm:$0xf]  ;;  %v1358_v32 = vld [vmem:[%s1624_s12 + $0x34] sm:$0xf] }
  0x53   : > { %801 = vmatpush.bf16.msra.mxu3 %v1283_v48  ;;  %760 = vmatmul.bf16.vlgmr.msra.gmra.mxu0 %v1721_v3  ;;  %v1252_v26 = vld [vmem:[%s1624_s12 + $0x148] sm:$0xf0]  ;;  %v1408_v27 = vld [vmem:[%s1624_s12 + $0x1c4] sm:$0xf]  ;;  %v1191_v30 = vor.u32 %v1376_v22, %v1188_v24  ;;  %v1116_v33 = vld [vmem:[%s1624_s12 + $0x38] sm:$0xf0] }
  0x54   : > { %808 = vmatpush.bf16.msrb.mxu0 %v1151_v49  ;;  %774 = vmatmul.bf16.vlgmr.msra.gmra.mxu1 %v1723_v5  ;;  %v1316_v28 = vld [vmem:[%s1624_s12 + $0x1c8] sm:$0xf0]  ;;  %v1255_v31 = vor.u32 %v1392_v25, %v1252_v26  ;;  %v1374_v34 = vld [vmem:[%s1624_s12 + $0xb4] sm:$0xf]  ;;  %v1180_v36 = vld [vmem:[%s1624_s12 + $0xb8] sm:$0xf0]  ;;  %v1119_v41 = vor.u32 %v1358_v32, %v1116_v33 }
  0x55   : > { %822 = vmatpush.bf16.msrb.mxu1 %v1215_v54  ;;  %788 = vmatmul.bf16.vlgmr.msra.gmra.mxu2 %v1712_v60  ;;  %v1319_v35 = vor.u32 %v1408_v27, %v1316_v28  ;;  %v1390_v37 = vld [vmem:[%s1624_s12 + $0x134] sm:$0xf]  ;;  %v1244_v38 = vld [vmem:[%s1624_s12 + $0x138] sm:$0xf0]  ;;  %v1183_v42 = vor.u32 %v1374_v34, %v1180_v36  ;;  %v1356_v44 = vld [vmem:[%s1624_s12 + $0x24] sm:$0xf] }
  0x56   : > { %836 = vmatpush.bf16.msrb.mxu2 %v1279_v55  ;;  %802 = vmatmul.bf16.vlgmr.msra.gmra.mxu3 %v1719_v2  ;;  %v1406_v39 = vld [vmem:[%s1624_s12 + $0x1b4] sm:$0xf]  ;;  %v1308_v40 = vld [vmem:[%s1624_s12 + $0x1b8] sm:$0xf0]  ;;  %v1247_v43 = vor.u32 %v1390_v37, %v1244_v38  ;;  %v1108_v45 = vld [vmem:[%s1624_s12 + $0x28] sm:$0xf0] }
  0x57   : > { %850 = vmatpush.bf16.msrb.mxu3 %v1343_v59  ;;  %v1372_v46 = vld [vmem:[%s1624_s12 + $0xa4] sm:$0xf]  ;;  %v1311_v47 = vor.u32 %v1406_v39, %v1308_v40  ;;  %v1172_v48 = vld [vmem:[%s1624_s12 + $0xa8] sm:$0xf0]  ;;  %v1111_v53 = vor.u32 %v1356_v44, %v1108_v45  ;;  %v1354_v56 = vld [vmem:[%s1624_s12 + $0x14] sm:$0xf] }
  0x58   : > { %809 = vmatpush.bf16.msrb.mxu0 %v1143_v4  ;;  %v1388_v49 = vld [vmem:[%s1624_s12 + $0x124] sm:$0xf]  ;;  %v1236_v50 = vld [vmem:[%s1624_s12 + $0x128] sm:$0xf0]  ;;  %v1175_v54 = vor.u32 %v1372_v46, %v1172_v48  ;;  %v1100_v57 = vld [vmem:[%s1624_s12 + $0x18] sm:$0xf0] }
  0x59   : > { %823 = vmatpush.bf16.msrb.mxu1 %v1207_v6  ;;  %v1404_v51 = vld [vmem:[%s1624_s12 + $0x1a4] sm:$0xf]  ;;  %v1300_v52 = vld [vmem:[%s1624_s12 + $0x1a8] sm:$0xf0]  ;;  %v1239_v55 = vor.u32 %v1388_v49, %v1236_v50  ;;  %v1370_v58 = vld [vmem:[%s1624_s12 + $0x94] sm:$0xf]  ;;  %v1103_v4 = vor.u32 %v1354_v56, %v1100_v57 }
  0x5a   : > { %837 = vmatpush.bf16.msrb.mxu2 %v1271_v7  ;;  %v1303_v59 = vor.u32 %v1404_v51, %v1300_v52  ;;  %v1164_v61 = vld [vmem:[%s1624_s12 + $0x98] sm:$0xf0]  ;;  %v1386_v62 = vld [vmem:[%s1624_s12 + $0x114] sm:$0xf]  ;;  %v1352_v8 = vld [vmem:[%s1624_s12 + $0x4] sm:$0xf] }
  0x5b   : > { %851 = vmatpush.bf16.msrb.mxu3 %v1335_v11  ;;  %v1228_v63 = vld [vmem:[%s1624_s12 + $0x118] sm:$0xf0]  ;;  %v1402_v0 = vld [vmem:[%s1624_s12 + $0x194] sm:$0xf]  ;;  %v1167_v6 = vor.u32 %v1370_v58, %v1164_v61  ;;  %v1092_v9 = vld [vmem:[%s1624_s12 + $0x8] sm:$0xf0] }
  0x5c   : > { %810 = vmatpush.bf16.msrb.mxu0 %v1135_v17  ;;  %v1292_v1 = vld [vmem:[%s1624_s12 + $0x198] sm:$0xf0]  ;;  %v1231_v7 = vor.u32 %v1386_v62, %v1228_v63  ;;  %v1368_v10 = vld [vmem:[%s1624_s12 + $0x84] sm:$0xf]  ;;  %v1156_v12 = vld [vmem:[%s1624_s12 + $0x88] sm:$0xf0]  ;;  %v1095_v17 = vor.u32 %v1352_v8, %v1092_v9 }
  0x5d   : > { %824 = vmatpush.bf16.msrb.mxu1 %v1199_v18  ;;  %v1295_v11 = vor.u32 %v1402_v0, %v1292_v1  ;;  %v1384_v13 = vld [vmem:[%s1624_s12 + $0x104] sm:$0xf]  ;;  %v1220_v14 = vld [vmem:[%s1624_s12 + $0x108] sm:$0xf0]  ;;  %v1159_v18 = vor.u32 %v1368_v10, %v1156_v12  ;;  %v340_v27 = vld [vmem:[#allocation2 + $0x10] sm:$0xff]  ;;  %p1344_p13 = scmp.ne.s32.totalorder %s1511_s14, 3 }
  0x5e   : > { %838 = vmatpush.bf16.msrb.mxu2 %v1263_v19  ;;  %v1400_v15 = vld [vmem:[%s1624_s12 + $0x184] sm:$0xf]  ;;  %v1284_v16 = vld [vmem:[%s1624_s12 + $0x188] sm:$0xf0]  ;;  %v1223_v19 = vor.u32 %v1384_v13, %v1220_v14  ;;  %v342_v34 = vld [vmem:[#allocation2 + $0x18] sm:$0xff] }
  0x5f   : > { %852 = vmatpush.bf16.msrb.mxu3 %v1327_v23  ;;  %v1287_v20 = vor.u32 %v1400_v15, %v1284_v16  ;;  %v343_v49 = vld [vmem:[#allocation2 + $0x8] sm:$0xff] }
  0x60   : > { %811 = vmatpush.bf16.msrb.mxu0 %v1127_v29 }
  0x61   : > { %825 = vmatpush.bf16.msrb.mxu1 %v1191_v30 }
  0x62   : > { %839 = vmatpush.bf16.msrb.mxu2 %v1255_v31 }
  0x63   : > { %853 = vmatpush.bf16.msrb.mxu3 %v1319_v35 }
  0x64   : > { %812 = vmatpush.bf16.msrb.mxu0 %v1119_v41  ;;  %v341_v41 = vld [vmem:[#allocation2] sm:$0xff] }
  0x65   : > { %826 = vmatpush.bf16.msrb.mxu1 %v1183_v42 }
  0x66   : > { %840 = vmatpush.bf16.msrb.mxu2 %v1247_v43 }
  0x67   : > { %854 = vmatpush.bf16.msrb.mxu3 %v1311_v47 }
  0x68   : > { %813 = vmatpush.bf16.msrb.mxu0 %v1111_v53 }
  0x69   : > { %827 = vmatpush.bf16.msrb.mxu1 %v1175_v54 }
  0x6a   : > { %841 = vmatpush.bf16.msrb.mxu2 %v1239_v55 }
  0x6b   : > { %855 = vmatpush.bf16.msrb.mxu3 %v1303_v59 }
  0x6c   : > { %814 = vmatpush.bf16.msrb.mxu0 %v1103_v4 }
  0x6d   : > { %828 = vmatpush.bf16.msrb.mxu1 %v1167_v6 }
  0x6e   : > { %842 = vmatpush.bf16.msrb.mxu2 %v1231_v7 }
  0x6f   : > { %856 = vmatpush.bf16.msrb.mxu3 %v1295_v11 }
  0x70   : > { %815 = vmatpush.bf16.msrb.mxu0 %v1095_v17 }
  0x71   : > { %829 = vmatpush.bf16.msrb.mxu1 %v1159_v18 }
  0x72   : > { %843 = vmatpush.bf16.msrb.mxu2 %v1223_v19 }
  0x73   : > { %857 = vmatpush.bf16.msrb.mxu3 %v1287_v20  ;;  %816 = vmatmul.bf16.vlgmr.msrb.gmra.mxu0 %v1721_v3 }
  0x74   : > { %830 = vmatmul.bf16.vlgmr.msrb.gmra.mxu1 %v1723_v5 }
  0x75   : > { %844 = vmatmul.bf16.vlgmr.msrb.gmra.mxu2 %v1712_v60 }
  0x76   : > { %858 = vmatmul.bf16.vlgmr.msrb.gmra.mxu3 %v1719_v2 }
  0xd0   : > { %v761_v21 = vpop.f32.mrf.mxu0 }
  0xd1   : > { %v775_v22 = vpop.f32.mrf.mxu1 }
  0xd2   : > { %v776_v23 = vadd.f32 %v775_v22, %v761_v21 }
  0xd8   : > { %v789_v24 = vpop.f32.mrf.mxu2  ;;  %v763_v29 = vpop.f32.mrf.mxu0 }
  0xd9   : > { %v790_v25 = vadd.f32 %v789_v24, %v776_v23  ;;  %v803_v26 = vpop.f32.mrf.mxu3  ;;  %v777_v30 = vpop.f32.mrf.mxu1 }
  0xda   : > { %v778_v32 = vadd.f32 %v777_v30, %v763_v29 }
  0xdb   : > { %v804_v28 = vadd.f32 %v803_v26, %v790_v25 }
  0xdd   : > { %v864_v31 = vadd.f32 %v804_v28, %v340_v27 }
  0xdf   : > { %868 = vst [vmem:[#allocation2 + $0x10] sm:$0xff] %v864_v31 }
  0xe0   : > { %v791_v3 = vpop.f32.mrf.mxu2 }
  0xe1   : > { %v792_v33 = vadd.f32 %v791_v3, %v778_v32  ;;  %v805_v5 = vpop.f32.mrf.mxu3 }
  0xe3   : > { %v806_v60 = vadd.f32 %v805_v5, %v792_v33 }
  0xe5   : > { %v866_v35 = vadd.f32 %v806_v60, %v342_v34 }
  0xe7   : > { %870 = vst [vmem:[#allocation2 + $0x18] sm:$0xff] %v866_v35 }
  0xf0   : > { %v817_v2 = vpop.f32.mrf.mxu0 }
  0xf1   : > { %v831_v36 = vpop.f32.mrf.mxu1 }
  0xf2   : > { %v832_v37 = vadd.f32 %v831_v36, %v817_v2 }
  0xf8   : > { %v845_v38 = vpop.f32.mrf.mxu2  ;;  %v819_v43 = vpop.f32.mrf.mxu0 }
  0xf9   : > { %v846_v39 = vadd.f32 %v845_v38, %v832_v37  ;;  %v859_v40 = vpop.f32.mrf.mxu3  ;;  %v833_v44 = vpop.f32.mrf.mxu1 }
  0xfa   : > { %v834_v46 = vadd.f32 %v833_v44, %v819_v43 }
  0xfb   : > { %v860_v42 = vadd.f32 %v859_v40, %v846_v39 }
  0xfd   : > { %v865_v45 = vadd.f32 %v860_v42, %v341_v41 }
  0xff   : > { %869 = vst [vmem:[#allocation2] sm:$0xff] %v865_v45 }
 0x100   : > { %v847_v47 = vpop.f32.mrf.mxu2 }
 0x101   : > { %v848_v48 = vadd.f32 %v847_v47, %v834_v46  ;;  %v861_v50 = vpop.f32.mrf.mxu3 }
 0x103   : > { %v862_v51 = vadd.f32 %v861_v50, %v848_v48  ;;  %875 = sbr.rel (%p1344_p13) target bundleno = 278 (0x116), region = 63 }
 0x105   : > { %v867_v52 = vadd.f32 %v862_v51, %v343_v49 }
 0x107   : > { %871 = vst [vmem:[#allocation2 + $0x8] sm:$0xff] %v867_v52 }
 0x108   : > { %v876_v53 = vld [vmem:[#allocation2 + $0x10] sm:$0xff]  ;;  %v877_v54 = vld [vmem:[#allocation2] sm:$0xff]  ;;  %v878_v58 = vld [vmem:[#allocation2 + $0x18] sm:$0xff] }
 0x109   : > { %v880_v55 = vld [vmem:[%s1810_s2] sm:$0x3] }
 0x10a   : > { %v882_v56 = vperm.slane %v880_v55, 0  ;;  %v883_v57 = vperm.slane %v880_v55, 1 }
 0x10c   : > { %v886_v61 = vadd.f32 %v882_v56, %v876_v53  ;;  %v887_v62 = vadd.f32 %v883_v57, %v877_v54  ;;  %v888_v63 = vadd.f32 %v882_v56, %v878_v58 }
 0x10e   : > { %v879_v59 = vld [vmem:[#allocation2 + $0x8] sm:$0xff]  ;;  %v890_v1 = vmax.f32 %v886_v61, 0.0  ;;  %v891_v4 = vmax.f32 %v887_v62, 0.0  ;;  %v892_v6 = vmax.f32 %v888_v63, 0.0 }
 0x10f   : > { %v889_v0 = vadd.f32 %v883_v57, %v879_v59 }
 0x110   : > { %v894_v8 = vpack.c.bf16 %v891_v4, %v890_v1 }
 0x111   : > { %v893_v7 = vmax.f32 %v889_v0, 0.0 }
 0x112   : > { %896 = vst [vmem:[%s1619_s27] sm:$0xff] %v894_v8 }
 0x113   : > { %v895_v9 = vpack.c.bf16 %v893_v7, %v892_v6 }
 0x115   : > { %897 = vst [vmem:[%s1619_s27 + $0x8] sm:$0xff] %v895_v9 }
 0x116 PF: > { %s13_s18 = sadd.s32 1, %s1527_s18   ;;  %s1812_s12 = smov %s1507_s13 }
 0x117   : > { %p10_p0 = scmp.ge.s32.totalorder %s13_s18, 18   ;;  %s1813_s13 = smov %s1601_s25 }
 0x118   : > { %s1814_s14 = smov %s1519_s16  ;;  %s1815_s15 = smov %s1523_s17 }
 0x119   : > { %s1816_s16 = smov %s1819_s19  ;;  %s1817_s17 = smov %s1823_s20 }
 0x11a   :  { %12 = sbr.rel (!%p10_p0) target bundleno = 4 (0x4), region = 104 }

// kernel: bidirectional_flow_estimator.13
= control target key start
LH: loop header
LB: loop body
LE: loop exit
PB: predicated region body
PF: predicated region fallthrough
CT: control target
= control target key end

     0   :  { %s1165_s12 = smov 0   ;;  %s1167_s13 = smov 0   ;;  %s1310_s0 = inlined_call_operand.vmem [shape: bf16[4,16,1024], index: 0, kind: input, shape index: {}]   ;;  %s1311_s1 = inlined_call_operand.vmem [shape: bf16[4,1024,128], index: 1, kind: input, shape index: {}]   ;;  %s1312_s2 = inlined_call_operand.vmem [shape: f32[1,128], index: 2, kind: input, shape index: {}]   ;;  %s1313_s3 = inlined_call_operand.vmem [shape: bf16[4,16,128], index: 3, kind: output, shape index: {}]  }
   0x1   :  { %s1169_s14 = smov 0   ;;  %s1171_s15 = smov 0  }
   0x2   :  { %s1173_s16 = smov 0   ;;  %s1175_s17 = smov 0  }
   0x3   :  { %s1177_s18 = smov 0  }
   0x4 LB: > { %s28_s19 = sadd.s32 1, %s1134_s16  ;;  %s39_s20 = sadd.s32 1, %s1138_s17  ;;  %s1142_s18 = sphi %s1177_s18, %s13_s18   ;;  %s1138_s17 = sphi %s1175_s17, %s1319_s17   ;;  %s1134_s16 = sphi %s1173_s16, %s1318_s16   ;;  %s1130_s15 = sphi %s1171_s15, %s1317_s15   ;;  %s1126_s14 = sphi %s1169_s14, %s1316_s14   ;;  %s1122_s13 = sphi %s1167_s13, %s1315_s13   ;;  %s1118_s12 = sphi %s1165_s12, %s1314_s12  }
   0x5   : > { %p29_p0 = scmp.ge.s32.totalorder %s28_s19, 2  ;;  %p57_p1 = scmp.ne.s32.totalorder %s1122_s13, %s1118_s12 }
   0x6   : > { %p58_p2 = scmp.eq.s32.totalorder %s1142_s18, 0  ;;  %s50_s24 = sadd.s32 1, %s1122_s13 }
   0x7   : > { %s1321_s19 = smov (%p29_p0, %s28_s19), 0  ;;  %s1323_s20 = smov (!%p29_p0, %s39_s20), %s1138_s17 }
   0x8   : > { %p59_p3 = por %p58_p2, %p57_p1  ;;  %p41_p4 = scmp.ge.s32.totalorder %s1323_s20, 4 }
   0x9   : > { %s46_s21 = ssub.s32 %s1134_s16, %s1321_s19  ;;  %p828_p6 = scmp.ge.s32.totalorder %s1142_s18, 8 }
   0xa   : > { %s1325_s20 = smov (%p41_p4, %s1323_s20), 0 }
   0xb   : > { %s43_s22 = ssub.s32 %s1138_s17, %s1325_s20  ;;  %175 = sbr.rel (%p828_p6) target bundleno = 27 (0x1b), region = 20 }
   0xc   : > { %s47_s23 = sor.u32 %s46_s21, %s43_s22 }
   0xd   : > { %p48_p5 = scmp.eq.s32.totalorder %s47_s23, 0 }
   0xf   : > { %s1216_s25 = scalar_select %p48_p5, %s1122_s13, %s50_s24  }
  0x10   : > { %178 = sbr.rel (!%p59_p3) target bundleno = 27 (0x1b), region = 24  ;;  %s180_s26 = sand.u32 (%p59_p3), 1, %s1122_s13  }
  0x11   : > { %s830_s27 = sshll.u32 (%p59_p3), %s1134_s16, 2  ;;  %s829_s28 = sshll.u32 (%p59_p3), %s180_s26, 5 }
  0x12   : > { %s831_s29 = sshll.u32 (%p59_p3), %s1138_s17, 4  ;;  %s182_s8 = scalar_lea.vmem (%p59_p3), [#allocation3], %s829_s28 }
  0x13   : > { %s188_s30 = sadd.s32 (%p59_p3), %s831_s29, %s830_s27 }
  0x14   : > { %s832_s4 = sshll.u32 (%p59_p3), %s188_s30, 2 }
  0x15   : > { %s190_s7 = scalar_lea.vmem %s1310_s0, %s832_s4 }
  0x16   : > { %v203_v0 = vld [vmem:[%s190_s7] sm:$0xff]  ;;  %v205_v1 = vld [vmem:[%s190_s7 + $0x8] sm:$0xff] }
  0x17   : > { %v207_v2 = vld [vmem:[%s190_s7 + $0x20] sm:$0xff]  ;;  %204 = vst [vmem:[%s182_s8] sm:$0xff] %v203_v0  ;;  %v209_v3 = vld [vmem:[%s190_s7 + $0x28] sm:$0xff] }
  0x18   : > { %206 = vst [vmem:[%s182_s8 + $0x8] sm:$0xff] %v205_v1 }
  0x19   : > { %208 = vst [vmem:[%s182_s8 + $0x10] sm:$0xff] %v207_v2 }
  0x1a   : > { %210 = vst [vmem:[%s182_s8 + $0x18] sm:$0xff] %v209_v3 }
  0x1b PF: > { %p833_p7 = scmp.ge.s32.totalorder %s1142_s18, 1  ;;  %p231_p8 = scmp.lt.s32.totalorder %s1142_s18, 9 }
  0x1d   : > { %p232_p9 = pnand %p833_p7, %p231_p8 }
  0x1e   : > { %s238_s9 = sand.u32 (!%p232_p9), 1, %s1118_s12   ;;  %s835_s10 = sshll.u32 (!%p232_p9), %s1126_s14, 6 }
  0x1f   : > { %235 = sbr.rel (%p232_p9) target bundleno = 242 (0xf2), region = 51  ;;  %s834_s11 = sshll.u32 (!%p232_p9), %s238_s9, 5 }
  0x20   : > { %p286_p10 = scmp.lt.s32.totalorder (!%p232_p9), %s1130_s15, 3  ;;  %p288_p11 = scmp.lt.s32.totalorder (!%p232_p9), %s835_s10, 127 }
  0x21   : > { %s1241_s12 = scalar_lea.vmem (!%p232_p9), [#allocation3], %s834_s11  ;;  %p840_p12 = scmp.ne.s32.totalorder (!%p232_p9), %s1126_s14, 0 }
  0x24   : > { %s1327_s15 = smov (!%p286_p10, %s1130_s15), 3  ;;  %s1329_s10 = smov (!%p288_p11, %s835_s10), 127 }
  0x25   : > { %s836_s21 = sshll.u32 %s1327_s15, 7  ;;  %s988_s22 = sshll.u32 %s1327_s15, 3 }
  0x26   : > { %s294_s23 = sadd.s32 %s836_s21, %s1329_s10  ;;  %s1234_s27 = scalar_lea.vmem %s1313_s3, %s988_s22 }
  0x27   : > { %s837_s28 = sshll.u32 %s294_s23, 2  ;;  %317 = sbr.rel (%p840_p12) target bundleno = 47 (0x2f), region = 59 }
  0x28   : > { %s1239_s4 = scalar_lea.vmem %s1311_s1, %s837_s28 }
  0x2c   : > { %v1144_v4 = vmov 0.0  }
  0x2d   : > { %318 = vst [vmem:[#allocation2] sm:$0xff] %v1144_v4 }
  0x2e   : > { %319 = vst [vmem:[#allocation2 + $0x8] sm:$0xff] %v1144_v4 }
  0x2f PF: > { %v1000_v5 = vld [vmem:[%s1239_s4 + $0x38] sm:$0xff]  ;;  %v999_v9 = vld [vmem:[%s1239_s4 + $0x30] sm:$0xff]  ;;  %v998_v13 = vld [vmem:[%s1239_s4 + $0x28] sm:$0xff]  ;;  %p985_p13 = scmp.ne.s32.totalorder %s1126_s14, 1 }
  0x30   : > { %v1008_v6 = vld [vmem:[%s1239_s4 + $0x78] sm:$0xff]  ;;  %602 = vmatpush.bf16.msra.mxu0 %v1000_v5  ;;  %v1007_v10 = vld [vmem:[%s1239_s4 + $0x70] sm:$0xff]  ;;  %v1006_v14 = vld [vmem:[%s1239_s4 + $0x68] sm:$0xff] }
  0x31   : > { %v1016_v7 = vld [vmem:[%s1239_s4 + $0xb8] sm:$0xff]  ;;  %616 = vmatpush.bf16.msra.mxu1 %v1008_v6  ;;  %v1015_v11 = vld [vmem:[%s1239_s4 + $0xb0] sm:$0xff]  ;;  %v1014_v15 = vld [vmem:[%s1239_s4 + $0xa8] sm:$0xff] }
  0x32   : > { %v1024_v8 = vld [vmem:[%s1239_s4 + $0xf8] sm:$0xff]  ;;  %630 = vmatpush.bf16.msra.mxu2 %v1016_v7  ;;  %v1023_v12 = vld [vmem:[%s1239_s4 + $0xf0] sm:$0xff]  ;;  %v1022_v16 = vld [vmem:[%s1239_s4 + $0xe8] sm:$0xff] }
  0x33   : > { %644 = vmatpush.bf16.msra.mxu3 %v1024_v8  ;;  %v997_v17 = vld [vmem:[%s1239_s4 + $0x20] sm:$0xff]  ;;  %v996_v21 = vld [vmem:[%s1239_s4 + $0x18] sm:$0xff]  ;;  %v995_v25 = vld [vmem:[%s1239_s4 + $0x10] sm:$0xff] }
  0x34   : > { %603 = vmatpush.bf16.msra.mxu0 %v999_v9  ;;  %v1005_v18 = vld [vmem:[%s1239_s4 + $0x60] sm:$0xff]  ;;  %v1004_v22 = vld [vmem:[%s1239_s4 + $0x58] sm:$0xff]  ;;  %v1003_v26 = vld [vmem:[%s1239_s4 + $0x50] sm:$0xff] }
  0x35   : > { %617 = vmatpush.bf16.msra.mxu1 %v1007_v10  ;;  %v1013_v19 = vld [vmem:[%s1239_s4 + $0xa0] sm:$0xff]  ;;  %v1012_v23 = vld [vmem:[%s1239_s4 + $0x98] sm:$0xff]  ;;  %v1011_v27 = vld [vmem:[%s1239_s4 + $0x90] sm:$0xff] }
  0x36   : > { %631 = vmatpush.bf16.msra.mxu2 %v1015_v11  ;;  %v1021_v20 = vld [vmem:[%s1239_s4 + $0xe0] sm:$0xff]  ;;  %v1020_v24 = vld [vmem:[%s1239_s4 + $0xd8] sm:$0xff]  ;;  %v1019_v28 = vld [vmem:[%s1239_s4 + $0xd0] sm:$0xff] }
  0x37   : > { %645 = vmatpush.bf16.msra.mxu3 %v1023_v12  ;;  %v994_v29 = vld [vmem:[%s1239_s4 + $0x8] sm:$0xff]  ;;  %v993_v33 = vld [vmem:[%s1239_s4] sm:$0xff]  ;;  %v843_v37 = vld [vmem:[%s1241_s12] sm:$0xf] }
  0x38   : > { %604 = vmatpush.bf16.msra.mxu0 %v998_v13  ;;  %v1002_v30 = vld [vmem:[%s1239_s4 + $0x48] sm:$0xff]  ;;  %v1001_v34 = vld [vmem:[%s1239_s4 + $0x40] sm:$0xff]  ;;  %v989_v39 = vld [vmem:[%s1241_s12 + $0x4] sm:$0xf] }
  0x39   : > { %618 = vmatpush.bf16.msra.mxu1 %v1006_v14  ;;  %v1010_v31 = vld [vmem:[%s1239_s4 + $0x88] sm:$0xff]  ;;  %v1009_v35 = vld [vmem:[%s1239_s4 + $0x80] sm:$0xff]  ;;  %v851_v41 = vld [vmem:[%s1241_s12 + $0x8] sm:$0xf] }
  0x3a   : > { %632 = vmatpush.bf16.msra.mxu2 %v1014_v15  ;;  %v1018_v32 = vld [vmem:[%s1239_s4 + $0xc8] sm:$0xff]  ;;  %v1017_v36 = vld [vmem:[%s1239_s4 + $0xc0] sm:$0xff]  ;;  %v990_v43 = vld [vmem:[%s1241_s12 + $0xc] sm:$0xf] }
  0x3b   : > { %646 = vmatpush.bf16.msra.mxu3 %v1022_v16  ;;  %v991_v38 = vld [vmem:[%s1241_s12 + $0xc] sm:$0xf0]  ;;  %v845_v40 = vld [vmem:[%s1241_s12 + $0x10] sm:$0xf0]  ;;  %v992_v42 = vld [vmem:[%s1241_s12 + $0x14] sm:$0xf0] }
  0x3c   : > { %605 = vmatpush.bf16.msra.mxu0 %v997_v17  ;;  %v853_v44 = vld [vmem:[%s1241_s12 + $0x18] sm:$0xf0]  ;;  %v844_v45 = vor.u32 %v991_v38, %v843_v37  ;;  %v848_v46 = vor.u32 %v989_v39, %v845_v40  ;;  %v852_v47 = vor.u32 %v992_v42, %v851_v41  ;;  %v320_v55 = vld [vmem:[#allocation2] sm:$0xff] }
  0x3d   : > { %619 = vmatpush.bf16.msra.mxu1 %v1005_v18  ;;  %v856_v48 = vor.u32 %v990_v43, %v853_v44  ;;  %v321_v63 = vld [vmem:[#allocation2 + $0x8] sm:$0xff] }
  0x3e   : > { %633 = vmatpush.bf16.msra.mxu2 %v1013_v19 }
  0x3f   : > { %647 = vmatpush.bf16.msra.mxu3 %v1021_v20 }
  0x40   : > { %606 = vmatpush.bf16.msra.mxu0 %v996_v21 }
  0x41   : > { %620 = vmatpush.bf16.msra.mxu1 %v1004_v22 }
  0x42   : > { %634 = vmatpush.bf16.msra.mxu2 %v1012_v23 }
  0x43   : > { %648 = vmatpush.bf16.msra.mxu3 %v1020_v24 }
  0x44   : > { %607 = vmatpush.bf16.msra.mxu0 %v995_v25 }
  0x45   : > { %621 = vmatpush.bf16.msra.mxu1 %v1003_v26 }
  0x46   : > { %635 = vmatpush.bf16.msra.mxu2 %v1011_v27 }
  0x47   : > { %649 = vmatpush.bf16.msra.mxu3 %v1019_v28 }
  0x48   : > { %608 = vmatpush.bf16.msra.mxu0 %v994_v29 }
  0x49   : > { %622 = vmatpush.bf16.msra.mxu1 %v1002_v30 }
  0x4a   : > { %636 = vmatpush.bf16.msra.mxu2 %v1010_v31 }
  0x4b   : > { %650 = vmatpush.bf16.msra.mxu3 %v1018_v32 }
  0x4c   : > { %609 = vmatpush.bf16.msra.mxu0 %v993_v33 }
  0x4d   : > { %623 = vmatpush.bf16.msra.mxu1 %v1001_v34 }
  0x4e   : > { %637 = vmatpush.bf16.msra.mxu2 %v1009_v35 }
  0x4f   : > { %651 = vmatpush.bf16.msra.mxu3 %v1017_v36  ;;  %610 = vmatmul.bf16.vlgmr.msra.gmra.mxu0 %v844_v45 }
  0x50   : > { %624 = vmatmul.bf16.vlgmr.msra.gmra.mxu1 %v848_v46 }
  0x51   : > { %638 = vmatmul.bf16.vlgmr.msra.gmra.mxu2 %v852_v47 }
  0x52   : > { %652 = vmatmul.bf16.vlgmr.msra.gmra.mxu3 %v856_v48 }
  0xcc   : > { %v611_v49 = vpop.f32.mrf.mxu0 }
  0xcd   : > { %v625_v50 = vpop.f32.mrf.mxu1 }
  0xce   : > { %v626_v51 = vadd.f32 %v625_v50, %v611_v49 }
  0xd4   : > { %v639_v52 = vpop.f32.mrf.mxu2  ;;  %v613_v57 = vpop.f32.mrf.mxu0 }
  0xd5   : > { %v653_v53 = vpop.f32.mrf.mxu3  ;;  %v640_v54 = vadd.f32 %v639_v52, %v626_v51  ;;  %v627_v58 = vpop.f32.mrf.mxu1 }
  0xd6   : > { %v628_v60 = vadd.f32 %v627_v58, %v613_v57 }
  0xd7   : > { %v654_v56 = vadd.f32 %v653_v53, %v640_v54 }
  0xd9   : > { %v658_v59 = vadd.f32 %v654_v56, %v320_v55 }
  0xdb   : > { %660 = vst [vmem:[#allocation2] sm:$0xff] %v658_v59 }
  0xdc   : > { %v641_v61 = vpop.f32.mrf.mxu2 }
  0xdd   : > { %v642_v62 = vadd.f32 %v641_v61, %v628_v60  ;;  %v655_v0 = vpop.f32.mrf.mxu3 }
  0xdf   : > { %v656_v1 = vadd.f32 %v655_v0, %v642_v62  ;;  %665 = sbr.rel (%p985_p13) target bundleno = 242 (0xf2), region = 63 }
  0xe1   : > { %v659_v2 = vadd.f32 %v656_v1, %v321_v63 }
  0xe3   : > { %661 = vst [vmem:[#allocation2 + $0x8] sm:$0xff] %v659_v2 }
  0xe4   : > { %v666_v3 = vld [vmem:[#allocation2] sm:$0xff] }
  0xe5   : > { %v1087_v5 = vld [vmem:[%s1312_s2] ss:$0 sm:$0xff] }
  0xe6   : > { %v672_v6 = vadd.f32 %v1087_v5, %v666_v3 }
  0xe8   : > { %v674_v8 = vmax.f32 %v672_v6, 0.0 }
  0xea   : > { %v667_v4 = vld [vmem:[#allocation2 + $0x8] sm:$0xff] }
  0xeb   : > { %v673_v7 = vadd.f32 %v1087_v5, %v667_v4 }
  0xed   : > { %v675_v9 = vmax.f32 %v673_v7, 0.0 }
  0xef   : > { %v1028_v10 = vpack.c.bf16 %v675_v9, %v674_v8 }
  0xf1   : > { %1029 = vst [vmem:[%s1234_s27] sm:$0xff] %v1028_v10  }
  0xf2 PF: > { %s13_s18 = sadd.s32 1, %s1142_s18   ;;  %s1314_s12 = smov %s1122_s13 }
  0xf3   : > { %p10_p0 = scmp.ge.s32.totalorder %s13_s18, 10   ;;  %s1315_s13 = smov %s1216_s25 }
  0xf4   : > { %s1316_s14 = smov %s1134_s16  ;;  %s1317_s15 = smov %s1138_s17 }
  0xf5   : > { %s1318_s16 = smov %s1321_s19  ;;  %s1319_s17 = smov %s1325_s20 }
  0xf6   :  { %12 = sbr.rel (!%p10_p0) target bundleno = 4 (0x4), region = 104 }

// kernel: bidirectional_flow_estimator.14
= control target key start
LH: loop header
LB: loop body
LE: loop exit
PB: predicated region body
PF: predicated region fallthrough
CT: control target
= control target key end

     0   :  { %s1178_s12 = smov 0   ;;  %s1180_s13 = smov 0   ;;  %s1274_s0 = inlined_call_operand.vmem [shape: bf16[4,32,512], index: 0, kind: input, shape index: {}]   ;;  %s1275_s1 = inlined_call_operand.vmem [shape: bf16[4,512,128], index: 1, kind: input, shape index: {}]   ;;  %s1276_s2 = inlined_call_operand.vmem [shape: f32[1,128], index: 2, kind: input, shape index: {}]   ;;  %s1277_s3 = inlined_call_operand.vmem [shape: bf16[4,32,128], index: 3, kind: output, shape index: {}]  }
   0x1   :  { %s1182_s14 = smov 0  }
   0x2 LB: > { %s39_s15 = sadd.s32 1, %s1152_s13  ;;  %p886_p0 = scmp.ge.s32.totalorder %s1156_s14, 1  ;;  %s1156_s14 = sphi %s1182_s14, %s13_s14   ;;  %s1152_s13 = sphi %s1180_s13, %s1279_s13   ;;  %s1148_s12 = sphi %s1178_s12, %s1278_s12  }
   0x3   : > { %p41_p1 = scmp.ge.s32.totalorder %s39_s15, 4  ;;  %p212_p2 = scmp.lt.s32.totalorder %s1156_s14, 5 }
   0x5   : > { %s1281_s15 = smov (%p41_p1, %s39_s15), 0  ;;  %p213_p3 = pnand %p886_p0, %p212_p2 }
   0x6   : > { %p269_p4 = scmp.lt.s32.totalorder (!%p213_p3), %s1148_s12, 3 }
   0x7   : > { %216 = sbr.rel (%p213_p3) target bundleno = 216 (0xd8), region = 32 }
   0xc   : > { %s1283_s12 = smov (!%p269_p4, %s1148_s12), 3 }
   0xd   : > { %s1056_s16 = sshll.u32 %s1283_s12, 8  ;;  %s1055_s20 = sshll.u32 %s1283_s12, 6 }
   0xe   : > { %s1202_s19 = scalar_lea.vmem %s1275_s1, %s1056_s16  ;;  %s1234_s23 = scalar_lea.vmem %s1274_s0, %s1055_s20 }
   0xf   : > { %v1073_v0 = vld [vmem:[%s1202_s19 + $0x38] sm:$0xff]  ;;  %v1072_v4 = vld [vmem:[%s1202_s19 + $0x30] sm:$0xff]  ;;  %v1071_v8 = vld [vmem:[%s1202_s19 + $0x28] sm:$0xff]  ;;  %s1057_s26 = sshll.u32 %s1283_s12, 4 }
  0x10   : > { %v1081_v1 = vld [vmem:[%s1202_s19 + $0x78] sm:$0xff]  ;;  %628 = vmatpush.bf16.msra.mxu0 %v1073_v0  ;;  %v1080_v5 = vld [vmem:[%s1202_s19 + $0x70] sm:$0xff]  ;;  %v1079_v9 = vld [vmem:[%s1202_s19 + $0x68] sm:$0xff]  ;;  %s310_s29 = scalar_lea.vmem %s1277_s3, %s1057_s26 }
  0x11   : > { %v1089_v2 = vld [vmem:[%s1202_s19 + $0xb8] sm:$0xff]  ;;  %647 = vmatpush.bf16.msra.mxu1 %v1081_v1  ;;  %v1088_v6 = vld [vmem:[%s1202_s19 + $0xb0] sm:$0xff]  ;;  %v1087_v10 = vld [vmem:[%s1202_s19 + $0xa8] sm:$0xff] }
  0x12   : > { %v1097_v3 = vld [vmem:[%s1202_s19 + $0xf8] sm:$0xff]  ;;  %666 = vmatpush.bf16.msra.mxu2 %v1089_v2  ;;  %v1096_v7 = vld [vmem:[%s1202_s19 + $0xf0] sm:$0xff]  ;;  %v1095_v11 = vld [vmem:[%s1202_s19 + $0xe8] sm:$0xff] }
  0x13   : > { %685 = vmatpush.bf16.msra.mxu3 %v1097_v3  ;;  %v1070_v12 = vld [vmem:[%s1202_s19 + $0x20] sm:$0xff]  ;;  %v1069_v16 = vld [vmem:[%s1202_s19 + $0x18] sm:$0xff]  ;;  %v1068_v20 = vld [vmem:[%s1202_s19 + $0x10] sm:$0xff] }
  0x14   : > { %629 = vmatpush.bf16.msra.mxu0 %v1072_v4  ;;  %v1078_v13 = vld [vmem:[%s1202_s19 + $0x60] sm:$0xff]  ;;  %v1077_v17 = vld [vmem:[%s1202_s19 + $0x58] sm:$0xff]  ;;  %v1076_v21 = vld [vmem:[%s1202_s19 + $0x50] sm:$0xff] }
  0x15   : > { %648 = vmatpush.bf16.msra.mxu1 %v1080_v5  ;;  %v1086_v14 = vld [vmem:[%s1202_s19 + $0xa0] sm:$0xff]  ;;  %v1085_v18 = vld [vmem:[%s1202_s19 + $0x98] sm:$0xff]  ;;  %v1084_v22 = vld [vmem:[%s1202_s19 + $0x90] sm:$0xff] }
  0x16   : > { %667 = vmatpush.bf16.msra.mxu2 %v1088_v6  ;;  %v1094_v15 = vld [vmem:[%s1202_s19 + $0xe0] sm:$0xff]  ;;  %v1093_v19 = vld [vmem:[%s1202_s19 + $0xd8] sm:$0xff]  ;;  %v1092_v23 = vld [vmem:[%s1202_s19 + $0xd0] sm:$0xff] }
  0x17   : > { %686 = vmatpush.bf16.msra.mxu3 %v1096_v7  ;;  %v1067_v24 = vld [vmem:[%s1202_s19 + $0x8] sm:$0xff]  ;;  %v1066_v28 = vld [vmem:[%s1202_s19] sm:$0xff]  ;;  %v1060_v33 = vld [vmem:[%s1234_s23 + $0xc] sm:$0xf0] }
  0x18   : > { %630 = vmatpush.bf16.msra.mxu0 %v1071_v8  ;;  %v1075_v25 = vld [vmem:[%s1202_s19 + $0x48] sm:$0xff]  ;;  %v1074_v29 = vld [vmem:[%s1202_s19 + $0x40] sm:$0xff]  ;;  %v897_v35 = vld [vmem:[%s1234_s23 + $0x10] sm:$0xf0] }
  0x19   : > { %649 = vmatpush.bf16.msra.mxu1 %v1079_v9  ;;  %v1083_v26 = vld [vmem:[%s1202_s19 + $0x88] sm:$0xff]  ;;  %v1082_v30 = vld [vmem:[%s1202_s19 + $0x80] sm:$0xff]  ;;  %v1061_v37 = vld [vmem:[%s1234_s23 + $0x14] sm:$0xf0] }
  0x1a   : > { %668 = vmatpush.bf16.msra.mxu2 %v1087_v10  ;;  %v1091_v27 = vld [vmem:[%s1202_s19 + $0xc8] sm:$0xff]  ;;  %v1090_v31 = vld [vmem:[%s1202_s19 + $0xc0] sm:$0xff]  ;;  %v905_v39 = vld [vmem:[%s1234_s23 + $0x18] sm:$0xf0] }
  0x1b   : > { %687 = vmatpush.bf16.msra.mxu3 %v1095_v11  ;;  %v895_v32 = vld [vmem:[%s1234_s23] sm:$0xf]  ;;  %v1058_v34 = vld [vmem:[%s1234_s23 + $0x4] sm:$0xf]  ;;  %v903_v36 = vld [vmem:[%s1234_s23 + $0x8] sm:$0xf] }
  0x1c   : > { %631 = vmatpush.bf16.msra.mxu0 %v1070_v12  ;;  %v1059_v38 = vld [vmem:[%s1234_s23 + $0xc] sm:$0xf]  ;;  %v896_v40 = vor.u32 %v1060_v33, %v895_v32  ;;  %v900_v41 = vor.u32 %v1058_v34, %v897_v35  ;;  %v904_v42 = vor.u32 %v1061_v37, %v903_v36  ;;  %v911_v44 = vld [vmem:[%s1234_s23 + $0x20] sm:$0xf]  ;;  %v1064_v45 = vld [vmem:[%s1234_s23 + $0x2c] sm:$0xf0] }
  0x1d   : > { %650 = vmatpush.bf16.msra.mxu1 %v1078_v13  ;;  %v908_v43 = vor.u32 %v1059_v38, %v905_v39  ;;  %v1062_v46 = vld [vmem:[%s1234_s23 + $0x24] sm:$0xf]  ;;  %v913_v47 = vld [vmem:[%s1234_s23 + $0x30] sm:$0xf0]  ;;  %v919_v48 = vld [vmem:[%s1234_s23 + $0x28] sm:$0xf]  ;;  %v912_v52 = vor.u32 %v1064_v45, %v911_v44 }
  0x1e   : > { %669 = vmatpush.bf16.msra.mxu2 %v1086_v14  ;;  %v1065_v49 = vld [vmem:[%s1234_s23 + $0x34] sm:$0xf0]  ;;  %v1063_v50 = vld [vmem:[%s1234_s23 + $0x2c] sm:$0xf]  ;;  %v921_v51 = vld [vmem:[%s1234_s23 + $0x38] sm:$0xf0]  ;;  %v916_v53 = vor.u32 %v1062_v46, %v913_v47 }
  0x1f   : > { %688 = vmatpush.bf16.msra.mxu3 %v1094_v15  ;;  %v920_v54 = vor.u32 %v1065_v49, %v919_v48  ;;  %v924_v55 = vor.u32 %v1063_v50, %v921_v51  ;;  %v1133_v1 = vld [vmem:[%s1276_s2] ss:$0 sm:$0xff] }
  0x20   : > { %632 = vmatpush.bf16.msra.mxu0 %v1069_v16 }
  0x21   : > { %651 = vmatpush.bf16.msra.mxu1 %v1077_v17 }
  0x22   : > { %670 = vmatpush.bf16.msra.mxu2 %v1085_v18 }
  0x23   : > { %689 = vmatpush.bf16.msra.mxu3 %v1093_v19 }
  0x24   : > { %633 = vmatpush.bf16.msra.mxu0 %v1068_v20 }
  0x25   : > { %652 = vmatpush.bf16.msra.mxu1 %v1076_v21 }
  0x26   : > { %671 = vmatpush.bf16.msra.mxu2 %v1084_v22 }
  0x27   : > { %690 = vmatpush.bf16.msra.mxu3 %v1092_v23 }
  0x28   : > { %634 = vmatpush.bf16.msra.mxu0 %v1067_v24 }
  0x29   : > { %653 = vmatpush.bf16.msra.mxu1 %v1075_v25 }
  0x2a   : > { %672 = vmatpush.bf16.msra.mxu2 %v1083_v26 }
  0x2b   : > { %691 = vmatpush.bf16.msra.mxu3 %v1091_v27 }
  0x2c   : > { %635 = vmatpush.bf16.msra.mxu0 %v1066_v28 }
  0x2d   : > { %654 = vmatpush.bf16.msra.mxu1 %v1074_v29 }
  0x2e   : > { %673 = vmatpush.bf16.msra.mxu2 %v1082_v30 }
  0x2f   : > { %692 = vmatpush.bf16.msra.mxu3 %v1090_v31  ;;  %636 = vmatmul.bf16.vlgmr.msra.gmra.mxu0 %v896_v40 }
  0x30   : > { %655 = vmatmul.bf16.vlgmr.msra.gmra.mxu1 %v900_v41 }
  0x31   : > { %674 = vmatmul.bf16.vlgmr.msra.gmra.mxu2 %v904_v42 }
  0x32   : > { %693 = vmatmul.bf16.vlgmr.msra.gmra.mxu3 %v908_v43 }
  0x3f   : > { %641 = vmatmul.bf16.gmra.mxu0 %v912_v52 }
  0x40   : > { %660 = vmatmul.bf16.gmra.mxu1 %v916_v53 }
  0x41   : > { %679 = vmatmul.bf16.gmra.mxu2 %v920_v54 }
  0x42   : > { %698 = vmatmul.bf16.gmra.mxu3 %v924_v55 }
  0xac   : > { %v637_v56 = vpop.f32.mrf.mxu0 }
  0xad   : > { %v656_v57 = vpop.f32.mrf.mxu1 }
  0xae   : > { %v657_v58 = vadd.f32 %v656_v57, %v637_v56 }
  0xb4   : > { %v675_v59 = vpop.f32.mrf.mxu2  ;;  %v639_v61 = vpop.f32.mrf.mxu0 }
  0xb5   : > { %v694_v60 = vpop.f32.mrf.mxu3  ;;  %v658_v62 = vpop.f32.mrf.mxu1  ;;  %v676_v63 = vadd.f32 %v675_v59, %v657_v58 }
  0xb6   : > { %v659_v2 = vadd.f32 %v658_v62, %v639_v61 }
  0xb7   : > { %v695_v0 = vadd.f32 %v694_v60, %v676_v63 }
  0xb9   : > { %v723_v8 = vadd.f32 %v1133_v1, %v695_v0 }
  0xbb   : > { %v727_v11 = vmax.f32 %v723_v8, 0.0 }
  0xbc   : > { %v677_v3 = vpop.f32.mrf.mxu2  ;;  %v642_v6 = vpop.f32.mrf.mxu0 }
  0xbd   : > { %v696_v4 = vpop.f32.mrf.mxu3  ;;  %v678_v5 = vadd.f32 %v677_v3, %v659_v2  ;;  %v661_v7 = vpop.f32.mrf.mxu1 }
  0xbe   : > { %v662_v13 = vadd.f32 %v661_v7, %v642_v6 }
  0xbf   : > { %v697_v9 = vadd.f32 %v696_v4, %v678_v5 }
  0xc1   : > { %v724_v10 = vadd.f32 %v1133_v1, %v697_v9 }
  0xc3   : > { %v728_v12 = vmax.f32 %v724_v10, 0.0 }
  0xc4   : > { %v680_v14 = vpop.f32.mrf.mxu2  ;;  %v644_v18 = vpop.f32.mrf.mxu0 }
  0xc5   : > { %v699_v15 = vpop.f32.mrf.mxu3  ;;  %v1101_v16 = vpack.c.bf16 %v728_v12, %v727_v11  ;;  %v681_v17 = vadd.f32 %v680_v14, %v662_v13  ;;  %v663_v19 = vpop.f32.mrf.mxu1 }
  0xc6   : > { %v664_v21 = vadd.f32 %v663_v19, %v644_v18 }
  0xc7   : > { %1102 = vst [vmem:[%s310_s29] sm:$0xff] %v1101_v16   ;;  %v700_v20 = vadd.f32 %v699_v15, %v681_v17 }
  0xc9   : > { %v725_v25 = vadd.f32 %v1133_v1, %v700_v20 }
  0xcb   : > { %v729_v28 = vmax.f32 %v725_v25, 0.0 }
  0xcc   : > { %v682_v22 = vpop.f32.mrf.mxu2 }
  0xcd   : > { %v683_v23 = vadd.f32 %v682_v22, %v664_v21  ;;  %v701_v24 = vpop.f32.mrf.mxu3 }
  0xcf   : > { %v702_v26 = vadd.f32 %v701_v24, %v683_v23 }
  0xd1   : > { %v726_v27 = vadd.f32 %v1133_v1, %v702_v26 }
  0xd3   : > { %v730_v29 = vmax.f32 %v726_v27, 0.0 }
  0xd5   : > { %v1106_v30 = vpack.c.bf16 %v730_v29, %v729_v28 }
  0xd7   : > { %1108 = vst [vmem:[%s310_s29 + $0x8] sm:$0xff] %v1106_v30  }
  0xd8 PF: > { %s13_s14 = sadd.s32 1, %s1156_s14   ;;  %s1278_s12 = smov %s1152_s13 }
  0xd9   : > { %p10_p5 = scmp.ge.s32.totalorder %s13_s14, 6   ;;  %s1279_s13 = smov %s1281_s15 }
  0xdb   :  { %12 = sbr.rel (!%p10_p5) target bundleno = 2 (0x2), region = 76 }

// kernel: bidirectional_flow_estimator.15
= control target key start
LH: loop header
LB: loop body
LE: loop exit
PB: predicated region body
PF: predicated region fallthrough
CT: control target
= control target key end

     0   :  { %s1161_s12 = smov 0   ;;  %s1163_s13 = smov 0   ;;  %s1293_s0 = inlined_call_operand.vmem [shape: bf16[4,128,256], index: 0, kind: input, shape index: {}]   ;;  %s1294_s1 = inlined_call_operand.vmem [shape: bf16[4,256,128], index: 1, kind: input, shape index: {}]   ;;  %s1295_s2 = inlined_call_operand.vmem [shape: f32[1,128], index: 2, kind: input, shape index: {}]   ;;  %s1296_s3 = inlined_call_operand.vmem [shape: f32[4,128,128], index: 3, kind: output, shape index: {}]  }
   0x1   :  { %s1165_s14 = smov 0  }
   0x2 LB: > { %s39_s15 = sadd.s32 1, %s1135_s13  ;;  %p904_p0 = scmp.ge.s32.totalorder %s1139_s14, 1  ;;  %s1139_s14 = sphi %s1165_s14, %s13_s14   ;;  %s1135_s13 = sphi %s1163_s13, %s1298_s13   ;;  %s1131_s12 = sphi %s1161_s12, %s1297_s12  }
   0x3   : > { %p41_p1 = scmp.ge.s32.totalorder %s39_s15, 4  ;;  %p212_p2 = scmp.lt.s32.totalorder %s1139_s14, 5 }
   0x5   : > { %s1300_s15 = smov (%p41_p1, %s39_s15), 0  ;;  %p213_p3 = pnand %p904_p0, %p212_p2 }
   0x6   : > { %p269_p4 = scmp.lt.s32.totalorder (!%p213_p3), %s1131_s12, 3 }
   0x7   : > { %216 = sbr.rel (%p213_p3) target bundleno = 241 (0xf1), region = 32 }
   0xc   : > { %s1302_s12 = smov (!%p269_p4, %s1131_s12), 3 }
   0xd   : > { %s1179_s16 = sshll.u32 %s1302_s12, 7 }
   0xe   : > { %s1185_s19 = scalar_lea.vmem %s1294_s1, %s1179_s16  ;;  %s1204_s22 = scalar_lea.vmem %s1293_s0, %s1179_s16 }
   0xf   : > { %v1067_v0 = vld [vmem:[%s1185_s19 + $0x38] sm:$0xff]  ;;  %v1066_v2 = vld [vmem:[%s1185_s19 + $0x30] sm:$0xff]  ;;  %v1065_v4 = vld [vmem:[%s1185_s19 + $0x28] sm:$0xff]  ;;  %s1250_s27 = scalar_lea.vmem %s1296_s3, %s1179_s16 }
  0x10   : > { %v1075_v1 = vld [vmem:[%s1185_s19 + $0x78] sm:$0xff]  ;;  %572 = vmatpush.bf16.msra.mxu0 %v1067_v0  ;;  %1076 = vmatpush.bf16.msra.mxu2 %v1067_v0  ;;  %v1074_v3 = vld [vmem:[%s1185_s19 + $0x70] sm:$0xff]  ;;  %v1073_v5 = vld [vmem:[%s1185_s19 + $0x68] sm:$0xff] }
  0x11   : > { %621 = vmatpush.bf16.msra.mxu1 %v1075_v1  ;;  %1084 = vmatpush.bf16.msra.mxu3 %v1075_v1  ;;  %v1064_v6 = vld [vmem:[%s1185_s19 + $0x20] sm:$0xff]  ;;  %v1063_v8 = vld [vmem:[%s1185_s19 + $0x18] sm:$0xff]  ;;  %v1062_v10 = vld [vmem:[%s1185_s19 + $0x10] sm:$0xff] }
  0x12   : > { %v1072_v7 = vld [vmem:[%s1185_s19 + $0x60] sm:$0xff]  ;;  %v1071_v9 = vld [vmem:[%s1185_s19 + $0x58] sm:$0xff]  ;;  %v1070_v11 = vld [vmem:[%s1185_s19 + $0x50] sm:$0xff] }
  0x13   : > { %v1061_v12 = vld [vmem:[%s1185_s19 + $0x8] sm:$0xff]  ;;  %v1060_v14 = vld [vmem:[%s1185_s19] sm:$0xff]  ;;  %v921_v28 = vld [vmem:[%s1204_s22 + $0x10] sm:$0xf] }
  0x14   : > { %573 = vmatpush.bf16.msra.mxu0 %v1066_v2  ;;  %1077 = vmatpush.bf16.msra.mxu2 %v1066_v2  ;;  %v1069_v13 = vld [vmem:[%s1185_s19 + $0x48] sm:$0xff]  ;;  %v1068_v15 = vld [vmem:[%s1185_s19 + $0x40] sm:$0xff]  ;;  %v1047_v29 = vld [vmem:[%s1204_s22 + $0x14] sm:$0xf0] }
  0x15   : > { %622 = vmatpush.bf16.msra.mxu1 %v1074_v3  ;;  %1085 = vmatpush.bf16.msra.mxu3 %v1074_v3  ;;  %v913_v16 = vld [vmem:[%s1204_s22] sm:$0xf]  ;;  %v1045_v17 = vld [vmem:[%s1204_s22 + $0x4] sm:$0xf0]  ;;  %v1044_v20 = vld [vmem:[%s1204_s22 + $0x4] sm:$0xf]  ;;  %v922_v36 = vor.u32 %v1047_v29, %v921_v28 }
  0x16   : > { %v945_v18 = vld [vmem:[%s1204_s22 + $0x40] sm:$0xf]  ;;  %v1053_v19 = vld [vmem:[%s1204_s22 + $0x44] sm:$0xf0]  ;;  %v915_v21 = vld [vmem:[%s1204_s22 + $0x8] sm:$0xf0]  ;;  %v914_v24 = vor.u32 %v1045_v17, %v913_v16 }
  0x17   : > { %v1052_v22 = vld [vmem:[%s1204_s22 + $0x44] sm:$0xf]  ;;  %v947_v23 = vld [vmem:[%s1204_s22 + $0x48] sm:$0xf0]  ;;  %v946_v25 = vor.u32 %v1053_v19, %v945_v18  ;;  %v918_v26 = vor.u32 %v1044_v20, %v915_v21  ;;  %v953_v30 = vld [vmem:[%s1204_s22 + $0x50] sm:$0xf] }
  0x18   : > { %574 = vmatpush.bf16.msra.mxu0 %v1065_v4  ;;  %1078 = vmatpush.bf16.msra.mxu2 %v1065_v4  ;;  %v950_v27 = vor.u32 %v1052_v22, %v947_v23  ;;  %v1055_v31 = vld [vmem:[%s1204_s22 + $0x54] sm:$0xf0]  ;;  %v1046_v32 = vld [vmem:[%s1204_s22 + $0x14] sm:$0xf]  ;;  %v923_v33 = vld [vmem:[%s1204_s22 + $0x18] sm:$0xf0] }
  0x19   : > { %623 = vmatpush.bf16.msra.mxu1 %v1073_v5  ;;  %1086 = vmatpush.bf16.msra.mxu3 %v1073_v5  ;;  %v1054_v34 = vld [vmem:[%s1204_s22 + $0x54] sm:$0xf]  ;;  %v955_v35 = vld [vmem:[%s1204_s22 + $0x58] sm:$0xf0]  ;;  %v954_v37 = vor.u32 %v1055_v31, %v953_v30  ;;  %v926_v38 = vor.u32 %v1046_v32, %v923_v33  ;;  %v929_v40 = vld [vmem:[%s1204_s22 + $0x20] sm:$0xf] }
  0x1a   : > { %v958_v39 = vor.u32 %v1054_v34, %v955_v35  ;;  %v1049_v41 = vld [vmem:[%s1204_s22 + $0x24] sm:$0xf0]  ;;  %v961_v42 = vld [vmem:[%s1204_s22 + $0x60] sm:$0xf]  ;;  %v1048_v44 = vld [vmem:[%s1204_s22 + $0x24] sm:$0xf] }
  0x1b   : > { %v1057_v43 = vld [vmem:[%s1204_s22 + $0x64] sm:$0xf0]  ;;  %v931_v45 = vld [vmem:[%s1204_s22 + $0x28] sm:$0xf0]  ;;  %v1056_v46 = vld [vmem:[%s1204_s22 + $0x64] sm:$0xf]  ;;  %v930_v48 = vor.u32 %v1049_v41, %v929_v40 }
  0x1c   : > { %575 = vmatpush.bf16.msra.mxu0 %v1064_v6  ;;  %1079 = vmatpush.bf16.msra.mxu2 %v1064_v6  ;;  %v963_v47 = vld [vmem:[%s1204_s22 + $0x68] sm:$0xf0]  ;;  %v962_v49 = vor.u32 %v1057_v43, %v961_v42  ;;  %v934_v50 = vor.u32 %v1048_v44, %v931_v45  ;;  %v937_v52 = vld [vmem:[%s1204_s22 + $0x30] sm:$0xf]  ;;  %v1051_v53 = vld [vmem:[%s1204_s22 + $0x34] sm:$0xf0] }
  0x1d   : > { %624 = vmatpush.bf16.msra.mxu1 %v1072_v7  ;;  %1087 = vmatpush.bf16.msra.mxu3 %v1072_v7  ;;  %v966_v51 = vor.u32 %v1056_v46, %v963_v47  ;;  %v969_v54 = vld [vmem:[%s1204_s22 + $0x70] sm:$0xf]  ;;  %v1059_v55 = vld [vmem:[%s1204_s22 + $0x74] sm:$0xf0]  ;;  %v1050_v56 = vld [vmem:[%s1204_s22 + $0x34] sm:$0xf]  ;;  %v938_v60 = vor.u32 %v1051_v53, %v937_v52 }
  0x1e   : > { %v939_v57 = vld [vmem:[%s1204_s22 + $0x38] sm:$0xf0]  ;;  %v1058_v58 = vld [vmem:[%s1204_s22 + $0x74] sm:$0xf]  ;;  %v970_v61 = vor.u32 %v1059_v55, %v969_v54  ;;  %v1244_v1 = vld [vmem:[%s1295_s2] ss:$0 sm:$0xff] }
  0x1f   : > { %v971_v59 = vld [vmem:[%s1204_s22 + $0x78] sm:$0xf0]  ;;  %v942_v62 = vor.u32 %v1050_v56, %v939_v57 }
  0x20   : > { %576 = vmatpush.bf16.msra.mxu0 %v1063_v8  ;;  %1080 = vmatpush.bf16.msra.mxu2 %v1063_v8  ;;  %v974_v63 = vor.u32 %v1058_v58, %v971_v59 }
  0x21   : > { %625 = vmatpush.bf16.msra.mxu1 %v1071_v9  ;;  %1088 = vmatpush.bf16.msra.mxu3 %v1071_v9 }
  0x24   : > { %577 = vmatpush.bf16.msra.mxu0 %v1062_v10  ;;  %1081 = vmatpush.bf16.msra.mxu2 %v1062_v10 }
  0x25   : > { %626 = vmatpush.bf16.msra.mxu1 %v1070_v11  ;;  %1089 = vmatpush.bf16.msra.mxu3 %v1070_v11 }
  0x28   : > { %578 = vmatpush.bf16.msra.mxu0 %v1061_v12  ;;  %1082 = vmatpush.bf16.msra.mxu2 %v1061_v12 }
  0x29   : > { %627 = vmatpush.bf16.msra.mxu1 %v1069_v13  ;;  %1090 = vmatpush.bf16.msra.mxu3 %v1069_v13 }
  0x2c   : > { %579 = vmatpush.bf16.msra.mxu0 %v1060_v14  ;;  %1083 = vmatpush.bf16.msra.mxu2 %v1060_v14 }
  0x2d   : > { %628 = vmatpush.bf16.msra.mxu1 %v1068_v15  ;;  %1091 = vmatpush.bf16.msra.mxu3 %v1068_v15 }
  0x2f   : > { %580 = vmatmul.bf16.vlgmr.msra.gmra.mxu0 %v914_v24  ;;  %600 = vmatmul.bf16.vlgmr.msra.gmra.mxu2 %v946_v25 }
  0x30   : > { %629 = vmatmul.bf16.vlgmr.msra.gmra.mxu1 %v918_v26  ;;  %649 = vmatmul.bf16.vlgmr.msra.gmra.mxu3 %v950_v27 }
  0x3f   : > { %585 = vmatmul.bf16.gmra.mxu0 %v922_v36  ;;  %605 = vmatmul.bf16.gmra.mxu2 %v954_v37 }
  0x40   : > { %634 = vmatmul.bf16.gmra.mxu1 %v926_v38  ;;  %654 = vmatmul.bf16.gmra.mxu3 %v958_v39 }
  0x4f   : > { %590 = vmatmul.bf16.gmra.mxu0 %v930_v48  ;;  %610 = vmatmul.bf16.gmra.mxu2 %v962_v49 }
  0x50   : > { %639 = vmatmul.bf16.gmra.mxu1 %v934_v50  ;;  %659 = vmatmul.bf16.gmra.mxu3 %v966_v51 }
  0x5f   : > { %595 = vmatmul.bf16.gmra.mxu0 %v938_v60  ;;  %615 = vmatmul.bf16.gmra.mxu2 %v970_v61 }
  0x60   : > { %644 = vmatmul.bf16.gmra.mxu1 %v942_v62  ;;  %664 = vmatmul.bf16.gmra.mxu3 %v974_v63 }
  0xac   : > { %v581_v0 = vpop.f32.mrf.mxu0 }
  0xad   : > { %v630_v2 = vpop.f32.mrf.mxu1 }
  0xae   : > { %v631_v3 = vadd.f32 %v630_v2, %v581_v0 }
  0xb0   : > { %v725_v4 = vadd.f32 %v1244_v1, %v631_v3 }
  0xb2   : > { %741 = vst [vmem:[%s1250_s27] sm:$0xff] %v725_v4  ;;  %v601_v5 = vpop.f32.mrf.mxu2 }
  0xb3   : > { %v650_v6 = vpop.f32.mrf.mxu3 }
  0xb4   : > { %v651_v7 = vadd.f32 %v650_v6, %v601_v5  ;;  %v583_v8 = vpop.f32.mrf.mxu0 }
  0xb5   : > { %v632_v9 = vpop.f32.mrf.mxu1 }
  0xb6   : > { %v733_v10 = vadd.f32 %v1244_v1, %v651_v7  ;;  %v633_v11 = vadd.f32 %v632_v9, %v583_v8 }
  0xb8   : > { %749 = vst [vmem:[%s1250_s27 + $0x40] sm:$0xff] %v733_v10  ;;  %v726_v12 = vadd.f32 %v1244_v1, %v633_v11 }
  0xba   : > { %742 = vst [vmem:[%s1250_s27 + $0x8] sm:$0xff] %v726_v12  ;;  %v603_v13 = vpop.f32.mrf.mxu2 }
  0xbb   : > { %v652_v14 = vpop.f32.mrf.mxu3 }
  0xbc   : > { %v653_v15 = vadd.f32 %v652_v14, %v603_v13  ;;  %v586_v16 = vpop.f32.mrf.mxu0 }
  0xbd   : > { %v635_v17 = vpop.f32.mrf.mxu1 }
  0xbe   : > { %v734_v18 = vadd.f32 %v1244_v1, %v653_v15  ;;  %v636_v19 = vadd.f32 %v635_v17, %v586_v16 }
  0xc0   : > { %750 = vst [vmem:[%s1250_s27 + $0x48] sm:$0xff] %v734_v18  ;;  %v727_v20 = vadd.f32 %v1244_v1, %v636_v19 }
  0xc2   : > { %743 = vst [vmem:[%s1250_s27 + $0x10] sm:$0xff] %v727_v20  ;;  %v606_v21 = vpop.f32.mrf.mxu2 }
  0xc3   : > { %v655_v22 = vpop.f32.mrf.mxu3 }
  0xc4   : > { %v656_v23 = vadd.f32 %v655_v22, %v606_v21  ;;  %v588_v24 = vpop.f32.mrf.mxu0 }
  0xc5   : > { %v637_v25 = vpop.f32.mrf.mxu1 }
  0xc6   : > { %v735_v26 = vadd.f32 %v1244_v1, %v656_v23  ;;  %v638_v27 = vadd.f32 %v637_v25, %v588_v24 }
  0xc8   : > { %751 = vst [vmem:[%s1250_s27 + $0x50] sm:$0xff] %v735_v26  ;;  %v728_v28 = vadd.f32 %v1244_v1, %v638_v27 }
  0xca   : > { %744 = vst [vmem:[%s1250_s27 + $0x18] sm:$0xff] %v728_v28  ;;  %v608_v29 = vpop.f32.mrf.mxu2 }
  0xcb   : > { %v657_v30 = vpop.f32.mrf.mxu3 }
  0xcc   : > { %v658_v31 = vadd.f32 %v657_v30, %v608_v29  ;;  %v591_v32 = vpop.f32.mrf.mxu0 }
  0xcd   : > { %v640_v33 = vpop.f32.mrf.mxu1 }
  0xce   : > { %v736_v34 = vadd.f32 %v1244_v1, %v658_v31  ;;  %v641_v35 = vadd.f32 %v640_v33, %v591_v32 }
  0xd0   : > { %752 = vst [vmem:[%s1250_s27 + $0x58] sm:$0xff] %v736_v34  ;;  %v729_v36 = vadd.f32 %v1244_v1, %v641_v35 }
  0xd2   : > { %745 = vst [vmem:[%s1250_s27 + $0x20] sm:$0xff] %v729_v36  ;;  %v611_v37 = vpop.f32.mrf.mxu2 }
  0xd3   : > { %v660_v38 = vpop.f32.mrf.mxu3 }
  0xd4   : > { %v661_v39 = vadd.f32 %v660_v38, %v611_v37  ;;  %v593_v40 = vpop.f32.mrf.mxu0 }
  0xd5   : > { %v642_v41 = vpop.f32.mrf.mxu1 }
  0xd6   : > { %v737_v42 = vadd.f32 %v1244_v1, %v661_v39  ;;  %v643_v43 = vadd.f32 %v642_v41, %v593_v40 }
  0xd8   : > { %753 = vst [vmem:[%s1250_s27 + $0x60] sm:$0xff] %v737_v42  ;;  %v730_v44 = vadd.f32 %v1244_v1, %v643_v43 }
  0xda   : > { %746 = vst [vmem:[%s1250_s27 + $0x28] sm:$0xff] %v730_v44  ;;  %v613_v45 = vpop.f32.mrf.mxu2 }
  0xdb   : > { %v662_v46 = vpop.f32.mrf.mxu3 }
  0xdc   : > { %v663_v47 = vadd.f32 %v662_v46, %v613_v45  ;;  %v596_v48 = vpop.f32.mrf.mxu0 }
  0xdd   : > { %v645_v49 = vpop.f32.mrf.mxu1 }
  0xde   : > { %v738_v50 = vadd.f32 %v1244_v1, %v663_v47  ;;  %v646_v51 = vadd.f32 %v645_v49, %v596_v48 }
  0xe0   : > { %754 = vst [vmem:[%s1250_s27 + $0x68] sm:$0xff] %v738_v50  ;;  %v731_v52 = vadd.f32 %v1244_v1, %v646_v51 }
  0xe2   : > { %747 = vst [vmem:[%s1250_s27 + $0x30] sm:$0xff] %v731_v52  ;;  %v616_v53 = vpop.f32.mrf.mxu2 }
  0xe3   : > { %v665_v54 = vpop.f32.mrf.mxu3 }
  0xe4   : > { %v666_v55 = vadd.f32 %v665_v54, %v616_v53  ;;  %v598_v56 = vpop.f32.mrf.mxu0 }
  0xe5   : > { %v647_v57 = vpop.f32.mrf.mxu1 }
  0xe6   : > { %v739_v58 = vadd.f32 %v1244_v1, %v666_v55  ;;  %v648_v59 = vadd.f32 %v647_v57, %v598_v56 }
  0xe8   : > { %755 = vst [vmem:[%s1250_s27 + $0x70] sm:$0xff] %v739_v58  ;;  %v732_v60 = vadd.f32 %v1244_v1, %v648_v59 }
  0xea   : > { %748 = vst [vmem:[%s1250_s27 + $0x38] sm:$0xff] %v732_v60  ;;  %v618_v61 = vpop.f32.mrf.mxu2 }
  0xeb   : > { %v667_v62 = vpop.f32.mrf.mxu3 }
  0xec   : > { %v668_v63 = vadd.f32 %v667_v62, %v618_v61 }
  0xee   : > { %v740_v0 = vadd.f32 %v1244_v1, %v668_v63 }
  0xf0   : > { %756 = vst [vmem:[%s1250_s27 + $0x78] sm:$0xff] %v740_v0 }
  0xf1 PF: > { %s13_s14 = sadd.s32 1, %s1139_s14   ;;  %s1297_s12 = smov %s1135_s13 }
  0xf2   : > { %p10_p5 = scmp.ge.s32.totalorder %s13_s14, 6   ;;  %s1298_s13 = smov %s1300_s15 }
  0xf4   :  { %12 = sbr.rel (!%p10_p5) target bundleno = 2 (0x2), region = 76 }

</bundles_post_ra>
